<compile_context>
chip_gen: v6e
topology: v6e:2x2x1
jax: 0.10.0
libtpu: 0.0.40
codegen_flags: <defaults>
</compile_context>

<pallas_src>
import math

import jax
import jax.numpy as jnp
from jax.experimental import pallas as pl
from jax.experimental.pallas import tpu as pltpu


# ----------------------------------------------------------------------------
# Fused DRRN forward kernel (bi-LSTM stack + q epilogue), built for static
# sizes T (seq len), N (actions), H (hidden), L (layers).
#
# Ref layout (inputs..., outputs..., scratch...):
#   x_ref                        (T*B, E)   f32   time-major rows: r = t*B + b
#   per layer l in [0, L):
#     wih_ref    (D_l, 8H)  bf16   columns [0:4H] fwd gates, [4H:8H] bwd gates
#     whhf_ref   (H, 4H)    bf16
#     whhb_ref   (H, 4H)    bf16
#     b_ref      (1, 8H)    f32    (b_ih + b_hh, fwd then bwd)
#   q_ref                        (N, 1)     f32
#   hs_scr                       (T*B, 2H)  f32   next-layer input (fwd | bwd)
# Gate order matches PyTorch nn.LSTM: [i, f, g, o].
# ----------------------------------------------------------------------------
def _make_drrn_kernel(T: int, N: int, H: int, L: int):
    B = 2 * N          # states [0:N) and actions [N:2N) batched together
    G = 4 * H          # gates per direction

    def cell(gates, c_prev):
        # gate slicing at H-lane granularity; acceptable VALU/XLU cost here.
        i = jax.nn.sigmoid(gates[:, 0 * H:1 * H])
        f = jax.nn.sigmoid(gates[:, 1 * H:2 * H])
        g = jnp.tanh(gates[:, 2 * H:3 * H])
        o = jax.nn.sigmoid(gates[:, 3 * H:4 * H])
        c = f * c_prev + i * g
        return o * jnp.tanh(c), c

    def kernel(*refs):
        x_ref = refs[0]
        w_refs = refs[1:1 + 4 * L]
        q_ref = refs[1 + 4 * L]
        hs_scr = refs[2 + 4 * L]

        xs_bf16 = x_ref[...].astype(jnp.bfloat16)            # (T*B, D0)
        h_f = h_b = None
        for l in range(L):
            wih = w_refs[4 * l + 0][...]                      # (D_l, 8H) bf16
            whh_f = w_refs[4 * l + 1][...]                    # (H, 4H)   bf16
            whh_b = w_refs[4 * l + 2][...]                    # (H, 4H)   bf16
            bias = w_refs[4 * l + 3][...]                     # (1, 8H)   f32

            # Hoisted input projection for BOTH directions: one GEMM per layer.
            gx = jnp.dot(xs_bf16, wih,
                         preferred_element_type=jnp.float32) + bias  # (T*B, 8H)

            h_f = jnp.zeros((B, H), jnp.float32)
            c_f = jnp.zeros((B, H), jnp.float32)
            h_b = jnp.zeros((B, H), jnp.float32)
            c_b = jnp.zeros((B, H), jnp.float32)

            last = (l == L - 1)
            for s in range(T):            # static unroll; serial part = h @ W_hh
                rf = s * B                # forward direction consumes time t = s
                rb = (T - 1 - s) * B      # backward direction consumes t = T-1-s
                g_f = gx[rf:rf + B, 0:G] + jnp.dot(
                    h_f.astype(jnp.bfloat16), whh_f,
                    preferred_element_type=jnp.float32)
                g_b = gx[rb:rb + B, G:2 * G] + jnp.dot(
                    h_b.astype(jnp.bfloat16), whh_b,
                    preferred_element_type=jnp.float32)
                h_f, c_f = cell(g_f, c_f)
                h_b, c_b = cell(g_b, c_b)
                if not last:
                    # stash hidden states aligned to true time for next layer
                    hs_scr[rf:rf + B, 0:H] = h_f
                    hs_scr[rb:rb + B, H:2 * H] = h_b
            if not last:
                xs_bf16 = hs_scr[...].astype(jnp.bfloat16)    # (T*B, 2H)

        # Fused q epilogue. Rows [0:N) = states, [N:2N) = actions. The PyTorch
        # permute((1,2,0)).reshape interleave of (fwd, bwd) units is the same
        # permutation on both embeddings, so the inner product is unaffected
        # and we can reduce the fwd and bwd halves directly.
        prod = h_f[0:N, :] * h_f[N:B, :] + h_b[0:N, :] * h_b[N:B, :]    # (N, H)
        q_ref[...] = jax.nn.sigmoid(jnp.sum(prod, axis=-1, keepdims=True))

    return kernel


def drrn_pallas_q(x_tm2d, packed_layers, *, T, N):
    """x_tm2d: (T*2N, E) f32, time-major rows r = t*2N + b (b<N states, b>=N actions).
    packed_layers: per layer (wih (D,8H) bf16, whh_f (H,4H) bf16, whh_b (H,4H) bf16,
    bias (1,8H) f32). Returns q: (N,) f32."""
    L = len(packed_layers)
    H = packed_layers[0][1].shape[0]
    B = 2 * N
    assert x_tm2d.shape[0] == T * B

    operands = [x_tm2d]
    in_specs = [pl.BlockSpec(x_tm2d.shape, lambda i: (0, 0))]
    for layer in packed_layers:
        for w in layer:
            operands.append(w)
            in_specs.append(pl.BlockSpec(w.shape, lambda i: (0, 0)))

    q = pl.pallas_call(
        _make_drrn_kernel(T=T, N=N, H=H, L=L),
        out_shape=jax.ShapeDtypeStruct((N, 1), jnp.float32),
        grid_spec=pltpu.PrefetchScalarGridSpec(
            num_scalar_prefetch=0,
            grid=(1,),                       # single fused invocation
            in_specs=in_specs,
            out_specs=pl.BlockSpec((N, 1), lambda i: (0, 0)),
            # VMEM-resident hidden sequence feeding the next LSTM layer.
            scratch_shapes=[pltpu.VMEM((T * B, 2 * H), jnp.float32)],
        ),
        compiler_params=pltpu.CompilerParams(
            dimension_semantics=("arbitrary",)),
    )(*operands)
    return q[:, 0]


def drrn_forward(params, state_tokens, action_tokens):
    """DRRN.forward: q = sigmoid(<action_embedding, state_embedding>) per action."""
    N, T = state_tokens.shape
    # character-embedding lookups (host-side glue)
    s_seq = jnp.take(params["state_embed_table"], state_tokens, axis=0)    # (N,T,E)
    a_seq = jnp.take(params["action_embed_table"], action_tokens, axis=0)  # (N,T,E)
    # Batch state + action through the SHARED state_encoder in one pass
    # (reference forward() encodes both with self.state_encoder).
    x = jnp.concatenate([s_seq, a_seq], axis=0)                # (2N, T, E)
    x = jnp.transpose(x, (1, 0, 2)).reshape(T * 2 * N, -1)     # time-major rows
    return drrn_pallas_q(x, params["state_encoder_packed"], T=T, N=N)


# ----------------------------------------------------------------------------
# Pure-JAX reference with the same numerics contract (bf16 MXU operands,
# f32 accumulation / elementwise) used to validate the fused kernel.
# ----------------------------------------------------------------------------
def drrn_reference(params_ref, state_tokens, action_tokens):
    N, T = state_tokens.shape
    s_seq = jnp.take(params_ref["state_embed_table"], state_tokens, axis=0)
    a_seq = jnp.take(params_ref["action_embed_table"], action_tokens, axis=0)
    x = jnp.transpose(jnp.concatenate([s_seq, a_seq], axis=0), (1, 0, 2))  # (T,B,E)
    B = 2 * N

    def bf16_dot(a, w):
        return jnp.dot(a.astype(jnp.bfloat16), w.astype(jnp.bfloat16),
                       preferred_element_type=jnp.float32)

    def run_dir(xs, wih_t, whh_t, b):
        H = whh_t.shape[0]
        h = jnp.zeros((B, H), jnp.float32)
        c = jnp.zeros((B, H), jnp.float32)
        outs = []
        for xt in xs:
            gates = bf16_dot(xt, wih_t) + bf16_dot(h, whh_t) + b
            i = jax.nn.sigmoid(gates[:, 0 * H:1 * H])
            f = jax.nn.sigmoid(gates[:, 1 * H:2 * H])
            g = jnp.tanh(gates[:, 2 * H:3 * H])
            o = jax.nn.sigmoid(gates[:, 3 * H:4 * H])
            c = f * c + i * g
            h = o * jnp.tanh(c)
            outs.append(h)
        return outs, h

    xs = [x[t] for t in range(T)]
    h_f = h_b = None
    for (wih_f, whh_f, b_f, wih_b, whh_b, b_b) in params_ref["state_encoder"]:
        outs_f, h_f = run_dir(xs, wih_f, whh_f, b_f)
        outs_b_rev, h_b = run_dir(xs[::-1], wih_b, whh_b, b_b)
        outs_b = outs_b_rev[::-1]
        xs = [jnp.concatenate([of, ob], axis=-1) for of, ob in zip(outs_f, outs_b)]

    def interleave(hf, hb):  # hn.view(L,2,N,H)[-1].permute(1,2,0).reshape(N,2H)
        n, H = hf.shape
        return jnp.stack([hf, hb], axis=-1).reshape(n, 2 * H)

    state_emb = interleave(h_f[:N], h_b[:N])
    action_emb = interleave(h_f[N:], h_b[N:])
    return jax.nn.sigmoid(jnp.sum(action_emb * state_emb, axis=1))


# ----------------------------------------------------------------------------
# Deterministic parameter construction (synthetic, PyTorch nn.LSTM-shaped)
# ----------------------------------------------------------------------------
def init_drrn_params(key, char_emb_dim, hidden_dim, num_layers, vocab):
    bound = 1.0 / math.sqrt(hidden_dim)
    H = hidden_dim
    packed_layers, ref_layers = [], []
    d_in = char_emb_dim
    for _ in range(num_layers):
        dirs = []
        for _ in range(2):  # forward, backward (weight_*_reverse)
            key, k1, k2, k3, k4 = jax.random.split(key, 5)
            w_ih = jax.random.uniform(k1, (4 * H, d_in), minval=-bound,
                                      maxval=bound, dtype=jnp.float32)
            w_hh = jax.random.uniform(k2, (4 * H, H), minval=-bound,
                                      maxval=bound, dtype=jnp.float32)
            b_ih = jax.random.uniform(k3, (4 * H,), minval=-bound,
                                      maxval=bound, dtype=jnp.float32)
            b_hh = jax.random.uniform(k4, (4 * H,), minval=-bound,
                                      maxval=bound, dtype=jnp.float32)
            dirs.append((w_ih.T, w_hh.T, b_ih + b_hh))
        (wih_f, whh_f, b_f), (wih_b, whh_b, b_b) = dirs
        ref_layers.append((wih_f, whh_f, b_f, wih_b, whh_b, b_b))
        packed_layers.append((
            jnp.concatenate([wih_f, wih_b], axis=1).astype(jnp.bfloat16),  # (D,8H)
            whh_f.astype(jnp.bfloat16),                                    # (H,4H)
            whh_b.astype(jnp.bfloat16),                                    # (H,4H)
            jnp.concatenate([b_f, b_b]).reshape(1, 8 * H),                 # (1,8H) f32
        ))
        d_in = 2 * H

    key, k_se, k_ae = jax.random.split(key, 3)
    state_table = jax.random.normal(k_se, (vocab, char_emb_dim), dtype=jnp.float32)
    action_table = jax.random.normal(k_ae, (vocab, char_emb_dim), dtype=jnp.float32)

    # TODO(synk): the reference __init__ also builds self.action_encoder, but
    # forward() never uses it (both embeddings go through state_encoder); omitted.
    kernel_params = {"state_embed_table": state_table,
                     "action_embed_table": action_table,
                     "state_encoder_packed": tuple(packed_layers)}
    ref_params = {"state_embed_table": state_table,
                  "action_embed_table": action_table,
                  "state_encoder": tuple(ref_layers)}
    return kernel_params, ref_params, key


if __name__ == "__main__":
    N = 2          # number of candidate actions in the batch
    T = 8          # character-sequence length
    CHAR_EMB = 32  # char_emb_dim
    HIDDEN = 32    # hidden_dim
    LAYERS = 2     # lstm_layers
    VOCAB = 64     # character vocabulary size

    key = jax.random.PRNGKey(0)
    kernel_params, ref_params, key = init_drrn_params(
        key, CHAR_EMB, HIDDEN, LAYERS, VOCAB)

    key, k_st, k_at = jax.random.split(key, 3)
    # TODO(synk): CharEncoding's string -> char-id tokenization is host-side
    # Python; we stand in with synthetic fixed-length token ids (LSTM math is
    # identical).
    state_tokens = jax.random.randint(k_st, (N, T), 0, VOCAB, dtype=jnp.int32)
    action_tokens = jax.random.randint(k_at, (N, T), 0, VOCAB, dtype=jnp.int32)

    q = jax.jit(drrn_forward)(kernel_params, state_tokens, action_tokens)
    q = jax.block_until_ready(q)

    assert q.shape == (N,) and q.dtype == jnp.float32
    assert bool(jnp.all(jnp.isfinite(q)))
    assert bool(jnp.all((q > 0.0) & (q < 1.0)))

    # Validate against a pure-JAX reference using the same bf16-operand /
    # f32-accumulation numerics (loose tolerance for bf16 operand rounding).
    q_ref = jax.block_until_ready(
        drrn_reference(ref_params, state_tokens, action_tokens))
    assert jnp.allclose(q, q_ref, atol=2e-2, rtol=0.0), (q, q_ref)

    print("KERNEL_OK")
</pallas_src>

<mosaic_0001>
module attributes {stable_mosaic.version = 11 : i64} {
  func.func @kernel(%arg0: i32, %arg1: memref<32x32xf32, #tpu.memory_space<vmem>>, %arg2: memref<32x256xbf16, #tpu.memory_space<vmem>>, %arg3: memref<32x128xbf16, #tpu.memory_space<vmem>>, %arg4: memref<32x128xbf16, #tpu.memory_space<vmem>>, %arg5: memref<1x256xf32, #tpu.memory_space<vmem>>, %arg6: memref<64x256xbf16, #tpu.memory_space<vmem>>, %arg7: memref<32x128xbf16, #tpu.memory_space<vmem>>, %arg8: memref<32x128xbf16, #tpu.memory_space<vmem>>, %arg9: memref<1x256xf32, #tpu.memory_space<vmem>>, %arg10: memref<2x1xf32, #tpu.memory_space<vmem>>, %arg11: memref<32x64xf32, #tpu.memory_space<vmem>>) attributes {dimension_semantics = [#tpu.dimension_semantics<arbitrary>], iteration_bounds = array<i64: 1>, scalar_prefetch = 0 : i64, scratch_operands = 1 : i64, tpu.core_type = #tpu.core_type<tc>, window_params = [{pipeline_mode = #tpu.pipeline_mode<synchronous>, transform_indices = @transform_0, window_bounds = array<i64: 32, 32>}, {pipeline_mode = #tpu.pipeline_mode<synchronous>, transform_indices = @transform_1, window_bounds = array<i64: 32, 256>}, {pipeline_mode = #tpu.pipeline_mode<synchronous>, transform_indices = @transform_2, window_bounds = array<i64: 32, 128>}, {pipeline_mode = #tpu.pipeline_mode<synchronous>, transform_indices = @transform_3, window_bounds = array<i64: 32, 128>}, {pipeline_mode = #tpu.pipeline_mode<synchronous>, transform_indices = @transform_4, window_bounds = array<i64: 1, 256>}, {pipeline_mode = #tpu.pipeline_mode<synchronous>, transform_indices = @transform_5, window_bounds = array<i64: 64, 256>}, {pipeline_mode = #tpu.pipeline_mode<synchronous>, transform_indices = @transform_6, window_bounds = array<i64: 32, 128>}, {pipeline_mode = #tpu.pipeline_mode<synchronous>, transform_indices = @transform_7, window_bounds = array<i64: 32, 128>}, {pipeline_mode = #tpu.pipeline_mode<synchronous>, transform_indices = @transform_8, window_bounds = array<i64: 1, 256>}, {pipeline_mode = #tpu.pipeline_mode<synchronous>, transform_indices = @transform_9, window_bounds = array<i64: 2, 1>}]} {
    %c0 = arith.constant 0 : index
    %c0_0 = arith.constant 0 : index
    %0 = vector.load %arg1[%c0, %c0_0] : memref<32x32xf32, #tpu.memory_space<vmem>>, vector<32x32xf32>
    %1 = arith.truncf %0 : vector<32x32xf32> to vector<32x32xbf16>
    %c0_1 = arith.constant 0 : index
    %c0_2 = arith.constant 0 : index
    %2 = vector.load %arg2[%c0_1, %c0_2] : memref<32x256xbf16, #tpu.memory_space<vmem>>, vector<32x256xbf16>
    %c0_3 = arith.constant 0 : index
    %c0_4 = arith.constant 0 : index
    %3 = vector.load %arg3[%c0_3, %c0_4] : memref<32x128xbf16, #tpu.memory_space<vmem>>, vector<32x128xbf16>
    %c0_5 = arith.constant 0 : index
    %c0_6 = arith.constant 0 : index
    %4 = vector.load %arg4[%c0_5, %c0_6] : memref<32x128xbf16, #tpu.memory_space<vmem>>, vector<32x128xbf16>
    %c0_7 = arith.constant 0 : index
    %c0_8 = arith.constant 0 : index
    %5 = vector.load %arg5[%c0_7, %c0_8] : memref<1x256xf32, #tpu.memory_space<vmem>>, vector<1x256xf32>
    %cst = arith.constant dense<0.000000e+00> : vector<32x256xf32>
    %6 = tpu.matmul %1, %2, %cst {dimension_numbers = #tpu.dot_dimension_numbers<[1], [0], [0], [1], [0, 0, 1, 1], [], []>} : vector<32x32xbf16>, vector<32x256xbf16>, vector<32x256xf32> -> vector<32x256xf32>
    %7 = vector.broadcast %5 : vector<1x256xf32> to vector<32x256xf32>
    %8 = arith.addf %6, %7 : vector<32x256xf32>
    %cst_9 = arith.constant 0.000000e+00 : f32
    %9 = vector.broadcast %cst_9 : f32 to vector<4x32xf32>
    %cst_10 = arith.constant 0.000000e+00 : f32
    %10 = vector.broadcast %cst_10 : f32 to vector<4x32xf32>
    %cst_11 = arith.constant 0.000000e+00 : f32
    %11 = vector.broadcast %cst_11 : f32 to vector<4x32xf32>
    %cst_12 = arith.constant 0.000000e+00 : f32
    %12 = vector.broadcast %cst_12 : f32 to vector<4x32xf32>
    %13 = vector.extract_strided_slice %8 {offsets = [0, 0], sizes = [4, 128], strides = [1, 1]} : vector<32x256xf32> to vector<4x128xf32>
    %14 = arith.truncf %9 : vector<4x32xf32> to vector<4x32xbf16>
    %cst_13 = arith.constant dense<0.000000e+00> : vector<4x128xf32>
    %15 = tpu.matmul %14, %3, %cst_13 {dimension_numbers = #tpu.dot_dimension_numbers<[1], [0], [0], [1], [0, 0, 1, 1], [], []>} : vector<4x32xbf16>, vector<32x128xbf16>, vector<4x128xf32> -> vector<4x128xf32>
    %16 = arith.addf %13, %15 : vector<4x128xf32>
    %17 = vector.extract_strided_slice %8 {offsets = [28, 128], sizes = [4, 128], strides = [1, 1]} : vector<32x256xf32> to vector<4x128xf32>
    %18 = arith.truncf %11 : vector<4x32xf32> to vector<4x32xbf16>
    %cst_14 = arith.constant dense<0.000000e+00> : vector<4x128xf32>
    %19 = tpu.matmul %18, %4, %cst_14 {dimension_numbers = #tpu.dot_dimension_numbers<[1], [0], [0], [1], [0, 0, 1, 1], [], []>} : vector<4x32xbf16>, vector<32x128xbf16>, vector<4x128xf32> -> vector<4x128xf32>
    %20 = arith.addf %17, %19 : vector<4x128xf32>
    %21 = vector.extract_strided_slice %16 {offsets = [0, 0], sizes = [4, 32], strides = [1, 1]} : vector<4x128xf32> to vector<4x32xf32>
    %22 = arith.negf %21 : vector<4x32xf32>
    %23 = math.exp %22 : vector<4x32xf32>
    %cst_15 = arith.constant 1.000000e+00 : f32
    %24 = vector.broadcast %cst_15 : f32 to vector<4x32xf32>
    %25 = arith.addf %24, %23 : vector<4x32xf32>
    %26 = arith.divf %24, %25 : vector<4x32xf32>
    %27 = vector.extract_strided_slice %16 {offsets = [0, 32], sizes = [4, 32], strides = [1, 1]} : vector<4x128xf32> to vector<4x32xf32>
    %28 = arith.negf %27 : vector<4x32xf32>
    %29 = math.exp %28 : vector<4x32xf32>
    %cst_16 = arith.constant 1.000000e+00 : f32
    %30 = vector.broadcast %cst_16 : f32 to vector<4x32xf32>
    %31 = arith.addf %30, %29 : vector<4x32xf32>
    %32 = arith.divf %30, %31 : vector<4x32xf32>
    %33 = vector.extract_strided_slice %16 {offsets = [0, 64], sizes = [4, 32], strides = [1, 1]} : vector<4x128xf32> to vector<4x32xf32>
    %34 = math.tanh %33 : vector<4x32xf32>
    %35 = vector.extract_strided_slice %16 {offsets = [0, 96], sizes = [4, 32], strides = [1, 1]} : vector<4x128xf32> to vector<4x32xf32>
    %36 = arith.negf %35 : vector<4x32xf32>
    %37 = math.exp %36 : vector<4x32xf32>
    %cst_17 = arith.constant 1.000000e+00 : f32
    %38 = vector.broadcast %cst_17 : f32 to vector<4x32xf32>
    %39 = arith.addf %38, %37 : vector<4x32xf32>
    %40 = arith.divf %38, %39 : vector<4x32xf32>
    %41 = arith.mulf %32, %10 : vector<4x32xf32>
    %42 = arith.mulf %26, %34 : vector<4x32xf32>
    %43 = arith.addf %41, %42 : vector<4x32xf32>
    %44 = math.tanh %43 : vector<4x32xf32>
    %45 = arith.mulf %40, %44 : vector<4x32xf32>
    %46 = vector.extract_strided_slice %20 {offsets = [0, 0], sizes = [4, 32], strides = [1, 1]} : vector<4x128xf32> to vector<4x32xf32>
    %47 = arith.negf %46 : vector<4x32xf32>
    %48 = math.exp %47 : vector<4x32xf32>
    %cst_18 = arith.constant 1.000000e+00 : f32
    %49 = vector.broadcast %cst_18 : f32 to vector<4x32xf32>
    %50 = arith.addf %49, %48 : vector<4x32xf32>
    %51 = arith.divf %49, %50 : vector<4x32xf32>
    %52 = vector.extract_strided_slice %20 {offsets = [0, 32], sizes = [4, 32], strides = [1, 1]} : vector<4x128xf32> to vector<4x32xf32>
    %53 = arith.negf %52 : vector<4x32xf32>
    %54 = math.exp %53 : vector<4x32xf32>
    %cst_19 = arith.constant 1.000000e+00 : f32
    %55 = vector.broadcast %cst_19 : f32 to vector<4x32xf32>
    %56 = arith.addf %55, %54 : vector<4x32xf32>
    %57 = arith.divf %55, %56 : vector<4x32xf32>
    %58 = vector.extract_strided_slice %20 {offsets = [0, 64], sizes = [4, 32], strides = [1, 1]} : vector<4x128xf32> to vector<4x32xf32>
    %59 = math.tanh %58 : vector<4x32xf32>
    %60 = vector.extract_strided_slice %20 {offsets = [0, 96], sizes = [4, 32], strides = [1, 1]} : vector<4x128xf32> to vector<4x32xf32>
    %61 = arith.negf %60 : vector<4x32xf32>
    %62 = math.exp %61 : vector<4x32xf32>
    %cst_20 = arith.constant 1.000000e+00 : f32
    %63 = vector.broadcast %cst_20 : f32 to vector<4x32xf32>
    %64 = arith.addf %63, %62 : vector<4x32xf32>
    %65 = arith.divf %63, %64 : vector<4x32xf32>
    %66 = arith.mulf %57, %12 : vector<4x32xf32>
    %67 = arith.mulf %51, %59 : vector<4x32xf32>
    %68 = arith.addf %66, %67 : vector<4x32xf32>
    %69 = math.tanh %68 : vector<4x32xf32>
    %70 = arith.mulf %65, %69 : vector<4x32xf32>
    %c0_21 = arith.constant 0 : index
    %c0_22 = arith.constant 0 : index
    %71 = vector.load %arg11[%c0_21, %c0_22] : memref<32x64xf32, #tpu.memory_space<vmem>>, vector<4x32xf32>
    tpu.vector_store %arg11[%c0_21, %c0_22], %45 {strides = array<i32>} : memref<32x64xf32, #tpu.memory_space<vmem>>, vector<4x32xf32>,
    %c28 = arith.constant 28 : index
    %c32 = arith.constant 32 : index
    %72 = vector.load %arg11[%c28, %c32] : memref<32x64xf32, #tpu.memory_space<vmem>>, vector<4x32xf32>
    tpu.vector_store %arg11[%c28, %c32], %70 {strides = array<i32>} : memref<32x64xf32, #tpu.memory_space<vmem>>, vector<4x32xf32>,
    %73 = vector.extract_strided_slice %8 {offsets = [4, 0], sizes = [4, 128], strides = [1, 1]} : vector<32x256xf32> to vector<4x128xf32>
    %74 = arith.truncf %45 : vector<4x32xf32> to vector<4x32xbf16>
    %cst_23 = arith.constant dense<0.000000e+00> : vector<4x128xf32>
    %75 = tpu.matmul %74, %3, %cst_23 {dimension_numbers = #tpu.dot_dimension_numbers<[1], [0], [0], [1], [0, 0, 1, 1], [], []>} : vector<4x32xbf16>, vector<32x128xbf16>, vector<4x128xf32> -> vector<4x128xf32>
    %76 = arith.addf %73, %75 : vector<4x128xf32>
    %77 = vector.extract_strided_slice %8 {offsets = [24, 128], sizes = [4, 128], strides = [1, 1]} : vector<32x256xf32> to vector<4x128xf32>
    %78 = arith.truncf %70 : vector<4x32xf32> to vector<4x32xbf16>
    %cst_24 = arith.constant dense<0.000000e+00> : vector<4x128xf32>
    %79 = tpu.matmul %78, %4, %cst_24 {dimension_numbers = #tpu.dot_dimension_numbers<[1], [0], [0], [1], [0, 0, 1, 1], [], []>} : vector<4x32xbf16>, vector<32x128xbf16>, vector<4x128xf32> -> vector<4x128xf32>
    %80 = arith.addf %77, %79 : vector<4x128xf32>
    %81 = vector.extract_strided_slice %76 {offsets = [0, 0], sizes = [4, 32], strides = [1, 1]} : vector<4x128xf32> to vector<4x32xf32>
    %82 = arith.negf %81 : vector<4x32xf32>
    %83 = math.exp %82 : vector<4x32xf32>
    %cst_25 = arith.constant 1.000000e+00 : f32
    %84 = vector.broadcast %cst_25 : f32 to vector<4x32xf32>
    %85 = arith.addf %84, %83 : vector<4x32xf32>
    %86 = arith.divf %84, %85 : vector<4x32xf32>
    %87 = vector.extract_strided_slice %76 {offsets = [0, 32], sizes = [4, 32], strides = [1, 1]} : vector<4x128xf32> to vector<4x32xf32>
    %88 = arith.negf %87 : vector<4x32xf32>
    %89 = math.exp %88 : vector<4x32xf32>
    %cst_26 = arith.constant 1.000000e+00 : f32
    %90 = vector.broadcast %cst_26 : f32 to vector<4x32xf32>
    %91 = arith.addf %90, %89 : vector<4x32xf32>
    %92 = arith.divf %90, %91 : vector<4x32xf32>
    %93 = vector.extract_strided_slice %76 {offsets = [0, 64], sizes = [4, 32], strides = [1, 1]} : vector<4x128xf32> to vector<4x32xf32>
    %94 = math.tanh %93 : vector<4x32xf32>
    %95 = vector.extract_strided_slice %76 {offsets = [0, 96], sizes = [4, 32], strides = [1, 1]} : vector<4x128xf32> to vector<4x32xf32>
    %96 = arith.negf %95 : vector<4x32xf32>
    %97 = math.exp %96 : vector<4x32xf32>
    %cst_27 = arith.constant 1.000000e+00 : f32
    %98 = vector.broadcast %cst_27 : f32 to vector<4x32xf32>
    %99 = arith.addf %98, %97 : vector<4x32xf32>
    %100 = arith.divf %98, %99 : vector<4x32xf32>
    %101 = arith.mulf %92, %43 : vector<4x32xf32>
    %102 = arith.mulf %86, %94 : vector<4x32xf32>
    %103 = arith.addf %101, %102 : vector<4x32xf32>
    %104 = math.tanh %103 : vector<4x32xf32>
    %105 = arith.mulf %100, %104 : vector<4x32xf32>
    %106 = vector.extract_strided_slice %80 {offsets = [0, 0], sizes = [4, 32], strides = [1, 1]} : vector<4x128xf32> to vector<4x32xf32>
    %107 = arith.negf %106 : vector<4x32xf32>
    %108 = math.exp %107 : vector<4x32xf32>
    %cst_28 = arith.constant 1.000000e+00 : f32
    %109 = vector.broadcast %cst_28 : f32 to vector<4x32xf32>
    %110 = arith.addf %109, %108 : vector<4x32xf32>
    %111 = arith.divf %109, %110 : vector<4x32xf32>
    %112 = vector.extract_strided_slice %80 {offsets = [0, 32], sizes = [4, 32], strides = [1, 1]} : vector<4x128xf32> to vector<4x32xf32>
    %113 = arith.negf %112 : vector<4x32xf32>
    %114 = math.exp %113 : vector<4x32xf32>
    %cst_29 = arith.constant 1.000000e+00 : f32
    %115 = vector.broadcast %cst_29 : f32 to vector<4x32xf32>
    %116 = arith.addf %115, %114 : vector<4x32xf32>
    %117 = arith.divf %115, %116 : vector<4x32xf32>
    %118 = vector.extract_strided_slice %80 {offsets = [0, 64], sizes = [4, 32], strides = [1, 1]} : vector<4x128xf32> to vector<4x32xf32>
    %119 = math.tanh %118 : vector<4x32xf32>
    %120 = vector.extract_strided_slice %80 {offsets = [0, 96], sizes = [4, 32], strides = [1, 1]} : vector<4x128xf32> to vector<4x32xf32>
    %121 = arith.negf %120 : vector<4x32xf32>
    %122 = math.exp %121 : vector<4x32xf32>
    %cst_30 = arith.constant 1.000000e+00 : f32
    %123 = vector.broadcast %cst_30 : f32 to vector<4x32xf32>
    %124 = arith.addf %123, %122 : vector<4x32xf32>
    %125 = arith.divf %123, %124 : vector<4x32xf32>
    %126 = arith.mulf %117, %68 : vector<4x32xf32>
    %127 = arith.mulf %111, %119 : vector<4x32xf32>
    %128 = arith.addf %126, %127 : vector<4x32xf32>
    %129 = math.tanh %128 : vector<4x32xf32>
    %130 = arith.mulf %125, %129 : vector<4x32xf32>
    %c4 = arith.constant 4 : index
    %c0_31 = arith.constant 0 : index
    %131 = vector.load %arg11[%c4, %c0_31] : memref<32x64xf32, #tpu.memory_space<vmem>>, vector<4x32xf32>
    tpu.vector_store %arg11[%c4, %c0_31], %105 {strides = array<i32>} : memref<32x64xf32, #tpu.memory_space<vmem>>, vector<4x32xf32>,
    %c24 = arith.constant 24 : index
    %c32_32 = arith.constant 32 : index
    %132 = vector.load %arg11[%c24, %c32_32] : memref<32x64xf32, #tpu.memory_space<vmem>>, vector<4x32xf32>
    tpu.vector_store %arg11[%c24, %c32_32], %130 {strides = array<i32>} : memref<32x64xf32, #tpu.memory_space<vmem>>, vector<4x32xf32>,
    %133 = vector.extract_strided_slice %8 {offsets = [8, 0], sizes = [4, 128], strides = [1, 1]} : vector<32x256xf32> to vector<4x128xf32>
    %134 = arith.truncf %105 : vector<4x32xf32> to vector<4x32xbf16>
    %cst_33 = arith.constant dense<0.000000e+00> : vector<4x128xf32>
    %135 = tpu.matmul %134, %3, %cst_33 {dimension_numbers = #tpu.dot_dimension_numbers<[1], [0], [0], [1], [0, 0, 1, 1], [], []>} : vector<4x32xbf16>, vector<32x128xbf16>, vector<4x128xf32> -> vector<4x128xf32>
    %136 = arith.addf %133, %135 : vector<4x128xf32>
    %137 = vector.extract_strided_slice %8 {offsets = [20, 128], sizes = [4, 128], strides = [1, 1]} : vector<32x256xf32> to vector<4x128xf32>
    %138 = arith.truncf %130 : vector<4x32xf32> to vector<4x32xbf16>
    %cst_34 = arith.constant dense<0.000000e+00> : vector<4x128xf32>
    %139 = tpu.matmul %138, %4, %cst_34 {dimension_numbers = #tpu.dot_dimension_numbers<[1], [0], [0], [1], [0, 0, 1, 1], [], []>} : vector<4x32xbf16>, vector<32x128xbf16>, vector<4x128xf32> -> vector<4x128xf32>
    %140 = arith.addf %137, %139 : vector<4x128xf32>
    %141 = vector.extract_strided_slice %136 {offsets = [0, 0], sizes = [4, 32], strides = [1, 1]} : vector<4x128xf32> to vector<4x32xf32>
    %142 = arith.negf %141 : vector<4x32xf32>
    %143 = math.exp %142 : vector<4x32xf32>
    %cst_35 = arith.constant 1.000000e+00 : f32
    %144 = vector.broadcast %cst_35 : f32 to vector<4x32xf32>
    %145 = arith.addf %144, %143 : vector<4x32xf32>
    %146 = arith.divf %144, %145 : vector<4x32xf32>
    %147 = vector.extract_strided_slice %136 {offsets = [0, 32], sizes = [4, 32], strides = [1, 1]} : vector<4x128xf32> to vector<4x32xf32>
    %148 = arith.negf %147 : vector<4x32xf32>
    %149 = math.exp %148 : vector<4x32xf32>
    %cst_36 = arith.constant 1.000000e+00 : f32
    %150 = vector.broadcast %cst_36 : f32 to vector<4x32xf32>
    %151 = arith.addf %150, %149 : vector<4x32xf32>
    %152 = arith.divf %150, %151 : vector<4x32xf32>
    %153 = vector.extract_strided_slice %136 {offsets = [0, 64], sizes = [4, 32], strides = [1, 1]} : vector<4x128xf32> to vector<4x32xf32>
    %154 = math.tanh %153 : vector<4x32xf32>
    %155 = vector.extract_strided_slice %136 {offsets = [0, 96], sizes = [4, 32], strides = [1, 1]} : vector<4x128xf32> to vector<4x32xf32>
    %156 = arith.negf %155 : vector<4x32xf32>
    %157 = math.exp %156 : vector<4x32xf32>
    %cst_37 = arith.constant 1.000000e+00 : f32
    %158 = vector.broadcast %cst_37 : f32 to vector<4x32xf32>
    %159 = arith.addf %158, %157 : vector<4x32xf32>
    %160 = arith.divf %158, %159 : vector<4x32xf32>
    %161 = arith.mulf %152, %103 : vector<4x32xf32>
    %162 = arith.mulf %146, %154 : vector<4x32xf32>
    %163 = arith.addf %161, %162 : vector<4x32xf32>
    %164 = math.tanh %163 : vector<4x32xf32>
    %165 = arith.mulf %160, %164 : vector<4x32xf32>
    %166 = vector.extract_strided_slice %140 {offsets = [0, 0], sizes = [4, 32], strides = [1, 1]} : vector<4x128xf32> to vector<4x32xf32>
    %167 = arith.negf %166 : vector<4x32xf32>
    %168 = math.exp %167 : vector<4x32xf32>
    %cst_38 = arith.constant 1.000000e+00 : f32
    %169 = vector.broadcast %cst_38 : f32 to vector<4x32xf32>
    %170 = arith.addf %169, %168 : vector<4x32xf32>
    %171 = arith.divf %169, %170 : vector<4x32xf32>
    %172 = vector.extract_strided_slice %140 {offsets = [0, 32], sizes = [4, 32], strides = [1, 1]} : vector<4x128xf32> to vector<4x32xf32>
    %173 = arith.negf %172 : vector<4x32xf32>
    %174 = math.exp %173 : vector<4x32xf32>
    %cst_39 = arith.constant 1.000000e+00 : f32
    %175 = vector.broadcast %cst_39 : f32 to vector<4x32xf32>
    %176 = arith.addf %175, %174 : vector<4x32xf32>
    %177 = arith.divf %175, %176 : vector<4x32xf32>
    %178 = vector.extract_strided_slice %140 {offsets = [0, 64], sizes = [4, 32], strides = [1, 1]} : vector<4x128xf32> to vector<4x32xf32>
    %179 = math.tanh %178 : vector<4x32xf32>
    %180 = vector.extract_strided_slice %140 {offsets = [0, 96], sizes = [4, 32], strides = [1, 1]} : vector<4x128xf32> to vector<4x32xf32>
    %181 = arith.negf %180 : vector<4x32xf32>
    %182 = math.exp %181 : vector<4x32xf32>
    %cst_40 = arith.constant 1.000000e+00 : f32
    %183 = vector.broadcast %cst_40 : f32 to vector<4x32xf32>
    %184 = arith.addf %183, %182 : vector<4x32xf32>
    %185 = arith.divf %183, %184 : vector<4x32xf32>
    %186 = arith.mulf %177, %128 : vector<4x32xf32>
    %187 = arith.mulf %171, %179 : vector<4x32xf32>
    %188 = arith.addf %186, %187 : vector<4x32xf32>
    %189 = math.tanh %188 : vector<4x32xf32>
    %190 = arith.mulf %185, %189 : vector<4x32xf32>
    %c8 = arith.constant 8 : index
    %c0_41 = arith.constant 0 : index
    %191 = vector.load %arg11[%c8, %c0_41] : memref<32x64xf32, #tpu.memory_space<vmem>>, vector<4x32xf32>
    tpu.vector_store %arg11[%c8, %c0_41], %165 {strides = array<i32>} : memref<32x64xf32, #tpu.memory_space<vmem>>, vector<4x32xf32>,
    %c20 = arith.constant 20 : index
    %c32_42 = arith.constant 32 : index
    %192 = vector.load %arg11[%c20, %c32_42] : memref<32x64xf32, #tpu.memory_space<vmem>>, vector<4x32xf32>
    tpu.vector_store %arg11[%c20, %c32_42], %190 {strides = array<i32>} : memref<32x64xf32, #tpu.memory_space<vmem>>, vector<4x32xf32>,
    %193 = vector.extract_strided_slice %8 {offsets = [12, 0], sizes = [4, 128], strides = [1, 1]} : vector<32x256xf32> to vector<4x128xf32>
    %194 = arith.truncf %165 : vector<4x32xf32> to vector<4x32xbf16>
    %cst_43 = arith.constant dense<0.000000e+00> : vector<4x128xf32>
    %195 = tpu.matmul %194, %3, %cst_43 {dimension_numbers = #tpu.dot_dimension_numbers<[1], [0], [0], [1], [0, 0, 1, 1], [], []>} : vector<4x32xbf16>, vector<32x128xbf16>, vector<4x128xf32> -> vector<4x128xf32>
    %196 = arith.addf %193, %195 : vector<4x128xf32>
    %197 = vector.extract_strided_slice %8 {offsets = [16, 128], sizes = [4, 128], strides = [1, 1]} : vector<32x256xf32> to vector<4x128xf32>
    %198 = arith.truncf %190 : vector<4x32xf32> to vector<4x32xbf16>
    %cst_44 = arith.constant dense<0.000000e+00> : vector<4x128xf32>
    %199 = tpu.matmul %198, %4, %cst_44 {dimension_numbers = #tpu.dot_dimension_numbers<[1], [0], [0], [1], [0, 0, 1, 1], [], []>} : vector<4x32xbf16>, vector<32x128xbf16>, vector<4x128xf32> -> vector<4x128xf32>
    %200 = arith.addf %197, %199 : vector<4x128xf32>
    %201 = vector.extract_strided_slice %196 {offsets = [0, 0], sizes = [4, 32], strides = [1, 1]} : vector<4x128xf32> to vector<4x32xf32>
    %202 = arith.negf %201 : vector<4x32xf32>
    %203 = math.exp %202 : vector<4x32xf32>
    %cst_45 = arith.constant 1.000000e+00 : f32
    %204 = vector.broadcast %cst_45 : f32 to vector<4x32xf32>
    %205 = arith.addf %204, %203 : vector<4x32xf32>
    %206 = arith.divf %204, %205 : vector<4x32xf32>
    %207 = vector.extract_strided_slice %196 {offsets = [0, 32], sizes = [4, 32], strides = [1, 1]} : vector<4x128xf32> to vector<4x32xf32>
    %208 = arith.negf %207 : vector<4x32xf32>
    %209 = math.exp %208 : vector<4x32xf32>
    %cst_46 = arith.constant 1.000000e+00 : f32
    %210 = vector.broadcast %cst_46 : f32 to vector<4x32xf32>
    %211 = arith.addf %210, %209 : vector<4x32xf32>
    %212 = arith.divf %210, %211 : vector<4x32xf32>
    %213 = vector.extract_strided_slice %196 {offsets = [0, 64], sizes = [4, 32], strides = [1, 1]} : vector<4x128xf32> to vector<4x32xf32>
    %214 = math.tanh %213 : vector<4x32xf32>
    %215 = vector.extract_strided_slice %196 {offsets = [0, 96], sizes = [4, 32], strides = [1, 1]} : vector<4x128xf32> to vector<4x32xf32>
    %216 = arith.negf %215 : vector<4x32xf32>
    %217 = math.exp %216 : vector<4x32xf32>
    %cst_47 = arith.constant 1.000000e+00 : f32
    %218 = vector.broadcast %cst_47 : f32 to vector<4x32xf32>
    %219 = arith.addf %218, %217 : vector<4x32xf32>
    %220 = arith.divf %218, %219 : vector<4x32xf32>
    %221 = arith.mulf %212, %163 : vector<4x32xf32>
    %222 = arith.mulf %206, %214 : vector<4x32xf32>
    %223 = arith.addf %221, %222 : vector<4x32xf32>
    %224 = math.tanh %223 : vector<4x32xf32>
    %225 = arith.mulf %220, %224 : vector<4x32xf32>
    %226 = vector.extract_strided_slice %200 {offsets = [0, 0], sizes = [4, 32], strides = [1, 1]} : vector<4x128xf32> to vector<4x32xf32>
    %227 = arith.negf %226 : vector<4x32xf32>
    %228 = math.exp %227 : vector<4x32xf32>
    %cst_48 = arith.constant 1.000000e+00 : f32
    %229 = vector.broadcast %cst_48 : f32 to vector<4x32xf32>
    %230 = arith.addf %229, %228 : vector<4x32xf32>
    %231 = arith.divf %229, %230 : vector<4x32xf32>
    %232 = vector.extract_strided_slice %200 {offsets = [0, 32], sizes = [4, 32], strides = [1, 1]} : vector<4x128xf32> to vector<4x32xf32>
    %233 = arith.negf %232 : vector<4x32xf32>
    %234 = math.exp %233 : vector<4x32xf32>
    %cst_49 = arith.constant 1.000000e+00 : f32
    %235 = vector.broadcast %cst_49 : f32 to vector<4x32xf32>
    %236 = arith.addf %235, %234 : vector<4x32xf32>
    %237 = arith.divf %235, %236 : vector<4x32xf32>
    %238 = vector.extract_strided_slice %200 {offsets = [0, 64], sizes = [4, 32], strides = [1, 1]} : vector<4x128xf32> to vector<4x32xf32>
    %239 = math.tanh %238 : vector<4x32xf32>
    %240 = vector.extract_strided_slice %200 {offsets = [0, 96], sizes = [4, 32], strides = [1, 1]} : vector<4x128xf32> to vector<4x32xf32>
    %241 = arith.negf %240 : vector<4x32xf32>
    %242 = math.exp %241 : vector<4x32xf32>
    %cst_50 = arith.constant 1.000000e+00 : f32
    %243 = vector.broadcast %cst_50 : f32 to vector<4x32xf32>
    %244 = arith.addf %243, %242 : vector<4x32xf32>
    %245 = arith.divf %243, %244 : vector<4x32xf32>
    %246 = arith.mulf %237, %188 : vector<4x32xf32>
    %247 = arith.mulf %231, %239 : vector<4x32xf32>
    %248 = arith.addf %246, %247 : vector<4x32xf32>
    %249 = math.tanh %248 : vector<4x32xf32>
    %250 = arith.mulf %245, %249 : vector<4x32xf32>
    %c12 = arith.constant 12 : index
    %c0_51 = arith.constant 0 : index
    %251 = vector.load %arg11[%c12, %c0_51] : memref<32x64xf32, #tpu.memory_space<vmem>>, vector<4x32xf32>
    tpu.vector_store %arg11[%c12, %c0_51], %225 {strides = array<i32>} : memref<32x64xf32, #tpu.memory_space<vmem>>, vector<4x32xf32>,
    %c16 = arith.constant 16 : index
    %c32_52 = arith.constant 32 : index
    %252 = vector.load %arg11[%c16, %c32_52] : memref<32x64xf32, #tpu.memory_space<vmem>>, vector<4x32xf32>
    tpu.vector_store %arg11[%c16, %c32_52], %250 {strides = array<i32>} : memref<32x64xf32, #tpu.memory_space<vmem>>, vector<4x32xf32>,
    %253 = vector.extract_strided_slice %8 {offsets = [16, 0], sizes = [4, 128], strides = [1, 1]} : vector<32x256xf32> to vector<4x128xf32>
    %254 = arith.truncf %225 : vector<4x32xf32> to vector<4x32xbf16>
    %cst_53 = arith.constant dense<0.000000e+00> : vector<4x128xf32>
    %255 = tpu.matmul %254, %3, %cst_53 {dimension_numbers = #tpu.dot_dimension_numbers<[1], [0], [0], [1], [0, 0, 1, 1], [], []>} : vector<4x32xbf16>, vector<32x128xbf16>, vector<4x128xf32> -> vector<4x128xf32>
    %256 = arith.addf %253, %255 : vector<4x128xf32>
    %257 = vector.extract_strided_slice %8 {offsets = [12, 128], sizes = [4, 128], strides = [1, 1]} : vector<32x256xf32> to vector<4x128xf32>
    %258 = arith.truncf %250 : vector<4x32xf32> to vector<4x32xbf16>
    %cst_54 = arith.constant dense<0.000000e+00> : vector<4x128xf32>
    %259 = tpu.matmul %258, %4, %cst_54 {dimension_numbers = #tpu.dot_dimension_numbers<[1], [0], [0], [1], [0, 0, 1, 1], [], []>} : vector<4x32xbf16>, vector<32x128xbf16>, vector<4x128xf32> -> vector<4x128xf32>
    %260 = arith.addf %257, %259 : vector<4x128xf32>
    %261 = vector.extract_strided_slice %256 {offsets = [0, 0], sizes = [4, 32], strides = [1, 1]} : vector<4x128xf32> to vector<4x32xf32>
    %262 = arith.negf %261 : vector<4x32xf32>
    %263 = math.exp %262 : vector<4x32xf32>
    %cst_55 = arith.constant 1.000000e+00 : f32
    %264 = vector.broadcast %cst_55 : f32 to vector<4x32xf32>
    %265 = arith.addf %264, %263 : vector<4x32xf32>
    %266 = arith.divf %264, %265 : vector<4x32xf32>
    %267 = vector.extract_strided_slice %256 {offsets = [0, 32], sizes = [4, 32], strides = [1, 1]} : vector<4x128xf32> to vector<4x32xf32>
    %268 = arith.negf %267 : vector<4x32xf32>
    %269 = math.exp %268 : vector<4x32xf32>
    %cst_56 = arith.constant 1.000000e+00 : f32
    %270 = vector.broadcast %cst_56 : f32 to vector<4x32xf32>
    %271 = arith.addf %270, %269 : vector<4x32xf32>
    %272 = arith.divf %270, %271 : vector<4x32xf32>
    %273 = vector.extract_strided_slice %256 {offsets = [0, 64], sizes = [4, 32], strides = [1, 1]} : vector<4x128xf32> to vector<4x32xf32>
    %274 = math.tanh %273 : vector<4x32xf32>
    %275 = vector.extract_strided_slice %256 {offsets = [0, 96], sizes = [4, 32], strides = [1, 1]} : vector<4x128xf32> to vector<4x32xf32>
    %276 = arith.negf %275 : vector<4x32xf32>
    %277 = math.exp %276 : vector<4x32xf32>
    %cst_57 = arith.constant 1.000000e+00 : f32
    %278 = vector.broadcast %cst_57 : f32 to vector<4x32xf32>
    %279 = arith.addf %278, %277 : vector<4x32xf32>
    %280 = arith.divf %278, %279 : vector<4x32xf32>
    %281 = arith.mulf %272, %223 : vector<4x32xf32>
    %282 = arith.mulf %266, %274 : vector<4x32xf32>
    %283 = arith.addf %281, %282 : vector<4x32xf32>
    %284 = math.tanh %283 : vector<4x32xf32>
    %285 = arith.mulf %280, %284 : vector<4x32xf32>
    %286 = vector.extract_strided_slice %260 {offsets = [0, 0], sizes = [4, 32], strides = [1, 1]} : vector<4x128xf32> to vector<4x32xf32>
    %287 = arith.negf %286 : vector<4x32xf32>
    %288 = math.exp %287 : vector<4x32xf32>
    %cst_58 = arith.constant 1.000000e+00 : f32
    %289 = vector.broadcast %cst_58 : f32 to vector<4x32xf32>
    %290 = arith.addf %289, %288 : vector<4x32xf32>
    %291 = arith.divf %289, %290 : vector<4x32xf32>
    %292 = vector.extract_strided_slice %260 {offsets = [0, 32], sizes = [4, 32], strides = [1, 1]} : vector<4x128xf32> to vector<4x32xf32>
    %293 = arith.negf %292 : vector<4x32xf32>
    %294 = math.exp %293 : vector<4x32xf32>
    %cst_59 = arith.constant 1.000000e+00 : f32
    %295 = vector.broadcast %cst_59 : f32 to vector<4x32xf32>
    %296 = arith.addf %295, %294 : vector<4x32xf32>
    %297 = arith.divf %295, %296 : vector<4x32xf32>
    %298 = vector.extract_strided_slice %260 {offsets = [0, 64], sizes = [4, 32], strides = [1, 1]} : vector<4x128xf32> to vector<4x32xf32>
    %299 = math.tanh %298 : vector<4x32xf32>
    %300 = vector.extract_strided_slice %260 {offsets = [0, 96], sizes = [4, 32], strides = [1, 1]} : vector<4x128xf32> to vector<4x32xf32>
    %301 = arith.negf %300 : vector<4x32xf32>
    %302 = math.exp %301 : vector<4x32xf32>
    %cst_60 = arith.constant 1.000000e+00 : f32
    %303 = vector.broadcast %cst_60 : f32 to vector<4x32xf32>
    %304 = arith.addf %303, %302 : vector<4x32xf32>
    %305 = arith.divf %303, %304 : vector<4x32xf32>
    %306 = arith.mulf %297, %248 : vector<4x32xf32>
    %307 = arith.mulf %291, %299 : vector<4x32xf32>
    %308 = arith.addf %306, %307 : vector<4x32xf32>
    %309 = math.tanh %308 : vector<4x32xf32>
    %310 = arith.mulf %305, %309 : vector<4x32xf32>
    %c16_61 = arith.constant 16 : index
    %c0_62 = arith.constant 0 : index
    %311 = vector.load %arg11[%c16_61, %c0_62] : memref<32x64xf32, #tpu.memory_space<vmem>>, vector<4x32xf32>
    tpu.vector_store %arg11[%c16_61, %c0_62], %285 {strides = array<i32>} : memref<32x64xf32, #tpu.memory_space<vmem>>, vector<4x32xf32>,
    %c12_63 = arith.constant 12 : index
    %c32_64 = arith.constant 32 : index
    %312 = vector.load %arg11[%c12_63, %c32_64] : memref<32x64xf32, #tpu.memory_space<vmem>>, vector<4x32xf32>
    tpu.vector_store %arg11[%c12_63, %c32_64], %310 {strides = array<i32>} : memref<32x64xf32, #tpu.memory_space<vmem>>, vector<4x32xf32>,
    %313 = vector.extract_strided_slice %8 {offsets = [20, 0], sizes = [4, 128], strides = [1, 1]} : vector<32x256xf32> to vector<4x128xf32>
    %314 = arith.truncf %285 : vector<4x32xf32> to vector<4x32xbf16>
    %cst_65 = arith.constant dense<0.000000e+00> : vector<4x128xf32>
    %315 = tpu.matmul %314, %3, %cst_65 {dimension_numbers = #tpu.dot_dimension_numbers<[1], [0], [0], [1], [0, 0, 1, 1], [], []>} : vector<4x32xbf16>, vector<32x128xbf16>, vector<4x128xf32> -> vector<4x128xf32>
    %316 = arith.addf %313, %315 : vector<4x128xf32>
    %317 = vector.extract_strided_slice %8 {offsets = [8, 128], sizes = [4, 128], strides = [1, 1]} : vector<32x256xf32> to vector<4x128xf32>
    %318 = arith.truncf %310 : vector<4x32xf32> to vector<4x32xbf16>
    %cst_66 = arith.constant dense<0.000000e+00> : vector<4x128xf32>
    %319 = tpu.matmul %318, %4, %cst_66 {dimension_numbers = #tpu.dot_dimension_numbers<[1], [0], [0], [1], [0, 0, 1, 1], [], []>} : vector<4x32xbf16>, vector<32x128xbf16>, vector<4x128xf32> -> vector<4x128xf32>
    %320 = arith.addf %317, %319 : vector<4x128xf32>
    %321 = vector.extract_strided_slice %316 {offsets = [0, 0], sizes = [4, 32], strides = [1, 1]} : vector<4x128xf32> to vector<4x32xf32>
    %322 = arith.negf %321 : vector<4x32xf32>
    %323 = math.exp %322 : vector<4x32xf32>
    %cst_67 = arith.constant 1.000000e+00 : f32
    %324 = vector.broadcast %cst_67 : f32 to vector<4x32xf32>
    %325 = arith.addf %324, %323 : vector<4x32xf32>
    %326 = arith.divf %324, %325 : vector<4x32xf32>
    %327 = vector.extract_strided_slice %316 {offsets = [0, 32], sizes = [4, 32], strides = [1, 1]} : vector<4x128xf32> to vector<4x32xf32>
    %328 = arith.negf %327 : vector<4x32xf32>
    %329 = math.exp %328 : vector<4x32xf32>
    %cst_68 = arith.constant 1.000000e+00 : f32
    %330 = vector.broadcast %cst_68 : f32 to vector<4x32xf32>
    %331 = arith.addf %330, %329 : vector<4x32xf32>
    %332 = arith.divf %330, %331 : vector<4x32xf32>
    %333 = vector.extract_strided_slice %316 {offsets = [0, 64], sizes = [4, 32], strides = [1, 1]} : vector<4x128xf32> to vector<4x32xf32>
    %334 = math.tanh %333 : vector<4x32xf32>
    %335 = vector.extract_strided_slice %316 {offsets = [0, 96], sizes = [4, 32], strides = [1, 1]} : vector<4x128xf32> to vector<4x32xf32>
    %336 = arith.negf %335 : vector<4x32xf32>
    %337 = math.exp %336 : vector<4x32xf32>
    %cst_69 = arith.constant 1.000000e+00 : f32
    %338 = vector.broadcast %cst_69 : f32 to vector<4x32xf32>
    %339 = arith.addf %338, %337 : vector<4x32xf32>
    %340 = arith.divf %338, %339 : vector<4x32xf32>
    %341 = arith.mulf %332, %283 : vector<4x32xf32>
    %342 = arith.mulf %326, %334 : vector<4x32xf32>
    %343 = arith.addf %341, %342 : vector<4x32xf32>
    %344 = math.tanh %343 : vector<4x32xf32>
    %345 = arith.mulf %340, %344 : vector<4x32xf32>
    %346 = vector.extract_strided_slice %320 {offsets = [0, 0], sizes = [4, 32], strides = [1, 1]} : vector<4x128xf32> to vector<4x32xf32>
    %347 = arith.negf %346 : vector<4x32xf32>
    %348 = math.exp %347 : vector<4x32xf32>
    %cst_70 = arith.constant 1.000000e+00 : f32
    %349 = vector.broadcast %cst_70 : f32 to vector<4x32xf32>
    %350 = arith.addf %349, %348 : vector<4x32xf32>
    %351 = arith.divf %349, %350 : vector<4x32xf32>
    %352 = vector.extract_strided_slice %320 {offsets = [0, 32], sizes = [4, 32], strides = [1, 1]} : vector<4x128xf32> to vector<4x32xf32>
    %353 = arith.negf %352 : vector<4x32xf32>
    %354 = math.exp %353 : vector<4x32xf32>
    %cst_71 = arith.constant 1.000000e+00 : f32
    %355 = vector.broadcast %cst_71 : f32 to vector<4x32xf32>
    %356 = arith.addf %355, %354 : vector<4x32xf32>
    %357 = arith.divf %355, %356 : vector<4x32xf32>
    %358 = vector.extract_strided_slice %320 {offsets = [0, 64], sizes = [4, 32], strides = [1, 1]} : vector<4x128xf32> to vector<4x32xf32>
    %359 = math.tanh %358 : vector<4x32xf32>
    %360 = vector.extract_strided_slice %320 {offsets = [0, 96], sizes = [4, 32], strides = [1, 1]} : vector<4x128xf32> to vector<4x32xf32>
    %361 = arith.negf %360 : vector<4x32xf32>
    %362 = math.exp %361 : vector<4x32xf32>
    %cst_72 = arith.constant 1.000000e+00 : f32
    %363 = vector.broadcast %cst_72 : f32 to vector<4x32xf32>
    %364 = arith.addf %363, %362 : vector<4x32xf32>
    %365 = arith.divf %363, %364 : vector<4x32xf32>
    %366 = arith.mulf %357, %308 : vector<4x32xf32>
    %367 = arith.mulf %351, %359 : vector<4x32xf32>
    %368 = arith.addf %366, %367 : vector<4x32xf32>
    %369 = math.tanh %368 : vector<4x32xf32>
    %370 = arith.mulf %365, %369 : vector<4x32xf32>
    %c20_73 = arith.constant 20 : index
    %c0_74 = arith.constant 0 : index
    %371 = vector.load %arg11[%c20_73, %c0_74] : memref<32x64xf32, #tpu.memory_space<vmem>>, vector<4x32xf32>
    tpu.vector_store %arg11[%c20_73, %c0_74], %345 {strides = array<i32>} : memref<32x64xf32, #tpu.memory_space<vmem>>, vector<4x32xf32>,
    %c8_75 = arith.constant 8 : index
    %c32_76 = arith.constant 32 : index
    %372 = vector.load %arg11[%c8_75, %c32_76] : memref<32x64xf32, #tpu.memory_space<vmem>>, vector<4x32xf32>
    tpu.vector_store %arg11[%c8_75, %c32_76], %370 {strides = array<i32>} : memref<32x64xf32, #tpu.memory_space<vmem>>, vector<4x32xf32>,
    %373 = vector.extract_strided_slice %8 {offsets = [24, 0], sizes = [4, 128], strides = [1, 1]} : vector<32x256xf32> to vector<4x128xf32>
    %374 = arith.truncf %345 : vector<4x32xf32> to vector<4x32xbf16>
    %cst_77 = arith.constant dense<0.000000e+00> : vector<4x128xf32>
    %375 = tpu.matmul %374, %3, %cst_77 {dimension_numbers = #tpu.dot_dimension_numbers<[1], [0], [0], [1], [0, 0, 1, 1], [], []>} : vector<4x32xbf16>, vector<32x128xbf16>, vector<4x128xf32> -> vector<4x128xf32>
    %376 = arith.addf %373, %375 : vector<4x128xf32>
    %377 = vector.extract_strided_slice %8 {offsets = [4, 128], sizes = [4, 128], strides = [1, 1]} : vector<32x256xf32> to vector<4x128xf32>
    %378 = arith.truncf %370 : vector<4x32xf32> to vector<4x32xbf16>
    %cst_78 = arith.constant dense<0.000000e+00> : vector<4x128xf32>
    %379 = tpu.matmul %378, %4, %cst_78 {dimension_numbers = #tpu.dot_dimension_numbers<[1], [0], [0], [1], [0, 0, 1, 1], [], []>} : vector<4x32xbf16>, vector<32x128xbf16>, vector<4x128xf32> -> vector<4x128xf32>
    %380 = arith.addf %377, %379 : vector<4x128xf32>
    %381 = vector.extract_strided_slice %376 {offsets = [0, 0], sizes = [4, 32], strides = [1, 1]} : vector<4x128xf32> to vector<4x32xf32>
    %382 = arith.negf %381 : vector<4x32xf32>
    %383 = math.exp %382 : vector<4x32xf32>
    %cst_79 = arith.constant 1.000000e+00 : f32
    %384 = vector.broadcast %cst_79 : f32 to vector<4x32xf32>
    %385 = arith.addf %384, %383 : vector<4x32xf32>
    %386 = arith.divf %384, %385 : vector<4x32xf32>
    %387 = vector.extract_strided_slice %376 {offsets = [0, 32], sizes = [4, 32], strides = [1, 1]} : vector<4x128xf32> to vector<4x32xf32>
    %388 = arith.negf %387 : vector<4x32xf32>
    %389 = math.exp %388 : vector<4x32xf32>
    %cst_80 = arith.constant 1.000000e+00 : f32
    %390 = vector.broadcast %cst_80 : f32 to vector<4x32xf32>
    %391 = arith.addf %390, %389 : vector<4x32xf32>
    %392 = arith.divf %390, %391 : vector<4x32xf32>
    %393 = vector.extract_strided_slice %376 {offsets = [0, 64], sizes = [4, 32], strides = [1, 1]} : vector<4x128xf32> to vector<4x32xf32>
    %394 = math.tanh %393 : vector<4x32xf32>
    %395 = vector.extract_strided_slice %376 {offsets = [0, 96], sizes = [4, 32], strides = [1, 1]} : vector<4x128xf32> to vector<4x32xf32>
    %396 = arith.negf %395 : vector<4x32xf32>
    %397 = math.exp %396 : vector<4x32xf32>
    %cst_81 = arith.constant 1.000000e+00 : f32
    %398 = vector.broadcast %cst_81 : f32 to vector<4x32xf32>
    %399 = arith.addf %398, %397 : vector<4x32xf32>
    %400 = arith.divf %398, %399 : vector<4x32xf32>
    %401 = arith.mulf %392, %343 : vector<4x32xf32>
    %402 = arith.mulf %386, %394 : vector<4x32xf32>
    %403 = arith.addf %401, %402 : vector<4x32xf32>
    %404 = math.tanh %403 : vector<4x32xf32>
    %405 = arith.mulf %400, %404 : vector<4x32xf32>
    %406 = vector.extract_strided_slice %380 {offsets = [0, 0], sizes = [4, 32], strides = [1, 1]} : vector<4x128xf32> to vector<4x32xf32>
    %407 = arith.negf %406 : vector<4x32xf32>
    %408 = math.exp %407 : vector<4x32xf32>
    %cst_82 = arith.constant 1.000000e+00 : f32
    %409 = vector.broadcast %cst_82 : f32 to vector<4x32xf32>
    %410 = arith.addf %409, %408 : vector<4x32xf32>
    %411 = arith.divf %409, %410 : vector<4x32xf32>
    %412 = vector.extract_strided_slice %380 {offsets = [0, 32], sizes = [4, 32], strides = [1, 1]} : vector<4x128xf32> to vector<4x32xf32>
    %413 = arith.negf %412 : vector<4x32xf32>
    %414 = math.exp %413 : vector<4x32xf32>
    %cst_83 = arith.constant 1.000000e+00 : f32
    %415 = vector.broadcast %cst_83 : f32 to vector<4x32xf32>
    %416 = arith.addf %415, %414 : vector<4x32xf32>
    %417 = arith.divf %415, %416 : vector<4x32xf32>
    %418 = vector.extract_strided_slice %380 {offsets = [0, 64], sizes = [4, 32], strides = [1, 1]} : vector<4x128xf32> to vector<4x32xf32>
    %419 = math.tanh %418 : vector<4x32xf32>
    %420 = vector.extract_strided_slice %380 {offsets = [0, 96], sizes = [4, 32], strides = [1, 1]} : vector<4x128xf32> to vector<4x32xf32>
    %421 = arith.negf %420 : vector<4x32xf32>
    %422 = math.exp %421 : vector<4x32xf32>
    %cst_84 = arith.constant 1.000000e+00 : f32
    %423 = vector.broadcast %cst_84 : f32 to vector<4x32xf32>
    %424 = arith.addf %423, %422 : vector<4x32xf32>
    %425 = arith.divf %423, %424 : vector<4x32xf32>
    %426 = arith.mulf %417, %368 : vector<4x32xf32>
    %427 = arith.mulf %411, %419 : vector<4x32xf32>
    %428 = arith.addf %426, %427 : vector<4x32xf32>
    %429 = math.tanh %428 : vector<4x32xf32>
    %430 = arith.mulf %425, %429 : vector<4x32xf32>
    %c24_85 = arith.constant 24 : index
    %c0_86 = arith.constant 0 : index
    %431 = vector.load %arg11[%c24_85, %c0_86] : memref<32x64xf32, #tpu.memory_space<vmem>>, vector<4x32xf32>
    tpu.vector_store %arg11[%c24_85, %c0_86], %405 {strides = array<i32>} : memref<32x64xf32, #tpu.memory_space<vmem>>, vector<4x32xf32>,
    %c4_87 = arith.constant 4 : index
    %c32_88 = arith.constant 32 : index
    %432 = vector.load %arg11[%c4_87, %c32_88] : memref<32x64xf32, #tpu.memory_space<vmem>>, vector<4x32xf32>
    tpu.vector_store %arg11[%c4_87, %c32_88], %430 {strides = array<i32>} : memref<32x64xf32, #tpu.memory_space<vmem>>, vector<4x32xf32>,
    %433 = vector.extract_strided_slice %8 {offsets = [28, 0], sizes = [4, 128], strides = [1, 1]} : vector<32x256xf32> to vector<4x128xf32>
    %434 = arith.truncf %405 : vector<4x32xf32> to vector<4x32xbf16>
    %cst_89 = arith.constant dense<0.000000e+00> : vector<4x128xf32>
    %435 = tpu.matmul %434, %3, %cst_89 {dimension_numbers = #tpu.dot_dimension_numbers<[1], [0], [0], [1], [0, 0, 1, 1], [], []>} : vector<4x32xbf16>, vector<32x128xbf16>, vector<4x128xf32> -> vector<4x128xf32>
    %436 = arith.addf %433, %435 : vector<4x128xf32>
    %437 = vector.extract_strided_slice %8 {offsets = [0, 128], sizes = [4, 128], strides = [1, 1]} : vector<32x256xf32> to vector<4x128xf32>
    %438 = arith.truncf %430 : vector<4x32xf32> to vector<4x32xbf16>
    %cst_90 = arith.constant dense<0.000000e+00> : vector<4x128xf32>
    %439 = tpu.matmul %438, %4, %cst_90 {dimension_numbers = #tpu.dot_dimension_numbers<[1], [0], [0], [1], [0, 0, 1, 1], [], []>} : vector<4x32xbf16>, vector<32x128xbf16>, vector<4x128xf32> -> vector<4x128xf32>
    %440 = arith.addf %437, %439 : vector<4x128xf32>
    %441 = vector.extract_strided_slice %436 {offsets = [0, 0], sizes = [4, 32], strides = [1, 1]} : vector<4x128xf32> to vector<4x32xf32>
    %442 = arith.negf %441 : vector<4x32xf32>
    %443 = math.exp %442 : vector<4x32xf32>
    %cst_91 = arith.constant 1.000000e+00 : f32
    %444 = vector.broadcast %cst_91 : f32 to vector<4x32xf32>
    %445 = arith.addf %444, %443 : vector<4x32xf32>
    %446 = arith.divf %444, %445 : vector<4x32xf32>
    %447 = vector.extract_strided_slice %436 {offsets = [0, 32], sizes = [4, 32], strides = [1, 1]} : vector<4x128xf32> to vector<4x32xf32>
    %448 = arith.negf %447 : vector<4x32xf32>
    %449 = math.exp %448 : vector<4x32xf32>
    %cst_92 = arith.constant 1.000000e+00 : f32
    %450 = vector.broadcast %cst_92 : f32 to vector<4x32xf32>
    %451 = arith.addf %450, %449 : vector<4x32xf32>
    %452 = arith.divf %450, %451 : vector<4x32xf32>
    %453 = vector.extract_strided_slice %436 {offsets = [0, 64], sizes = [4, 32], strides = [1, 1]} : vector<4x128xf32> to vector<4x32xf32>
    %454 = math.tanh %453 : vector<4x32xf32>
    %455 = vector.extract_strided_slice %436 {offsets = [0, 96], sizes = [4, 32], strides = [1, 1]} : vector<4x128xf32> to vector<4x32xf32>
    %456 = arith.negf %455 : vector<4x32xf32>
    %457 = math.exp %456 : vector<4x32xf32>
    %cst_93 = arith.constant 1.000000e+00 : f32
    %458 = vector.broadcast %cst_93 : f32 to vector<4x32xf32>
    %459 = arith.addf %458, %457 : vector<4x32xf32>
    %460 = arith.divf %458, %459 : vector<4x32xf32>
    %461 = arith.mulf %452, %403 : vector<4x32xf32>
    %462 = arith.mulf %446, %454 : vector<4x32xf32>
    %463 = arith.addf %461, %462 : vector<4x32xf32>
    %464 = math.tanh %463 : vector<4x32xf32>
    %465 = arith.mulf %460, %464 : vector<4x32xf32>
    %466 = vector.extract_strided_slice %440 {offsets = [0, 0], sizes = [4, 32], strides = [1, 1]} : vector<4x128xf32> to vector<4x32xf32>
    %467 = arith.negf %466 : vector<4x32xf32>
    %468 = math.exp %467 : vector<4x32xf32>
    %cst_94 = arith.constant 1.000000e+00 : f32
    %469 = vector.broadcast %cst_94 : f32 to vector<4x32xf32>
    %470 = arith.addf %469, %468 : vector<4x32xf32>
    %471 = arith.divf %469, %470 : vector<4x32xf32>
    %472 = vector.extract_strided_slice %440 {offsets = [0, 32], sizes = [4, 32], strides = [1, 1]} : vector<4x128xf32> to vector<4x32xf32>
    %473 = arith.negf %472 : vector<4x32xf32>
    %474 = math.exp %473 : vector<4x32xf32>
    %cst_95 = arith.constant 1.000000e+00 : f32
    %475 = vector.broadcast %cst_95 : f32 to vector<4x32xf32>
    %476 = arith.addf %475, %474 : vector<4x32xf32>
    %477 = arith.divf %475, %476 : vector<4x32xf32>
    %478 = vector.extract_strided_slice %440 {offsets = [0, 64], sizes = [4, 32], strides = [1, 1]} : vector<4x128xf32> to vector<4x32xf32>
    %479 = math.tanh %478 : vector<4x32xf32>
    %480 = vector.extract_strided_slice %440 {offsets = [0, 96], sizes = [4, 32], strides = [1, 1]} : vector<4x128xf32> to vector<4x32xf32>
    %481 = arith.negf %480 : vector<4x32xf32>
    %482 = math.exp %481 : vector<4x32xf32>
    %cst_96 = arith.constant 1.000000e+00 : f32
    %483 = vector.broadcast %cst_96 : f32 to vector<4x32xf32>
    %484 = arith.addf %483, %482 : vector<4x32xf32>
    %485 = arith.divf %483, %484 : vector<4x32xf32>
    %486 = arith.mulf %477, %428 : vector<4x32xf32>
    %487 = arith.mulf %471, %479 : vector<4x32xf32>
    %488 = arith.addf %486, %487 : vector<4x32xf32>
    %489 = math.tanh %488 : vector<4x32xf32>
    %490 = arith.mulf %485, %489 : vector<4x32xf32>
    %c28_97 = arith.constant 28 : index
    %c0_98 = arith.constant 0 : index
    %491 = vector.load %arg11[%c28_97, %c0_98] : memref<32x64xf32, #tpu.memory_space<vmem>>, vector<4x32xf32>
    tpu.vector_store %arg11[%c28_97, %c0_98], %465 {strides = array<i32>} : memref<32x64xf32, #tpu.memory_space<vmem>>, vector<4x32xf32>,
    %c0_99 = arith.constant 0 : index
    %c32_100 = arith.constant 32 : index
    %492 = vector.load %arg11[%c0_99, %c32_100] : memref<32x64xf32, #tpu.memory_space<vmem>>, vector<4x32xf32>
    tpu.vector_store %arg11[%c0_99, %c32_100], %490 {strides = array<i32>} : memref<32x64xf32, #tpu.memory_space<vmem>>, vector<4x32xf32>,
    %c0_101 = arith.constant 0 : index
    %c0_102 = arith.constant 0 : index
    %493 = vector.load %arg11[%c0_101, %c0_102] : memref<32x64xf32, #tpu.memory_space<vmem>>, vector<32x64xf32>
    %494 = arith.truncf %493 : vector<32x64xf32> to vector<32x64xbf16>
    %c0_103 = arith.constant 0 : index
    %c0_104 = arith.constant 0 : index
    %495 = vector.load %arg6[%c0_103, %c0_104] : memref<64x256xbf16, #tpu.memory_space<vmem>>, vector<64x256xbf16>
    %c0_105 = arith.constant 0 : index
    %c0_106 = arith.constant 0 : index
    %496 = vector.load %arg7[%c0_105, %c0_106] : memref<32x128xbf16, #tpu.memory_space<vmem>>, vector<32x128xbf16>
    %c0_107 = arith.constant 0 : index
    %c0_108 = arith.constant 0 : index
    %497 = vector.load %arg8[%c0_107, %c0_108] : memref<32x128xbf16, #tpu.memory_space<vmem>>, vector<32x128xbf16>
    %c0_109 = arith.constant 0 : index
    %c0_110 = arith.constant 0 : index
    %498 = vector.load %arg9[%c0_109, %c0_110] : memref<1x256xf32, #tpu.memory_space<vmem>>, vector<1x256xf32>
    %cst_111 = arith.constant dense<0.000000e+00> : vector<32x256xf32>
    %499 = tpu.matmul %494, %495, %cst_111 {dimension_numbers = #tpu.dot_dimension_numbers<[1], [0], [0], [1], [0, 0, 1, 1], [], []>} : vector<32x64xbf16>, vector<64x256xbf16>, vector<32x256xf32> -> vector<32x256xf32>
    %500 = vector.broadcast %498 : vector<1x256xf32> to vector<32x256xf32>
    %501 = arith.addf %499, %500 : vector<32x256xf32>
    %cst_112 = arith.constant 0.000000e+00 : f32
    %502 = vector.broadcast %cst_112 : f32 to vector<4x32xf32>
    %cst_113 = arith.constant 0.000000e+00 : f32
    %503 = vector.broadcast %cst_113 : f32 to vector<4x32xf32>
    %cst_114 = arith.constant 0.000000e+00 : f32
    %504 = vector.broadcast %cst_114 : f32 to vector<4x32xf32>
    %cst_115 = arith.constant 0.000000e+00 : f32
    %505 = vector.broadcast %cst_115 : f32 to vector<4x32xf32>
    %506 = vector.extract_strided_slice %501 {offsets = [0, 0], sizes = [4, 128], strides = [1, 1]} : vector<32x256xf32> to vector<4x128xf32>
    %507 = arith.truncf %502 : vector<4x32xf32> to vector<4x32xbf16>
    %cst_116 = arith.constant dense<0.000000e+00> : vector<4x128xf32>
    %508 = tpu.matmul %507, %496, %cst_116 {dimension_numbers = #tpu.dot_dimension_numbers<[1], [0], [0], [1], [0, 0, 1, 1], [], []>} : vector<4x32xbf16>, vector<32x128xbf16>, vector<4x128xf32> -> vector<4x128xf32>
    %509 = arith.addf %506, %508 : vector<4x128xf32>
    %510 = vector.extract_strided_slice %501 {offsets = [28, 128], sizes = [4, 128], strides = [1, 1]} : vector<32x256xf32> to vector<4x128xf32>
    %511 = arith.truncf %504 : vector<4x32xf32> to vector<4x32xbf16>
    %cst_117 = arith.constant dense<0.000000e+00> : vector<4x128xf32>
    %512 = tpu.matmul %511, %497, %cst_117 {dimension_numbers = #tpu.dot_dimension_numbers<[1], [0], [0], [1], [0, 0, 1, 1], [], []>} : vector<4x32xbf16>, vector<32x128xbf16>, vector<4x128xf32> -> vector<4x128xf32>
    %513 = arith.addf %510, %512 : vector<4x128xf32>
    %514 = vector.extract_strided_slice %509 {offsets = [0, 0], sizes = [4, 32], strides = [1, 1]} : vector<4x128xf32> to vector<4x32xf32>
    %515 = arith.negf %514 : vector<4x32xf32>
    %516 = math.exp %515 : vector<4x32xf32>
    %cst_118 = arith.constant 1.000000e+00 : f32
    %517 = vector.broadcast %cst_118 : f32 to vector<4x32xf32>
    %518 = arith.addf %517, %516 : vector<4x32xf32>
    %519 = arith.divf %517, %518 : vector<4x32xf32>
    %520 = vector.extract_strided_slice %509 {offsets = [0, 32], sizes = [4, 32], strides = [1, 1]} : vector<4x128xf32> to vector<4x32xf32>
    %521 = arith.negf %520 : vector<4x32xf32>
    %522 = math.exp %521 : vector<4x32xf32>
    %cst_119 = arith.constant 1.000000e+00 : f32
    %523 = vector.broadcast %cst_119 : f32 to vector<4x32xf32>
    %524 = arith.addf %523, %522 : vector<4x32xf32>
    %525 = arith.divf %523, %524 : vector<4x32xf32>
    %526 = vector.extract_strided_slice %509 {offsets = [0, 64], sizes = [4, 32], strides = [1, 1]} : vector<4x128xf32> to vector<4x32xf32>
    %527 = math.tanh %526 : vector<4x32xf32>
    %528 = vector.extract_strided_slice %509 {offsets = [0, 96], sizes = [4, 32], strides = [1, 1]} : vector<4x128xf32> to vector<4x32xf32>
    %529 = arith.negf %528 : vector<4x32xf32>
    %530 = math.exp %529 : vector<4x32xf32>
    %cst_120 = arith.constant 1.000000e+00 : f32
    %531 = vector.broadcast %cst_120 : f32 to vector<4x32xf32>
    %532 = arith.addf %531, %530 : vector<4x32xf32>
    %533 = arith.divf %531, %532 : vector<4x32xf32>
    %534 = arith.mulf %525, %503 : vector<4x32xf32>
    %535 = arith.mulf %519, %527 : vector<4x32xf32>
    %536 = arith.addf %534, %535 : vector<4x32xf32>
    %537 = math.tanh %536 : vector<4x32xf32>
    %538 = arith.mulf %533, %537 : vector<4x32xf32>
    %539 = vector.extract_strided_slice %513 {offsets = [0, 0], sizes = [4, 32], strides = [1, 1]} : vector<4x128xf32> to vector<4x32xf32>
    %540 = arith.negf %539 : vector<4x32xf32>
    %541 = math.exp %540 : vector<4x32xf32>
    %cst_121 = arith.constant 1.000000e+00 : f32
    %542 = vector.broadcast %cst_121 : f32 to vector<4x32xf32>
    %543 = arith.addf %542, %541 : vector<4x32xf32>
    %544 = arith.divf %542, %543 : vector<4x32xf32>
    %545 = vector.extract_strided_slice %513 {offsets = [0, 32], sizes = [4, 32], strides = [1, 1]} : vector<4x128xf32> to vector<4x32xf32>
    %546 = arith.negf %545 : vector<4x32xf32>
    %547 = math.exp %546 : vector<4x32xf32>
    %cst_122 = arith.constant 1.000000e+00 : f32
    %548 = vector.broadcast %cst_122 : f32 to vector<4x32xf32>
    %549 = arith.addf %548, %547 : vector<4x32xf32>
    %550 = arith.divf %548, %549 : vector<4x32xf32>
    %551 = vector.extract_strided_slice %513 {offsets = [0, 64], sizes = [4, 32], strides = [1, 1]} : vector<4x128xf32> to vector<4x32xf32>
    %552 = math.tanh %551 : vector<4x32xf32>
    %553 = vector.extract_strided_slice %513 {offsets = [0, 96], sizes = [4, 32], strides = [1, 1]} : vector<4x128xf32> to vector<4x32xf32>
    %554 = arith.negf %553 : vector<4x32xf32>
    %555 = math.exp %554 : vector<4x32xf32>
    %cst_123 = arith.constant 1.000000e+00 : f32
    %556 = vector.broadcast %cst_123 : f32 to vector<4x32xf32>
    %557 = arith.addf %556, %555 : vector<4x32xf32>
    %558 = arith.divf %556, %557 : vector<4x32xf32>
    %559 = arith.mulf %550, %505 : vector<4x32xf32>
    %560 = arith.mulf %544, %552 : vector<4x32xf32>
    %561 = arith.addf %559, %560 : vector<4x32xf32>
    %562 = math.tanh %561 : vector<4x32xf32>
    %563 = arith.mulf %558, %562 : vector<4x32xf32>
    %564 = vector.extract_strided_slice %501 {offsets = [4, 0], sizes = [4, 128], strides = [1, 1]} : vector<32x256xf32> to vector<4x128xf32>
    %565 = arith.truncf %538 : vector<4x32xf32> to vector<4x32xbf16>
    %cst_124 = arith.constant dense<0.000000e+00> : vector<4x128xf32>
    %566 = tpu.matmul %565, %496, %cst_124 {dimension_numbers = #tpu.dot_dimension_numbers<[1], [0], [0], [1], [0, 0, 1, 1], [], []>} : vector<4x32xbf16>, vector<32x128xbf16>, vector<4x128xf32> -> vector<4x128xf32>
    %567 = arith.addf %564, %566 : vector<4x128xf32>
    %568 = vector.extract_strided_slice %501 {offsets = [24, 128], sizes = [4, 128], strides = [1, 1]} : vector<32x256xf32> to vector<4x128xf32>
    %569 = arith.truncf %563 : vector<4x32xf32> to vector<4x32xbf16>
    %cst_125 = arith.constant dense<0.000000e+00> : vector<4x128xf32>
    %570 = tpu.matmul %569, %497, %cst_125 {dimension_numbers = #tpu.dot_dimension_numbers<[1], [0], [0], [1], [0, 0, 1, 1], [], []>} : vector<4x32xbf16>, vector<32x128xbf16>, vector<4x128xf32> -> vector<4x128xf32>
    %571 = arith.addf %568, %570 : vector<4x128xf32>
    %572 = vector.extract_strided_slice %567 {offsets = [0, 0], sizes = [4, 32], strides = [1, 1]} : vector<4x128xf32> to vector<4x32xf32>
    %573 = arith.negf %572 : vector<4x32xf32>
    %574 = math.exp %573 : vector<4x32xf32>
    %cst_126 = arith.constant 1.000000e+00 : f32
    %575 = vector.broadcast %cst_126 : f32 to vector<4x32xf32>
    %576 = arith.addf %575, %574 : vector<4x32xf32>
    %577 = arith.divf %575, %576 : vector<4x32xf32>
    %578 = vector.extract_strided_slice %567 {offsets = [0, 32], sizes = [4, 32], strides = [1, 1]} : vector<4x128xf32> to vector<4x32xf32>
    %579 = arith.negf %578 : vector<4x32xf32>
    %580 = math.exp %579 : vector<4x32xf32>
    %cst_127 = arith.constant 1.000000e+00 : f32
    %581 = vector.broadcast %cst_127 : f32 to vector<4x32xf32>
    %582 = arith.addf %581, %580 : vector<4x32xf32>
    %583 = arith.divf %581, %582 : vector<4x32xf32>
    %584 = vector.extract_strided_slice %567 {offsets = [0, 64], sizes = [4, 32], strides = [1, 1]} : vector<4x128xf32> to vector<4x32xf32>
    %585 = math.tanh %584 : vector<4x32xf32>
    %586 = vector.extract_strided_slice %567 {offsets = [0, 96], sizes = [4, 32], strides = [1, 1]} : vector<4x128xf32> to vector<4x32xf32>
    %587 = arith.negf %586 : vector<4x32xf32>
    %588 = math.exp %587 : vector<4x32xf32>
    %cst_128 = arith.constant 1.000000e+00 : f32
    %589 = vector.broadcast %cst_128 : f32 to vector<4x32xf32>
    %590 = arith.addf %589, %588 : vector<4x32xf32>
    %591 = arith.divf %589, %590 : vector<4x32xf32>
    %592 = arith.mulf %583, %536 : vector<4x32xf32>
    %593 = arith.mulf %577, %585 : vector<4x32xf32>
    %594 = arith.addf %592, %593 : vector<4x32xf32>
    %595 = math.tanh %594 : vector<4x32xf32>
    %596 = arith.mulf %591, %595 : vector<4x32xf32>
    %597 = vector.extract_strided_slice %571 {offsets = [0, 0], sizes = [4, 32], strides = [1, 1]} : vector<4x128xf32> to vector<4x32xf32>
    %598 = arith.negf %597 : vector<4x32xf32>
    %599 = math.exp %598 : vector<4x32xf32>
    %cst_129 = arith.constant 1.000000e+00 : f32
    %600 = vector.broadcast %cst_129 : f32 to vector<4x32xf32>
    %601 = arith.addf %600, %599 : vector<4x32xf32>
    %602 = arith.divf %600, %601 : vector<4x32xf32>
    %603 = vector.extract_strided_slice %571 {offsets = [0, 32], sizes = [4, 32], strides = [1, 1]} : vector<4x128xf32> to vector<4x32xf32>
    %604 = arith.negf %603 : vector<4x32xf32>
    %605 = math.exp %604 : vector<4x32xf32>
    %cst_130 = arith.constant 1.000000e+00 : f32
    %606 = vector.broadcast %cst_130 : f32 to vector<4x32xf32>
    %607 = arith.addf %606, %605 : vector<4x32xf32>
    %608 = arith.divf %606, %607 : vector<4x32xf32>
    %609 = vector.extract_strided_slice %571 {offsets = [0, 64], sizes = [4, 32], strides = [1, 1]} : vector<4x128xf32> to vector<4x32xf32>
    %610 = math.tanh %609 : vector<4x32xf32>
    %611 = vector.extract_strided_slice %571 {offsets = [0, 96], sizes = [4, 32], strides = [1, 1]} : vector<4x128xf32> to vector<4x32xf32>
    %612 = arith.negf %611 : vector<4x32xf32>
    %613 = math.exp %612 : vector<4x32xf32>
    %cst_131 = arith.constant 1.000000e+00 : f32
    %614 = vector.broadcast %cst_131 : f32 to vector<4x32xf32>
    %615 = arith.addf %614, %613 : vector<4x32xf32>
    %616 = arith.divf %614, %615 : vector<4x32xf32>
    %617 = arith.mulf %608, %561 : vector<4x32xf32>
    %618 = arith.mulf %602, %610 : vector<4x32xf32>
    %619 = arith.addf %617, %618 : vector<4x32xf32>
    %620 = math.tanh %619 : vector<4x32xf32>
    %621 = arith.mulf %616, %620 : vector<4x32xf32>
    %622 = vector.extract_strided_slice %501 {offsets = [8, 0], sizes = [4, 128], strides = [1, 1]} : vector<32x256xf32> to vector<4x128xf32>
    %623 = arith.truncf %596 : vector<4x32xf32> to vector<4x32xbf16>
    %cst_132 = arith.constant dense<0.000000e+00> : vector<4x128xf32>
    %624 = tpu.matmul %623, %496, %cst_132 {dimension_numbers = #tpu.dot_dimension_numbers<[1], [0], [0], [1], [0, 0, 1, 1], [], []>} : vector<4x32xbf16>, vector<32x128xbf16>, vector<4x128xf32> -> vector<4x128xf32>
    %625 = arith.addf %622, %624 : vector<4x128xf32>
    %626 = vector.extract_strided_slice %501 {offsets = [20, 128], sizes = [4, 128], strides = [1, 1]} : vector<32x256xf32> to vector<4x128xf32>
    %627 = arith.truncf %621 : vector<4x32xf32> to vector<4x32xbf16>
    %cst_133 = arith.constant dense<0.000000e+00> : vector<4x128xf32>
    %628 = tpu.matmul %627, %497, %cst_133 {dimension_numbers = #tpu.dot_dimension_numbers<[1], [0], [0], [1], [0, 0, 1, 1], [], []>} : vector<4x32xbf16>, vector<32x128xbf16>, vector<4x128xf32> -> vector<4x128xf32>
    %629 = arith.addf %626, %628 : vector<4x128xf32>
    %630 = vector.extract_strided_slice %625 {offsets = [0, 0], sizes = [4, 32], strides = [1, 1]} : vector<4x128xf32> to vector<4x32xf32>
    %631 = arith.negf %630 : vector<4x32xf32>
    %632 = math.exp %631 : vector<4x32xf32>
    %cst_134 = arith.constant 1.000000e+00 : f32
    %633 = vector.broadcast %cst_134 : f32 to vector<4x32xf32>
    %634 = arith.addf %633, %632 : vector<4x32xf32>
    %635 = arith.divf %633, %634 : vector<4x32xf32>
    %636 = vector.extract_strided_slice %625 {offsets = [0, 32], sizes = [4, 32], strides = [1, 1]} : vector<4x128xf32> to vector<4x32xf32>
    %637 = arith.negf %636 : vector<4x32xf32>
    %638 = math.exp %637 : vector<4x32xf32>
    %cst_135 = arith.constant 1.000000e+00 : f32
    %639 = vector.broadcast %cst_135 : f32 to vector<4x32xf32>
    %640 = arith.addf %639, %638 : vector<4x32xf32>
    %641 = arith.divf %639, %640 : vector<4x32xf32>
    %642 = vector.extract_strided_slice %625 {offsets = [0, 64], sizes = [4, 32], strides = [1, 1]} : vector<4x128xf32> to vector<4x32xf32>
    %643 = math.tanh %642 : vector<4x32xf32>
    %644 = vector.extract_strided_slice %625 {offsets = [0, 96], sizes = [4, 32], strides = [1, 1]} : vector<4x128xf32> to vector<4x32xf32>
    %645 = arith.negf %644 : vector<4x32xf32>
    %646 = math.exp %645 : vector<4x32xf32>
    %cst_136 = arith.constant 1.000000e+00 : f32
    %647 = vector.broadcast %cst_136 : f32 to vector<4x32xf32>
    %648 = arith.addf %647, %646 : vector<4x32xf32>
    %649 = arith.divf %647, %648 : vector<4x32xf32>
    %650 = arith.mulf %641, %594 : vector<4x32xf32>
    %651 = arith.mulf %635, %643 : vector<4x32xf32>
    %652 = arith.addf %650, %651 : vector<4x32xf32>
    %653 = math.tanh %652 : vector<4x32xf32>
    %654 = arith.mulf %649, %653 : vector<4x32xf32>
    %655 = vector.extract_strided_slice %629 {offsets = [0, 0], sizes = [4, 32], strides = [1, 1]} : vector<4x128xf32> to vector<4x32xf32>
    %656 = arith.negf %655 : vector<4x32xf32>
    %657 = math.exp %656 : vector<4x32xf32>
    %cst_137 = arith.constant 1.000000e+00 : f32
    %658 = vector.broadcast %cst_137 : f32 to vector<4x32xf32>
    %659 = arith.addf %658, %657 : vector<4x32xf32>
    %660 = arith.divf %658, %659 : vector<4x32xf32>
    %661 = vector.extract_strided_slice %629 {offsets = [0, 32], sizes = [4, 32], strides = [1, 1]} : vector<4x128xf32> to vector<4x32xf32>
    %662 = arith.negf %661 : vector<4x32xf32>
    %663 = math.exp %662 : vector<4x32xf32>
    %cst_138 = arith.constant 1.000000e+00 : f32
    %664 = vector.broadcast %cst_138 : f32 to vector<4x32xf32>
    %665 = arith.addf %664, %663 : vector<4x32xf32>
    %666 = arith.divf %664, %665 : vector<4x32xf32>
    %667 = vector.extract_strided_slice %629 {offsets = [0, 64], sizes = [4, 32], strides = [1, 1]} : vector<4x128xf32> to vector<4x32xf32>
    %668 = math.tanh %667 : vector<4x32xf32>
    %669 = vector.extract_strided_slice %629 {offsets = [0, 96], sizes = [4, 32], strides = [1, 1]} : vector<4x128xf32> to vector<4x32xf32>
    %670 = arith.negf %669 : vector<4x32xf32>
    %671 = math.exp %670 : vector<4x32xf32>
    %cst_139 = arith.constant 1.000000e+00 : f32
    %672 = vector.broadcast %cst_139 : f32 to vector<4x32xf32>
    %673 = arith.addf %672, %671 : vector<4x32xf32>
    %674 = arith.divf %672, %673 : vector<4x32xf32>
    %675 = arith.mulf %666, %619 : vector<4x32xf32>
    %676 = arith.mulf %660, %668 : vector<4x32xf32>
    %677 = arith.addf %675, %676 : vector<4x32xf32>
    %678 = math.tanh %677 : vector<4x32xf32>
    %679 = arith.mulf %674, %678 : vector<4x32xf32>
    %680 = vector.extract_strided_slice %501 {offsets = [12, 0], sizes = [4, 128], strides = [1, 1]} : vector<32x256xf32> to vector<4x128xf32>
    %681 = arith.truncf %654 : vector<4x32xf32> to vector<4x32xbf16>
    %cst_140 = arith.constant dense<0.000000e+00> : vector<4x128xf32>
    %682 = tpu.matmul %681, %496, %cst_140 {dimension_numbers = #tpu.dot_dimension_numbers<[1], [0], [0], [1], [0, 0, 1, 1], [], []>} : vector<4x32xbf16>, vector<32x128xbf16>, vector<4x128xf32> -> vector<4x128xf32>
    %683 = arith.addf %680, %682 : vector<4x128xf32>
    %684 = vector.extract_strided_slice %501 {offsets = [16, 128], sizes = [4, 128], strides = [1, 1]} : vector<32x256xf32> to vector<4x128xf32>
    %685 = arith.truncf %679 : vector<4x32xf32> to vector<4x32xbf16>
    %cst_141 = arith.constant dense<0.000000e+00> : vector<4x128xf32>
    %686 = tpu.matmul %685, %497, %cst_141 {dimension_numbers = #tpu.dot_dimension_numbers<[1], [0], [0], [1], [0, 0, 1, 1], [], []>} : vector<4x32xbf16>, vector<32x128xbf16>, vector<4x128xf32> -> vector<4x128xf32>
    %687 = arith.addf %684, %686 : vector<4x128xf32>
    %688 = vector.extract_strided_slice %683 {offsets = [0, 0], sizes = [4, 32], strides = [1, 1]} : vector<4x128xf32> to vector<4x32xf32>
    %689 = arith.negf %688 : vector<4x32xf32>
    %690 = math.exp %689 : vector<4x32xf32>
    %cst_142 = arith.constant 1.000000e+00 : f32
    %691 = vector.broadcast %cst_142 : f32 to vector<4x32xf32>
    %692 = arith.addf %691, %690 : vector<4x32xf32>
    %693 = arith.divf %691, %692 : vector<4x32xf32>
    %694 = vector.extract_strided_slice %683 {offsets = [0, 32], sizes = [4, 32], strides = [1, 1]} : vector<4x128xf32> to vector<4x32xf32>
    %695 = arith.negf %694 : vector<4x32xf32>
    %696 = math.exp %695 : vector<4x32xf32>
    %cst_143 = arith.constant 1.000000e+00 : f32
    %697 = vector.broadcast %cst_143 : f32 to vector<4x32xf32>
    %698 = arith.addf %697, %696 : vector<4x32xf32>
    %699 = arith.divf %697, %698 : vector<4x32xf32>
    %700 = vector.extract_strided_slice %683 {offsets = [0, 64], sizes = [4, 32], strides = [1, 1]} : vector<4x128xf32> to vector<4x32xf32>
    %701 = math.tanh %700 : vector<4x32xf32>
    %702 = vector.extract_strided_slice %683 {offsets = [0, 96], sizes = [4, 32], strides = [1, 1]} : vector<4x128xf32> to vector<4x32xf32>
    %703 = arith.negf %702 : vector<4x32xf32>
    %704 = math.exp %703 : vector<4x32xf32>
    %cst_144 = arith.constant 1.000000e+00 : f32
    %705 = vector.broadcast %cst_144 : f32 to vector<4x32xf32>
    %706 = arith.addf %705, %704 : vector<4x32xf32>
    %707 = arith.divf %705, %706 : vector<4x32xf32>
    %708 = arith.mulf %699, %652 : vector<4x32xf32>
    %709 = arith.mulf %693, %701 : vector<4x32xf32>
    %710 = arith.addf %708, %709 : vector<4x32xf32>
    %711 = math.tanh %710 : vector<4x32xf32>
    %712 = arith.mulf %707, %711 : vector<4x32xf32>
    %713 = vector.extract_strided_slice %687 {offsets = [0, 0], sizes = [4, 32], strides = [1, 1]} : vector<4x128xf32> to vector<4x32xf32>
    %714 = arith.negf %713 : vector<4x32xf32>
    %715 = math.exp %714 : vector<4x32xf32>
    %cst_145 = arith.constant 1.000000e+00 : f32
    %716 = vector.broadcast %cst_145 : f32 to vector<4x32xf32>
    %717 = arith.addf %716, %715 : vector<4x32xf32>
    %718 = arith.divf %716, %717 : vector<4x32xf32>
    %719 = vector.extract_strided_slice %687 {offsets = [0, 32], sizes = [4, 32], strides = [1, 1]} : vector<4x128xf32> to vector<4x32xf32>
    %720 = arith.negf %719 : vector<4x32xf32>
    %721 = math.exp %720 : vector<4x32xf32>
    %cst_146 = arith.constant 1.000000e+00 : f32
    %722 = vector.broadcast %cst_146 : f32 to vector<4x32xf32>
    %723 = arith.addf %722, %721 : vector<4x32xf32>
    %724 = arith.divf %722, %723 : vector<4x32xf32>
    %725 = vector.extract_strided_slice %687 {offsets = [0, 64], sizes = [4, 32], strides = [1, 1]} : vector<4x128xf32> to vector<4x32xf32>
    %726 = math.tanh %725 : vector<4x32xf32>
    %727 = vector.extract_strided_slice %687 {offsets = [0, 96], sizes = [4, 32], strides = [1, 1]} : vector<4x128xf32> to vector<4x32xf32>
    %728 = arith.negf %727 : vector<4x32xf32>
    %729 = math.exp %728 : vector<4x32xf32>
    %cst_147 = arith.constant 1.000000e+00 : f32
    %730 = vector.broadcast %cst_147 : f32 to vector<4x32xf32>
    %731 = arith.addf %730, %729 : vector<4x32xf32>
    %732 = arith.divf %730, %731 : vector<4x32xf32>
    %733 = arith.mulf %724, %677 : vector<4x32xf32>
    %734 = arith.mulf %718, %726 : vector<4x32xf32>
    %735 = arith.addf %733, %734 : vector<4x32xf32>
    %736 = math.tanh %735 : vector<4x32xf32>
    %737 = arith.mulf %732, %736 : vector<4x32xf32>
    %738 = vector.extract_strided_slice %501 {offsets = [16, 0], sizes = [4, 128], strides = [1, 1]} : vector<32x256xf32> to vector<4x128xf32>
    %739 = arith.truncf %712 : vector<4x32xf32> to vector<4x32xbf16>
    %cst_148 = arith.constant dense<0.000000e+00> : vector<4x128xf32>
    %740 = tpu.matmul %739, %496, %cst_148 {dimension_numbers = #tpu.dot_dimension_numbers<[1], [0], [0], [1], [0, 0, 1, 1], [], []>} : vector<4x32xbf16>, vector<32x128xbf16>, vector<4x128xf32> -> vector<4x128xf32>
    %741 = arith.addf %738, %740 : vector<4x128xf32>
    %742 = vector.extract_strided_slice %501 {offsets = [12, 128], sizes = [4, 128], strides = [1, 1]} : vector<32x256xf32> to vector<4x128xf32>
    %743 = arith.truncf %737 : vector<4x32xf32> to vector<4x32xbf16>
    %cst_149 = arith.constant dense<0.000000e+00> : vector<4x128xf32>
    %744 = tpu.matmul %743, %497, %cst_149 {dimension_numbers = #tpu.dot_dimension_numbers<[1], [0], [0], [1], [0, 0, 1, 1], [], []>} : vector<4x32xbf16>, vector<32x128xbf16>, vector<4x128xf32> -> vector<4x128xf32>
    %745 = arith.addf %742, %744 : vector<4x128xf32>
    %746 = vector.extract_strided_slice %741 {offsets = [0, 0], sizes = [4, 32], strides = [1, 1]} : vector<4x128xf32> to vector<4x32xf32>
    %747 = arith.negf %746 : vector<4x32xf32>
    %748 = math.exp %747 : vector<4x32xf32>
    %cst_150 = arith.constant 1.000000e+00 : f32
    %749 = vector.broadcast %cst_150 : f32 to vector<4x32xf32>
    %750 = arith.addf %749, %748 : vector<4x32xf32>
    %751 = arith.divf %749, %750 : vector<4x32xf32>
    %752 = vector.extract_strided_slice %741 {offsets = [0, 32], sizes = [4, 32], strides = [1, 1]} : vector<4x128xf32> to vector<4x32xf32>
    %753 = arith.negf %752 : vector<4x32xf32>
    %754 = math.exp %753 : vector<4x32xf32>
    %cst_151 = arith.constant 1.000000e+00 : f32
    %755 = vector.broadcast %cst_151 : f32 to vector<4x32xf32>
    %756 = arith.addf %755, %754 : vector<4x32xf32>
    %757 = arith.divf %755, %756 : vector<4x32xf32>
    %758 = vector.extract_strided_slice %741 {offsets = [0, 64], sizes = [4, 32], strides = [1, 1]} : vector<4x128xf32> to vector<4x32xf32>
    %759 = math.tanh %758 : vector<4x32xf32>
    %760 = vector.extract_strided_slice %741 {offsets = [0, 96], sizes = [4, 32], strides = [1, 1]} : vector<4x128xf32> to vector<4x32xf32>
    %761 = arith.negf %760 : vector<4x32xf32>
    %762 = math.exp %761 : vector<4x32xf32>
    %cst_152 = arith.constant 1.000000e+00 : f32
    %763 = vector.broadcast %cst_152 : f32 to vector<4x32xf32>
    %764 = arith.addf %763, %762 : vector<4x32xf32>
    %765 = arith.divf %763, %764 : vector<4x32xf32>
    %766 = arith.mulf %757, %710 : vector<4x32xf32>
    %767 = arith.mulf %751, %759 : vector<4x32xf32>
    %768 = arith.addf %766, %767 : vector<4x32xf32>
    %769 = math.tanh %768 : vector<4x32xf32>
    %770 = arith.mulf %765, %769 : vector<4x32xf32>
    %771 = vector.extract_strided_slice %745 {offsets = [0, 0], sizes = [4, 32], strides = [1, 1]} : vector<4x128xf32> to vector<4x32xf32>
    %772 = arith.negf %771 : vector<4x32xf32>
    %773 = math.exp %772 : vector<4x32xf32>
    %cst_153 = arith.constant 1.000000e+00 : f32
    %774 = vector.broadcast %cst_153 : f32 to vector<4x32xf32>
    %775 = arith.addf %774, %773 : vector<4x32xf32>
    %776 = arith.divf %774, %775 : vector<4x32xf32>
    %777 = vector.extract_strided_slice %745 {offsets = [0, 32], sizes = [4, 32], strides = [1, 1]} : vector<4x128xf32> to vector<4x32xf32>
    %778 = arith.negf %777 : vector<4x32xf32>
    %779 = math.exp %778 : vector<4x32xf32>
    %cst_154 = arith.constant 1.000000e+00 : f32
    %780 = vector.broadcast %cst_154 : f32 to vector<4x32xf32>
    %781 = arith.addf %780, %779 : vector<4x32xf32>
    %782 = arith.divf %780, %781 : vector<4x32xf32>
    %783 = vector.extract_strided_slice %745 {offsets = [0, 64], sizes = [4, 32], strides = [1, 1]} : vector<4x128xf32> to vector<4x32xf32>
    %784 = math.tanh %783 : vector<4x32xf32>
    %785 = vector.extract_strided_slice %745 {offsets = [0, 96], sizes = [4, 32], strides = [1, 1]} : vector<4x128xf32> to vector<4x32xf32>
    %786 = arith.negf %785 : vector<4x32xf32>
    %787 = math.exp %786 : vector<4x32xf32>
    %cst_155 = arith.constant 1.000000e+00 : f32
    %788 = vector.broadcast %cst_155 : f32 to vector<4x32xf32>
    %789 = arith.addf %788, %787 : vector<4x32xf32>
    %790 = arith.divf %788, %789 : vector<4x32xf32>
    %791 = arith.mulf %782, %735 : vector<4x32xf32>
    %792 = arith.mulf %776, %784 : vector<4x32xf32>
    %793 = arith.addf %791, %792 : vector<4x32xf32>
    %794 = math.tanh %793 : vector<4x32xf32>
    %795 = arith.mulf %790, %794 : vector<4x32xf32>
    %796 = vector.extract_strided_slice %501 {offsets = [20, 0], sizes = [4, 128], strides = [1, 1]} : vector<32x256xf32> to vector<4x128xf32>
    %797 = arith.truncf %770 : vector<4x32xf32> to vector<4x32xbf16>
    %cst_156 = arith.constant dense<0.000000e+00> : vector<4x128xf32>
    %798 = tpu.matmul %797, %496, %cst_156 {dimension_numbers = #tpu.dot_dimension_numbers<[1], [0], [0], [1], [0, 0, 1, 1], [], []>} : vector<4x32xbf16>, vector<32x128xbf16>, vector<4x128xf32> -> vector<4x128xf32>
    %799 = arith.addf %796, %798 : vector<4x128xf32>
    %800 = vector.extract_strided_slice %501 {offsets = [8, 128], sizes = [4, 128], strides = [1, 1]} : vector<32x256xf32> to vector<4x128xf32>
    %801 = arith.truncf %795 : vector<4x32xf32> to vector<4x32xbf16>
    %cst_157 = arith.constant dense<0.000000e+00> : vector<4x128xf32>
    %802 = tpu.matmul %801, %497, %cst_157 {dimension_numbers = #tpu.dot_dimension_numbers<[1], [0], [0], [1], [0, 0, 1, 1], [], []>} : vector<4x32xbf16>, vector<32x128xbf16>, vector<4x128xf32> -> vector<4x128xf32>
    %803 = arith.addf %800, %802 : vector<4x128xf32>
    %804 = vector.extract_strided_slice %799 {offsets = [0, 0], sizes = [4, 32], strides = [1, 1]} : vector<4x128xf32> to vector<4x32xf32>
    %805 = arith.negf %804 : vector<4x32xf32>
    %806 = math.exp %805 : vector<4x32xf32>
    %cst_158 = arith.constant 1.000000e+00 : f32
    %807 = vector.broadcast %cst_158 : f32 to vector<4x32xf32>
    %808 = arith.addf %807, %806 : vector<4x32xf32>
    %809 = arith.divf %807, %808 : vector<4x32xf32>
    %810 = vector.extract_strided_slice %799 {offsets = [0, 32], sizes = [4, 32], strides = [1, 1]} : vector<4x128xf32> to vector<4x32xf32>
    %811 = arith.negf %810 : vector<4x32xf32>
    %812 = math.exp %811 : vector<4x32xf32>
    %cst_159 = arith.constant 1.000000e+00 : f32
    %813 = vector.broadcast %cst_159 : f32 to vector<4x32xf32>
    %814 = arith.addf %813, %812 : vector<4x32xf32>
    %815 = arith.divf %813, %814 : vector<4x32xf32>
    %816 = vector.extract_strided_slice %799 {offsets = [0, 64], sizes = [4, 32], strides = [1, 1]} : vector<4x128xf32> to vector<4x32xf32>
    %817 = math.tanh %816 : vector<4x32xf32>
    %818 = vector.extract_strided_slice %799 {offsets = [0, 96], sizes = [4, 32], strides = [1, 1]} : vector<4x128xf32> to vector<4x32xf32>
    %819 = arith.negf %818 : vector<4x32xf32>
    %820 = math.exp %819 : vector<4x32xf32>
    %cst_160 = arith.constant 1.000000e+00 : f32
    %821 = vector.broadcast %cst_160 : f32 to vector<4x32xf32>
    %822 = arith.addf %821, %820 : vector<4x32xf32>
    %823 = arith.divf %821, %822 : vector<4x32xf32>
    %824 = arith.mulf %815, %768 : vector<4x32xf32>
    %825 = arith.mulf %809, %817 : vector<4x32xf32>
    %826 = arith.addf %824, %825 : vector<4x32xf32>
    %827 = math.tanh %826 : vector<4x32xf32>
    %828 = arith.mulf %823, %827 : vector<4x32xf32>
    %829 = vector.extract_strided_slice %803 {offsets = [0, 0], sizes = [4, 32], strides = [1, 1]} : vector<4x128xf32> to vector<4x32xf32>
    %830 = arith.negf %829 : vector<4x32xf32>
    %831 = math.exp %830 : vector<4x32xf32>
    %cst_161 = arith.constant 1.000000e+00 : f32
    %832 = vector.broadcast %cst_161 : f32 to vector<4x32xf32>
    %833 = arith.addf %832, %831 : vector<4x32xf32>
    %834 = arith.divf %832, %833 : vector<4x32xf32>
    %835 = vector.extract_strided_slice %803 {offsets = [0, 32], sizes = [4, 32], strides = [1, 1]} : vector<4x128xf32> to vector<4x32xf32>
    %836 = arith.negf %835 : vector<4x32xf32>
    %837 = math.exp %836 : vector<4x32xf32>
    %cst_162 = arith.constant 1.000000e+00 : f32
    %838 = vector.broadcast %cst_162 : f32 to vector<4x32xf32>
    %839 = arith.addf %838, %837 : vector<4x32xf32>
    %840 = arith.divf %838, %839 : vector<4x32xf32>
    %841 = vector.extract_strided_slice %803 {offsets = [0, 64], sizes = [4, 32], strides = [1, 1]} : vector<4x128xf32> to vector<4x32xf32>
    %842 = math.tanh %841 : vector<4x32xf32>
    %843 = vector.extract_strided_slice %803 {offsets = [0, 96], sizes = [4, 32], strides = [1, 1]} : vector<4x128xf32> to vector<4x32xf32>
    %844 = arith.negf %843 : vector<4x32xf32>
    %845 = math.exp %844 : vector<4x32xf32>
    %cst_163 = arith.constant 1.000000e+00 : f32
    %846 = vector.broadcast %cst_163 : f32 to vector<4x32xf32>
    %847 = arith.addf %846, %845 : vector<4x32xf32>
    %848 = arith.divf %846, %847 : vector<4x32xf32>
    %849 = arith.mulf %840, %793 : vector<4x32xf32>
    %850 = arith.mulf %834, %842 : vector<4x32xf32>
    %851 = arith.addf %849, %850 : vector<4x32xf32>
    %852 = math.tanh %851 : vector<4x32xf32>
    %853 = arith.mulf %848, %852 : vector<4x32xf32>
    %854 = vector.extract_strided_slice %501 {offsets = [24, 0], sizes = [4, 128], strides = [1, 1]} : vector<32x256xf32> to vector<4x128xf32>
    %855 = arith.truncf %828 : vector<4x32xf32> to vector<4x32xbf16>
    %cst_164 = arith.constant dense<0.000000e+00> : vector<4x128xf32>
    %856 = tpu.matmul %855, %496, %cst_164 {dimension_numbers = #tpu.dot_dimension_numbers<[1], [0], [0], [1], [0, 0, 1, 1], [], []>} : vector<4x32xbf16>, vector<32x128xbf16>, vector<4x128xf32> -> vector<4x128xf32>
    %857 = arith.addf %854, %856 : vector<4x128xf32>
    %858 = vector.extract_strided_slice %501 {offsets = [4, 128], sizes = [4, 128], strides = [1, 1]} : vector<32x256xf32> to vector<4x128xf32>
    %859 = arith.truncf %853 : vector<4x32xf32> to vector<4x32xbf16>
    %cst_165 = arith.constant dense<0.000000e+00> : vector<4x128xf32>
    %860 = tpu.matmul %859, %497, %cst_165 {dimension_numbers = #tpu.dot_dimension_numbers<[1], [0], [0], [1], [0, 0, 1, 1], [], []>} : vector<4x32xbf16>, vector<32x128xbf16>, vector<4x128xf32> -> vector<4x128xf32>
    %861 = arith.addf %858, %860 : vector<4x128xf32>
    %862 = vector.extract_strided_slice %857 {offsets = [0, 0], sizes = [4, 32], strides = [1, 1]} : vector<4x128xf32> to vector<4x32xf32>
    %863 = arith.negf %862 : vector<4x32xf32>
    %864 = math.exp %863 : vector<4x32xf32>
    %cst_166 = arith.constant 1.000000e+00 : f32
    %865 = vector.broadcast %cst_166 : f32 to vector<4x32xf32>
    %866 = arith.addf %865, %864 : vector<4x32xf32>
    %867 = arith.divf %865, %866 : vector<4x32xf32>
    %868 = vector.extract_strided_slice %857 {offsets = [0, 32], sizes = [4, 32], strides = [1, 1]} : vector<4x128xf32> to vector<4x32xf32>
    %869 = arith.negf %868 : vector<4x32xf32>
    %870 = math.exp %869 : vector<4x32xf32>
    %cst_167 = arith.constant 1.000000e+00 : f32
    %871 = vector.broadcast %cst_167 : f32 to vector<4x32xf32>
    %872 = arith.addf %871, %870 : vector<4x32xf32>
    %873 = arith.divf %871, %872 : vector<4x32xf32>
    %874 = vector.extract_strided_slice %857 {offsets = [0, 64], sizes = [4, 32], strides = [1, 1]} : vector<4x128xf32> to vector<4x32xf32>
    %875 = math.tanh %874 : vector<4x32xf32>
    %876 = vector.extract_strided_slice %857 {offsets = [0, 96], sizes = [4, 32], strides = [1, 1]} : vector<4x128xf32> to vector<4x32xf32>
    %877 = arith.negf %876 : vector<4x32xf32>
    %878 = math.exp %877 : vector<4x32xf32>
    %cst_168 = arith.constant 1.000000e+00 : f32
    %879 = vector.broadcast %cst_168 : f32 to vector<4x32xf32>
    %880 = arith.addf %879, %878 : vector<4x32xf32>
    %881 = arith.divf %879, %880 : vector<4x32xf32>
    %882 = arith.mulf %873, %826 : vector<4x32xf32>
    %883 = arith.mulf %867, %875 : vector<4x32xf32>
    %884 = arith.addf %882, %883 : vector<4x32xf32>
    %885 = math.tanh %884 : vector<4x32xf32>
    %886 = arith.mulf %881, %885 : vector<4x32xf32>
    %887 = vector.extract_strided_slice %861 {offsets = [0, 0], sizes = [4, 32], strides = [1, 1]} : vector<4x128xf32> to vector<4x32xf32>
    %888 = arith.negf %887 : vector<4x32xf32>
    %889 = math.exp %888 : vector<4x32xf32>
    %cst_169 = arith.constant 1.000000e+00 : f32
    %890 = vector.broadcast %cst_169 : f32 to vector<4x32xf32>
    %891 = arith.addf %890, %889 : vector<4x32xf32>
    %892 = arith.divf %890, %891 : vector<4x32xf32>
    %893 = vector.extract_strided_slice %861 {offsets = [0, 32], sizes = [4, 32], strides = [1, 1]} : vector<4x128xf32> to vector<4x32xf32>
    %894 = arith.negf %893 : vector<4x32xf32>
    %895 = math.exp %894 : vector<4x32xf32>
    %cst_170 = arith.constant 1.000000e+00 : f32
    %896 = vector.broadcast %cst_170 : f32 to vector<4x32xf32>
    %897 = arith.addf %896, %895 : vector<4x32xf32>
    %898 = arith.divf %896, %897 : vector<4x32xf32>
    %899 = vector.extract_strided_slice %861 {offsets = [0, 64], sizes = [4, 32], strides = [1, 1]} : vector<4x128xf32> to vector<4x32xf32>
    %900 = math.tanh %899 : vector<4x32xf32>
    %901 = vector.extract_strided_slice %861 {offsets = [0, 96], sizes = [4, 32], strides = [1, 1]} : vector<4x128xf32> to vector<4x32xf32>
    %902 = arith.negf %901 : vector<4x32xf32>
    %903 = math.exp %902 : vector<4x32xf32>
    %cst_171 = arith.constant 1.000000e+00 : f32
    %904 = vector.broadcast %cst_171 : f32 to vector<4x32xf32>
    %905 = arith.addf %904, %903 : vector<4x32xf32>
    %906 = arith.divf %904, %905 : vector<4x32xf32>
    %907 = arith.mulf %898, %851 : vector<4x32xf32>
    %908 = arith.mulf %892, %900 : vector<4x32xf32>
    %909 = arith.addf %907, %908 : vector<4x32xf32>
    %910 = math.tanh %909 : vector<4x32xf32>
    %911 = arith.mulf %906, %910 : vector<4x32xf32>
    %912 = vector.extract_strided_slice %501 {offsets = [28, 0], sizes = [4, 128], strides = [1, 1]} : vector<32x256xf32> to vector<4x128xf32>
    %913 = arith.truncf %886 : vector<4x32xf32> to vector<4x32xbf16>
    %cst_172 = arith.constant dense<0.000000e+00> : vector<4x128xf32>
    %914 = tpu.matmul %913, %496, %cst_172 {dimension_numbers = #tpu.dot_dimension_numbers<[1], [0], [0], [1], [0, 0, 1, 1], [], []>} : vector<4x32xbf16>, vector<32x128xbf16>, vector<4x128xf32> -> vector<4x128xf32>
    %915 = arith.addf %912, %914 : vector<4x128xf32>
    %916 = vector.extract_strided_slice %501 {offsets = [0, 128], sizes = [4, 128], strides = [1, 1]} : vector<32x256xf32> to vector<4x128xf32>
    %917 = arith.truncf %911 : vector<4x32xf32> to vector<4x32xbf16>
    %cst_173 = arith.constant dense<0.000000e+00> : vector<4x128xf32>
    %918 = tpu.matmul %917, %497, %cst_173 {dimension_numbers = #tpu.dot_dimension_numbers<[1], [0], [0], [1], [0, 0, 1, 1], [], []>} : vector<4x32xbf16>, vector<32x128xbf16>, vector<4x128xf32> -> vector<4x128xf32>
    %919 = arith.addf %916, %918 : vector<4x128xf32>
    %920 = vector.extract_strided_slice %915 {offsets = [0, 0], sizes = [4, 32], strides = [1, 1]} : vector<4x128xf32> to vector<4x32xf32>
    %921 = arith.negf %920 : vector<4x32xf32>
    %922 = math.exp %921 : vector<4x32xf32>
    %cst_174 = arith.constant 1.000000e+00 : f32
    %923 = vector.broadcast %cst_174 : f32 to vector<4x32xf32>
    %924 = arith.addf %923, %922 : vector<4x32xf32>
    %925 = arith.divf %923, %924 : vector<4x32xf32>
    %926 = vector.extract_strided_slice %915 {offsets = [0, 32], sizes = [4, 32], strides = [1, 1]} : vector<4x128xf32> to vector<4x32xf32>
    %927 = arith.negf %926 : vector<4x32xf32>
    %928 = math.exp %927 : vector<4x32xf32>
    %cst_175 = arith.constant 1.000000e+00 : f32
    %929 = vector.broadcast %cst_175 : f32 to vector<4x32xf32>
    %930 = arith.addf %929, %928 : vector<4x32xf32>
    %931 = arith.divf %929, %930 : vector<4x32xf32>
    %932 = vector.extract_strided_slice %915 {offsets = [0, 64], sizes = [4, 32], strides = [1, 1]} : vector<4x128xf32> to vector<4x32xf32>
    %933 = math.tanh %932 : vector<4x32xf32>
    %934 = vector.extract_strided_slice %915 {offsets = [0, 96], sizes = [4, 32], strides = [1, 1]} : vector<4x128xf32> to vector<4x32xf32>
    %935 = arith.negf %934 : vector<4x32xf32>
    %936 = math.exp %935 : vector<4x32xf32>
    %cst_176 = arith.constant 1.000000e+00 : f32
    %937 = vector.broadcast %cst_176 : f32 to vector<4x32xf32>
    %938 = arith.addf %937, %936 : vector<4x32xf32>
    %939 = arith.divf %937, %938 : vector<4x32xf32>
    %940 = arith.mulf %931, %884 : vector<4x32xf32>
    %941 = arith.mulf %925, %933 : vector<4x32xf32>
    %942 = arith.addf %940, %941 : vector<4x32xf32>
    %943 = math.tanh %942 : vector<4x32xf32>
    %944 = arith.mulf %939, %943 : vector<4x32xf32>
    %945 = vector.extract_strided_slice %919 {offsets = [0, 0], sizes = [4, 32], strides = [1, 1]} : vector<4x128xf32> to vector<4x32xf32>
    %946 = arith.negf %945 : vector<4x32xf32>
    %947 = math.exp %946 : vector<4x32xf32>
    %cst_177 = arith.constant 1.000000e+00 : f32
    %948 = vector.broadcast %cst_177 : f32 to vector<4x32xf32>
    %949 = arith.addf %948, %947 : vector<4x32xf32>
    %950 = arith.divf %948, %949 : vector<4x32xf32>
    %951 = vector.extract_strided_slice %919 {offsets = [0, 32], sizes = [4, 32], strides = [1, 1]} : vector<4x128xf32> to vector<4x32xf32>
    %952 = arith.negf %951 : vector<4x32xf32>
    %953 = math.exp %952 : vector<4x32xf32>
    %cst_178 = arith.constant 1.000000e+00 : f32
    %954 = vector.broadcast %cst_178 : f32 to vector<4x32xf32>
    %955 = arith.addf %954, %953 : vector<4x32xf32>
    %956 = arith.divf %954, %955 : vector<4x32xf32>
    %957 = vector.extract_strided_slice %919 {offsets = [0, 64], sizes = [4, 32], strides = [1, 1]} : vector<4x128xf32> to vector<4x32xf32>
    %958 = math.tanh %957 : vector<4x32xf32>
    %959 = vector.extract_strided_slice %919 {offsets = [0, 96], sizes = [4, 32], strides = [1, 1]} : vector<4x128xf32> to vector<4x32xf32>
    %960 = arith.negf %959 : vector<4x32xf32>
    %961 = math.exp %960 : vector<4x32xf32>
    %cst_179 = arith.constant 1.000000e+00 : f32
    %962 = vector.broadcast %cst_179 : f32 to vector<4x32xf32>
    %963 = arith.addf %962, %961 : vector<4x32xf32>
    %964 = arith.divf %962, %963 : vector<4x32xf32>
    %965 = arith.mulf %956, %909 : vector<4x32xf32>
    %966 = arith.mulf %950, %958 : vector<4x32xf32>
    %967 = arith.addf %965, %966 : vector<4x32xf32>
    %968 = math.tanh %967 : vector<4x32xf32>
    %969 = arith.mulf %964, %968 : vector<4x32xf32>
    %970 = vector.extract_strided_slice %944 {offsets = [0, 0], sizes = [2, 32], strides = [1, 1]} : vector<4x32xf32> to vector<2x32xf32>
    %971 = vector.extract_strided_slice %944 {offsets = [2, 0], sizes = [2, 32], strides = [1, 1]} : vector<4x32xf32> to vector<2x32xf32>
    %972 = arith.mulf %970, %971 : vector<2x32xf32>
    %973 = vector.extract_strided_slice %969 {offsets = [0, 0], sizes = [2, 32], strides = [1, 1]} : vector<4x32xf32> to vector<2x32xf32>
    %974 = vector.extract_strided_slice %969 {offsets = [2, 0], sizes = [2, 32], strides = [1, 1]} : vector<4x32xf32> to vector<2x32xf32>
    %975 = arith.mulf %973, %974 : vector<2x32xf32>
    %976 = arith.addf %972, %975 : vector<2x32xf32>
    %cst_180 = arith.constant dense<0.000000e+00> : vector<2xf32>
    %977 = vector.multi_reduction <add>, %976, %cst_180 [1] : vector<2x32xf32> to vector<2xf32>
    %978 = vector.shape_cast %977 : vector<2xf32> to vector<2x1xf32>
    %979 = arith.negf %978 : vector<2x1xf32>
    %980 = math.exp %979 : vector<2x1xf32>
    %cst_181 = arith.constant 1.000000e+00 : f32
    %981 = vector.broadcast %cst_181 : f32 to vector<2x1xf32>
    %982 = arith.addf %981, %980 : vector<2x1xf32>
    %983 = arith.divf %981, %982 : vector<2x1xf32>
    %c0_182 = arith.constant 0 : index
    %c0_183 = arith.constant 0 : index
    %984 = vector.load %arg10[%c0_182, %c0_183] : memref<2x1xf32, #tpu.memory_space<vmem>>, vector<2x1xf32>
    tpu.vector_store %arg10[%c0_182, %c0_183], %983 {strides = array<i32>} : memref<2x1xf32, #tpu.memory_space<vmem>>, vector<2x1xf32>,
    return
  }
  func.func @transform_0(%arg0: i32) -> (i32, i32) {
    %c0_i32 = arith.constant 0 : i32
    %c0_i32_0 = arith.constant 0 : i32
    %c0_i32_1 = arith.constant 0 : i32
    return %c0_i32, %c0_i32_0 : i32, i32
  }
  func.func @transform_1(%arg0: i32) -> (i32, i32) {
    %c0_i32 = arith.constant 0 : i32
    %c0_i32_0 = arith.constant 0 : i32
    %c0_i32_1 = arith.constant 0 : i32
    return %c0_i32, %c0_i32_0 : i32, i32
  }
  func.func @transform_2(%arg0: i32) -> (i32, i32) {
    %c0_i32 = arith.constant 0 : i32
    %c0_i32_0 = arith.constant 0 : i32
    %c0_i32_1 = arith.constant 0 : i32
    return %c0_i32, %c0_i32_0 : i32, i32
  }
  func.func @transform_3(%arg0: i32) -> (i32, i32) {
    %c0_i32 = arith.constant 0 : i32
    %c0_i32_0 = arith.constant 0 : i32
    %c0_i32_1 = arith.constant 0 : i32
    return %c0_i32, %c0_i32_0 : i32, i32
  }
  func.func @transform_4(%arg0: i32) -> (i32, i32) {
    %c0_i32 = arith.constant 0 : i32
    %c0_i32_0 = arith.constant 0 : i32
    %c0_i32_1 = arith.constant 0 : i32
    return %c0_i32, %c0_i32_0 : i32, i32
  }
  func.func @transform_5(%arg0: i32) -> (i32, i32) {
    %c0_i32 = arith.constant 0 : i32
    %c0_i32_0 = arith.constant 0 : i32
    %c0_i32_1 = arith.constant 0 : i32
    return %c0_i32, %c0_i32_0 : i32, i32
  }
  func.func @transform_6(%arg0: i32) -> (i32, i32) {
    %c0_i32 = arith.constant 0 : i32
    %c0_i32_0 = arith.constant 0 : i32
    %c0_i32_1 = arith.constant 0 : i32
    return %c0_i32, %c0_i32_0 : i32, i32
  }
  func.func @transform_7(%arg0: i32) -> (i32, i32) {
    %c0_i32 = arith.constant 0 : i32
    %c0_i32_0 = arith.constant 0 : i32
    %c0_i32_1 = arith.constant 0 : i32
    return %c0_i32, %c0_i32_0 : i32, i32
  }
  func.func @transform_8(%arg0: i32) -> (i32, i32) {
    %c0_i32 = arith.constant 0 : i32
    %c0_i32_0 = arith.constant 0 : i32
    %c0_i32_1 = arith.constant 0 : i32
    return %c0_i32, %c0_i32_0 : i32, i32
  }
  func.func @transform_9(%arg0: i32) -> (i32, i32) {
    %c0_i32 = arith.constant 0 : i32
    %c0_i32_0 = arith.constant 0 : i32
    %c0_i32_1 = arith.constant 0 : i32
    return %c0_i32, %c0_i32_0 : i32, i32
  }
}

</mosaic_0001>

<bundles_post_ra>
// kernel: drrn_forward.1
= control target key start
LH: loop header
LB: loop body
LE: loop exit
PB: predicated region body
PF: predicated region fallthrough
CT: control target
= control target key end

     0   :  { %v3598_v1 = vmov 0.0   ;;  %v3599_v2 = vmov 0   ;;  %vm3600_vm0 = vmmov 0   ;;  %vm83_vm1 = vcmask 261120   ;;  %s3602_s10 = smov 32   ;;  %s4401_s1 = inlined_call_operand.vmem [shape: bf16[32,256], index: 1, kind: input, shape index: {}]   ;;  %s4402_s2 = inlined_call_operand.vmem [shape: bf16[32,128], index: 2, kind: input, shape index: {}]   ;;  %s4403_s0 = inlined_call_operand.vmem [shape: f32[32,32], index: 0, kind: input, shape index: {}]   ;;  %s4404_s3 = inlined_call_operand.vmem [shape: bf16[32,128], index: 3, kind: input, shape index: {}]   ;;  %s4405_s4 = inlined_call_operand.vmem [shape: f32[1,256], index: 4, kind: input, shape index: {}]   ;;  %s4406_s5 = inlined_call_operand.vmem [shape: bf16[64,256], index: 5, kind: input, shape index: {}]   ;;  %s4407_s6 = inlined_call_operand.vmem [shape: bf16[32,128], index: 6, kind: input, shape index: {}]   ;;  %s4408_s7 = inlined_call_operand.vmem [shape: bf16[32,128], index: 7, kind: input, shape index: {}]   ;;  %s4409_s8 = inlined_call_operand.vmem [shape: f32[1,256], index: 8, kind: input, shape index: {}]   ;;  %s4410_s9 = inlined_call_operand.vmem [shape: f32[2,1], index: 9, kind: output, shape index: {}]  }
   0x1   :  { %v3308_v0 = vld [vmem:[%s4401_s1 + $0x14] ss:$8 sps:$4 sm:$0xff]   ;;  %3047 = vmatprep.subr.bf16.mxu1 %v3598_v1  ;;  %122 = vmatprep.mubr.bf16.mxu0 %v3599_v2  ;;  %v3310_v3 = vld [vmem:[%s4401_s1 + $0x10] ss:$8 sps:$4 sm:$0xff]   ;;  %v3666_v4 = vld [vmem:[%s4402_s2 + $0x8] sm:$0xff]   ;;  %v53_v16 = vlaneseq  ;;  %vm307_vm2 = vcmask 257024  }
   0x2   :  { %3051 = vmatprep.mubr.msk.bf16.mxu1 %vm3600_vm0, %v3598_v1  ;;  %102 = vmatprep.subr.bf16.mxu0 %v3308_v0  ;;  %v3312_v5 = vld [vmem:[%s4401_s1 + $0x4] ss:$8 sps:$4 sm:$0xff]   ;;  %v3314_v6 = vld [vmem:[%s4401_s1] ss:$8 sps:$4 sm:$0xff]   ;;  %v35_v12 = vld [vmem:[%s4403_s0 + $0x10] sm:$0xff]  ;;  %vm473_vm3 = vcmask 261124  }
   0x3   :  { %103 = vmatpush1.bf16.msra.mxu0 %v3310_v3  ;;  %3048 = vmatpush3.bf16.msra.mxu1 %v3666_v4  ;;  %v3678_v7 = vld [vmem:[%s4402_s2] sm:$0xff]   ;;  %v34_v9 = vld [vmem:[%s4403_s0 + $0x8] sm:$0xff]  ;;  %v36_v13 = vld [vmem:[%s4403_s0 + $0x18] sm:$0xff]  ;;  %v3729_v17 = vshrl.u32 %v53_v16, 7  ;;  %vm313_vm4 = vcmask 523524   ;;  %vm479_vm5 = vcmask 519424  }
   0x4   :  { %v33_v8 = vld [vmem:[%s4403_s0] sm:$0xff]  ;;  %104 = vmatprep.subr.bf16.mxu0 %v3312_v5  ;;  %3049 = vmatprep.subr.bf16.mxu1 %v3598_v1  ;;  %v3691_v11 = vld [vmem:[%s4404_s3 + $0x8] sm:$0xff]   ;;  %v38_v15 = vpack.c.bf16 %v36_v13, %v35_v12  ;;  %vm1539_vm6 = vcmask 523264   ;;  %vm2850_vm7 = vcmask 259076   ;;  %vm2860_vm8 = vcmask 5124  }
   0x5   :  { %v37_v10 = vpack.c.bf16 %v34_v9, %v33_v8  ;;  %v3708_v14 = vld [vmem:[%s4404_s3] sm:$0xff]   ;;  %v59_v18 = vsub.s32 1, %v3729_v17  ;;  %v55_v20 = vsub.s32 0, %v3729_v17 }
   0x6   :  { %v51_v19 = vld [vmem:[%s4405_s4] sm:$0x3]  ;;  %s3601_s4 = smov 64  }
   0x7   :  { %105 = vmatpush1.bf16.msra.mxu0 %v3314_v6  ;;  %3050 = vmatpush3.bf16.msra.mxu1 %v3678_v7  ;;  %v60_v21 = vrot.slane %v51_v19, %v59_v18  ;;  %v56_v25 = vrot.slane %v51_v19, %v55_v20 }
   0x8   :  { %3063 = vmatprep.subr.bf16.mxu0 %v3598_v1  ;;  %3055 = vmatprep.subr.bf16.mxu1 %v3598_v1 }
   0xa   :  { %2870 = vmatmul.mubr.msk.bf16.vlgmr.msra.gmra.mxu0 %vm83_vm1, %v37_v10  ;;  %3052 = vmatmul.mubr.bf16.vlgmr.msra.gmra.mxu1 %v3599_v2 }
   0xb   :  { %132 = vmatprep.mubr.bf16.mxu0 %v3599_v2  ;;  %3056 = vmatpush3.bf16.msra.mxu1 %v3691_v11 }
   0xc   :  { %3059 = vmatprep.mubr.msk.bf16.mxu1 %vm3600_vm0, %v3598_v1  ;;  %3057 = vmatprep.subr.bf16.mxu1 %v3598_v1 }
   0xd   :  { %3064 = vmatpush3.bf16.msra.mxu0 %v3666_v4 }
   0xe   :  { %3065 = vmatprep.subr.bf16.mxu0 %v3598_v1 }
   0xf   :  { %3058 = vmatpush3.bf16.msra.mxu1 %v3708_v14 }
  0x10   :  { %3071 = vmatprep.subr.bf16.mxu1 %v3598_v1 }
  0x11   :  { %3066 = vmatpush3.bf16.msra.mxu0 %v3678_v7 }
  0x12   :  { %2871 = vmatmul.mubr.msk.bf16.gmra.mxu0 %vm83_vm1, %v38_v15  ;;  %3079 = vmatprep.subr.bf16.mxu0 %v3598_v1 }
  0x13   :  { %3060 = vmatmul.mubr.bf16.vlgmr.msra.gmra.mxu1 %v3599_v2  ;;  %3067 = vmatprep.mubr.msk.bf16.mxu0 %vm3600_vm0, %v3598_v1 }
  0x14   :  { %3072 = vmatpush3.bf16.msra.mxu1 %v3691_v11  ;;  %3075 = vmatprep.mubr.msk.bf16.mxu1 %vm3600_vm0, %v3598_v1 }
  0x15   :  { %3073 = vmatprep.subr.bf16.mxu1 %v3598_v1 }
  0x18   :  { %3074 = vmatpush3.bf16.msra.mxu1 %v3708_v14 }
  0x19   :  { %3087 = vmatprep.subr.bf16.mxu1 %v3598_v1 }
  0xca   :  { %v124_v22 = vpop.f32.mrf.mxu0  ;;  %v192_v23 = vpop.f32.mrf.mxu1 }
  0xcb   :  { %v3752_v45 = vadd.f32 %v124_v22, %v56_v25 }
  0xcc   :  { %v126_v24 = vpop.f32.mrf.mxu0  ;;  %v3053_v27 = vpop.f32.mrf.mxu1 }
  0xcd   :  { %v3740_v26 = vadd.f32 %v126_v24, %v60_v21  ;;  %v198_v49 = vadd.f32 %v192_v23, %v3752_v45 }
  0xce   :  { %v128_v28 = vpop.f32.mrf.mxu0  ;;  %v195_v30 = vpop.f32.mrf.mxu1 }
  0xcf   :  { %v3742_v29 = vadd.f32 %v128_v28, %v56_v25  ;;  %v2876_v53 = vmul.f32 -1.442695, %v198_v49 }
  0xd0   :  { %v130_v31 = vpop.f32.mrf.mxu0  ;;  %v3054_v33 = vpop.f32.mrf.mxu1 }
  0xd1   :  { %v3744_v32 = vadd.f32 %v130_v31, %v60_v21 }
  0xd2   :  { %v134_v34 = vpop.f32.mrf.mxu0 }
  0xd3   :  { %v3746_v35 = vadd.f32 %v134_v34, %v56_v25  ;;  %v245_v36 = vpop.f32.mrf.mxu1 }
  0xd4   :  { %v136_v37 = vpop.f32.mrf.mxu0  ;;  %v252_v41 = vrot.slane %v245_v36, 4 }
  0xd5   :  { %v3748_v38 = vadd.f32 %v136_v37, %v60_v21  ;;  %v3061_v39 = vpop.f32.mrf.mxu1 }
  0xd6   :  { %v138_v40 = vpop.f32.mrf.mxu0 }
  0xd7   :  { %v3750_v42 = vadd.f32 %v138_v40, %v56_v25  ;;  %v248_v43 = vpop.f32.mrf.mxu1 }
  0xd8   :  { %v140_v44 = vpop.f32.mrf.mxu0 }
  0xd9   :  { %v3754_v46 = vadd.f32 %v140_v44, %v60_v21  ;;  %v3062_v47 = vpop.f32.mrf.mxu1 }
  0xdb   :  { %v254_v48 = vadd.f32 %v252_v41, %v3754_v46 }
  0xdd   :  { %3334 = vtanh.f32 %v254_v48  ;;  %v2877_v52 = vmul.f32 -1.442695, %v254_v48 }
  0xde   :  { %3336 = vtanh.f32 %v198_v49 }
  0xdf   :  { %3338 = vpow2.f32 %v2877_v52 }
  0xe0   :  { %3340 = vpow2.f32 %v2876_v53 }
  0xea   :  { %v3335_v50 = vpop.eup %3334 }
  0xeb   :  { %288 = vrot.lane.b32.xlu0 %v3335_v50, %s3601_s4  ;;  %v3337_v51 = vpop.eup %3336 }
  0xec   :  { %v3339_v54 = vpop.eup %3338 }
  0xed   :  { %v282_v55 = vadd.f32 1.0, %v3339_v54  ;;  %v3341_v56 = vpop.eup %3340 }
  0xee   :  { %v258_v57 = vadd.f32 1.0, %v3341_v56 }
  0xef   :  { %264 = vrot.lane.b32.xlu0 %v3337_v51, %s3601_s4  ;;  %3342 = vrcp.f32 %v282_v55 }
  0xf0   :  { %3344 = vrcp.f32 %v258_v57 }
  0xfc   :  { %v3343_v58 = vpop.eup %3342 }
  0xfd   :  { %v3345_v61 = vpop.eup %3344  ;;  %v286_v0 = vmul.f32 0.0, %v3343_v58 }
  0xfe   :  { %v262_v6 = vmul.f32 0.0, %v3345_v61 }
 0x15d   :  { %v289_v59 = vpop.permute.xlu0 %288 }
 0x15e   :  { %v291_v60 = vmul.f32 %v3343_v58, %v289_v59 }
 0x160   :  { %293 = vrot.lane.b32.xlu1 %v291_v60, %s3602_s10 }
 0x161   :  { %v265_v62 = vpop.permute.xlu0 %264 }
 0x162   :  { %v267_v63 = vmul.f32 %v3345_v61, %v265_v62 }
 0x164   :  { %269 = vrot.lane.b32.xlu1 %v267_v63, %s3602_s10 }
 0x1d2   :  { %v294_v3 = vpop.permute.xlu1 %293 }
 0x1d3   :  { %v3762_v5 = vadd.f32 %v294_v3, %v286_v0 }
 0x1d5   :  { %3346 = vtanh.f32 %v3762_v5  ;;  %v450_v57 = vrot.slane %v3762_v5, 4 }
 0x1d6   :  { %v270_v8 = vpop.permute.xlu1 %269 }
 0x1d7   :  { %v3765_v9 = vadd.f32 %v270_v8, %v262_v6 }
 0x1d9   :  { %3348 = vtanh.f32 %v3765_v9  ;;  %v423_v60 = vrot.slane %v3765_v9, 4 }
 0x1e2   :  { %v3347_v10 = vpop.eup %3346 }
 0x1e3   :  { %299 = vrot.lane.b32.xlu0 %v3347_v10, %s3601_s4 }
 0x1e6   :  { %v3349_v12 = vpop.eup %3348 }
 0x1e7   :  { %275 = vrot.lane.b32.xlu1 %v3349_v12, %s3601_s4 }
 0x255   :  { %v300_v13 = vpop.permute.xlu0 %299 }
 0x256   :  { %v3770_v15 = vmul.f32 %v3343_v58, %v300_v13 }
 0x258   :  { %v366_v16 = vpack.c.bf16 %v3770_v15, %v3770_v15 }
 0x259   :  { %v276_v19 = vpop.permute.xlu1 %275 }
 0x25a   :  { %v3774_v21 = vmul.f32 %v3345_v61, %v276_v19  ;;  %v368_v22 = vrot.slane %v366_v16, 2 }
 0x25c   :  { %v315_v23 = vpack.c.bf16 %v3774_v21, %v3774_v21  ;;  %369 = vrot.lane.b32.xlu0 %v368_v22, %s3602_s10 }
 0x25e   :  { %317 = vrot.lane.b32.xlu1 %v315_v23, %s3602_s10 }
 0x2ce   :  { %v370_v24 = vpop.permute.xlu0 %369 }
 0x2cf   :  { %3076 = vmatmul.mubr.msk.bf16.vlgmr.msra.gmra.mxu1 %vm83_vm1, %v370_v24 }
 0x2d0   :  { %v318_v25 = vpop.permute.xlu1 %317  ;;  %3088 = vmatpush3.bf16.msra.mxu1 %v3691_v11  ;;  %3091 = vmatprep.mubr.msk.bf16.mxu1 %vm3600_vm0, %v3598_v1 }
 0x2d1   :  { %3068 = vmatmul.mubr.msk.bf16.vlgmr.msra.gmra.mxu0 %vm83_vm1, %v318_v25  ;;  %3089 = vmatprep.subr.bf16.mxu1 %v3598_v1 }
 0x2d2   :  { %3080 = vmatpush3.bf16.msra.mxu0 %v3666_v4  ;;  %3083 = vmatprep.mubr.msk.bf16.mxu0 %vm3600_vm0, %v3598_v1 }
 0x2d3   :  { %3081 = vmatprep.subr.bf16.mxu0 %v3598_v1 }
 0x2d4   :  { %3090 = vmatpush3.bf16.msra.mxu1 %v3708_v14 }
 0x2d5   :  { %3103 = vmatprep.subr.bf16.mxu1 %v3598_v1 }
 0x2d6   :  { %3082 = vmatpush3.bf16.msra.mxu0 %v3678_v7 }
 0x2d7   :  { %3095 = vmatprep.subr.bf16.mxu0 %v3598_v1 }
 0x38f   :  { %v408_v27 = vpop.f32.mrf.mxu1 }
 0x390   :  { %v414_v28 = vadd.f32 %v408_v27, %v3754_v46 }
 0x391   :  { %v356_v30 = vpop.f32.mrf.mxu0  ;;  %v3077_v31 = vpop.f32.mrf.mxu1 }
 0x392   :  { %3350 = vtanh.f32 %v414_v28  ;;  %v363_v33 = vrot.slane %v356_v30, 4  ;;  %v2881_v47 = vmul.f32 -1.442695, %v414_v28 }
 0x393   :  { %v3069_v34 = vpop.f32.mrf.mxu0  ;;  %v411_v36 = vpop.f32.mrf.mxu1 }
 0x394   :  { %v365_v37 = vadd.f32 %v363_v33, %v3752_v45 }
 0x395   :  { %v359_v39 = vpop.f32.mrf.mxu0  ;;  %v3078_v40 = vpop.f32.mrf.mxu1 }
 0x396   :  { %3352 = vtanh.f32 %v365_v37  ;;  %v2880_v46 = vmul.f32 -1.442695, %v365_v37 }
 0x397   :  { %v3070_v41 = vpop.f32.mrf.mxu0  ;;  %3354 = vpow2.f32 %v2881_v47 }
 0x398   :  { %3356 = vpow2.f32 %v2880_v46 }
 0x39f   :  { %v3351_v43 = vpop.eup %3350 }
 0x3a0   :  { %454 = vrot.lane.b32.xlu0 %v3351_v43, %s3601_s4 }
 0x3a3   :  { %v3353_v44 = vpop.eup %3352 }
 0x3a4   :  { %427 = vrot.lane.b32.xlu1 %v3353_v44, %s3601_s4  ;;  %v3355_v48 = vpop.eup %3354 }
 0x3a5   :  { %v445_v49 = vadd.f32 1.0, %v3355_v48  ;;  %v3357_v50 = vpop.eup %3356 }
 0x3a6   :  { %v418_v51 = vadd.f32 1.0, %v3357_v50 }
 0x3a7   :  { %3358 = vrcp.f32 %v445_v49 }
 0x3a8   :  { %3360 = vrcp.f32 %v418_v51 }
 0x3b4   :  { %v3359_v45 = vpop.eup %3358 }
 0x3b5   :  { %v3361_v54 = vpop.eup %3360  ;;  %v452_v58 = vmul.f32 %v3359_v45, %v450_v57 }
 0x3b6   :  { %v425_v62 = vmul.f32 %v3361_v54, %v423_v60 }
 0x412   :  { %v455_v52 = vpop.permute.xlu0 %454 }
 0x413   :  { %v457_v53 = vmul.f32 %v3359_v45, %v455_v52 }
 0x415   :  { %459 = vrot.lane.b32.xlu0 %v457_v53, %s3602_s10 }
 0x416   :  { %v428_v55 = vpop.permute.xlu1 %427 }
 0x417   :  { %v430_v56 = vmul.f32 %v3361_v54, %v428_v55 }
 0x419   :  { %432 = vrot.lane.b32.xlu1 %v430_v56, %s3602_s10 }
 0x487   :  { %v460_v59 = vpop.permute.xlu0 %459 }
 0x488   :  { %v3802_v61 = vadd.f32 %v460_v59, %v452_v58 }
 0x48a   :  { %3362 = vtanh.f32 %v3802_v61 }
 0x48b   :  { %v433_v63 = vpop.permute.xlu1 %432 }
 0x48c   :  { %v3805_v0 = vadd.f32 %v433_v63, %v425_v62 }
 0x48e   :  { %3364 = vtanh.f32 %v3805_v0  ;;  %v589_v57 = vrot.slane %v3805_v0, 4 }
 0x497   :  { %v3363_v3 = vpop.eup %3362 }
 0x498   :  { %465 = vrot.lane.b32.xlu0 %v3363_v3, %s3601_s4 }
 0x49b   :  { %v3365_v6 = vpop.eup %3364 }
 0x49c   :  { %438 = vrot.lane.b32.xlu1 %v3365_v6, %s3601_s4 }
 0x50a   :  { %v466_v5 = vpop.permute.xlu0 %465 }
 0x50b   :  { %v3810_v8 = vmul.f32 %v3359_v45, %v466_v5 }
 0x50d   :  { %v530_v9 = vpack.c.bf16 %v3810_v8, %v3810_v8 }
 0x50e   :  { %v439_v10 = vpop.permute.xlu1 %438 }
 0x50f   :  { %v3814_v12 = vmul.f32 %v3361_v54, %v439_v10  ;;  %532 = vrot.lane.b32.xlu0 %v530_v9, %s3602_s10  ;;  %v616_v54 = vrot.slane %v3802_v61, 4 }
 0x511   :  { %v481_v13 = vpack.c.bf16 %v3814_v12, %v3814_v12 }
 0x513   :  { %v483_v16 = vrot.slane %v481_v13, 2 }
 0x515   :  { %484 = vrot.lane.b32.xlu1 %v483_v16, %s3602_s10 }
 0x581   :  { %v533_v19 = vpop.permute.xlu0 %532 }
 0x582   :  { %3092 = vmatmul.mubr.msk.bf16.vlgmr.msra.gmra.mxu1 %vm83_vm1, %v533_v19 }
 0x583   :  { %3104 = vmatpush3.bf16.msra.mxu1 %v3691_v11  ;;  %3107 = vmatprep.mubr.msk.bf16.mxu1 %vm3600_vm0, %v3598_v1 }
 0x584   :  { %3105 = vmatprep.subr.bf16.mxu1 %v3598_v1 }
 0x587   :  { %v485_v22 = vpop.permute.xlu1 %484  ;;  %3106 = vmatpush3.bf16.msra.mxu1 %v3708_v14 }
 0x588   :  { %3084 = vmatmul.mubr.msk.bf16.vlgmr.msra.gmra.mxu0 %vm83_vm1, %v485_v22  ;;  %3119 = vmatprep.subr.bf16.mxu1 %v3598_v1 }
 0x589   :  { %3096 = vmatpush3.bf16.msra.mxu0 %v3666_v4  ;;  %3099 = vmatprep.mubr.msk.bf16.mxu0 %vm3600_vm0, %v3598_v1 }
 0x58a   :  { %3097 = vmatprep.subr.bf16.mxu0 %v3598_v1 }
 0x58d   :  { %3098 = vmatpush3.bf16.msra.mxu0 %v3678_v7 }
 0x58e   :  { %3111 = vmatprep.subr.bf16.mxu0 %v3598_v1 }
 0x642   :  { %v571_v23 = vpop.f32.mrf.mxu1 }
 0x643   :  { %v578_v24 = vrot.slane %v571_v23, 4 }
 0x644   :  { %v3093_v25 = vpop.f32.mrf.mxu1 }
 0x645   :  { %v580_v27 = vadd.f32 %v578_v24, %v3748_v38 }
 0x646   :  { %v574_v28 = vpop.f32.mrf.mxu1 }
 0x647   :  { %3366 = vtanh.f32 %v580_v27  ;;  %v2885_v41 = vmul.f32 -1.442695, %v580_v27 }
 0x648   :  { %v523_v30 = vpop.f32.mrf.mxu0  ;;  %v3094_v31 = vpop.f32.mrf.mxu1 }
 0x649   :  { %v529_v33 = vadd.f32 %v523_v30, %v3742_v29 }
 0x64a   :  { %v3085_v34 = vpop.f32.mrf.mxu0 }
 0x64b   :  { %3368 = vtanh.f32 %v529_v33  ;;  %v2884_v43 = vmul.f32 -1.442695, %v529_v33 }
 0x64c   :  { %v526_v36 = vpop.f32.mrf.mxu0  ;;  %3370 = vpow2.f32 %v2885_v41 }
 0x64d   :  { %3372 = vpow2.f32 %v2884_v43 }
 0x64e   :  { %v3086_v37 = vpop.f32.mrf.mxu0 }
 0x654   :  { %v3367_v39 = vpop.eup %3366 }
 0x655   :  { %620 = vrot.lane.b32.xlu0 %v3367_v39, %s3601_s4 }
 0x658   :  { %v3369_v40 = vpop.eup %3368 }
 0x659   :  { %593 = vrot.lane.b32.xlu1 %v3369_v40, %s3601_s4  ;;  %v3371_v44 = vpop.eup %3370 }
 0x65a   :  { %v611_v47 = vadd.f32 1.0, %v3371_v44  ;;  %v3373_v46 = vpop.eup %3372 }
 0x65b   :  { %v584_v48 = vadd.f32 1.0, %v3373_v46 }
 0x65c   :  { %3374 = vrcp.f32 %v611_v47 }
 0x65d   :  { %3376 = vrcp.f32 %v584_v48 }
 0x669   :  { %v3375_v49 = vpop.eup %3374 }
 0x66a   :  { %v3377_v45 = vpop.eup %3376  ;;  %v618_v55 = vmul.f32 %v3375_v49, %v616_v54 }
 0x66b   :  { %v591_v59 = vmul.f32 %v3377_v45, %v589_v57 }
 0x6c7   :  { %v621_v50 = vpop.permute.xlu0 %620 }
 0x6c8   :  { %v623_v51 = vmul.f32 %v3375_v49, %v621_v50 }
 0x6ca   :  { %625 = vrot.lane.b32.xlu0 %v623_v51, %s3602_s10 }
 0x6cb   :  { %v594_v52 = vpop.permute.xlu1 %593 }
 0x6cc   :  { %v596_v53 = vmul.f32 %v3377_v45, %v594_v52 }
 0x6ce   :  { %598 = vrot.lane.b32.xlu1 %v596_v53, %s3602_s10 }
 0x73c   :  { %v626_v56 = vpop.permute.xlu0 %625 }
 0x73d   :  { %v3842_v58 = vadd.f32 %v626_v56, %v618_v55 }
 0x73f   :  { %3378 = vtanh.f32 %v3842_v58 }
 0x740   :  { %v599_v60 = vpop.permute.xlu1 %598 }
 0x741   :  { %v3845_v62 = vadd.f32 %v599_v60, %v591_v59 }
 0x743   :  { %3380 = vtanh.f32 %v3845_v62  ;;  %v753_v54 = vrot.slane %v3845_v62, 4 }
 0x74c   :  { %v3379_v63 = vpop.eup %3378 }
 0x74d   :  { %631 = vrot.lane.b32.xlu0 %v3379_v63, %s3601_s4 }
 0x750   :  { %v3381_v3 = vpop.eup %3380 }
 0x751   :  { %604 = vrot.lane.b32.xlu1 %v3381_v3, %s3601_s4 }
 0x7bf   :  { %v632_v61 = vpop.permute.xlu0 %631 }
 0x7c0   :  { %v3850_v6 = vmul.f32 %v3375_v49, %v632_v61 }
 0x7c2   :  { %v696_v0 = vpack.c.bf16 %v3850_v6, %v3850_v6 }
 0x7c3   :  { %v605_v5 = vpop.permute.xlu1 %604 }
 0x7c4   :  { %v3854_v9 = vmul.f32 %v3377_v45, %v605_v5  ;;  %v698_v10 = vrot.slane %v696_v0, 2  ;;  %v780_v45 = vrot.slane %v3842_v58, 4 }
 0x7c6   :  { %v645_v13 = vpack.c.bf16 %v3854_v9, %v3854_v9  ;;  %699 = vrot.lane.b32.xlu0 %v698_v10, %s3602_s10 }
 0x7c8   :  { %647 = vrot.lane.b32.xlu1 %v645_v13, %s3602_s10 }
 0x838   :  { %v700_v16 = vpop.permute.xlu0 %699 }
 0x839   :  { %3108 = vmatmul.mubr.msk.bf16.vlgmr.msra.gmra.mxu1 %vm83_vm1, %v700_v16 }
 0x83a   :  { %v648_v19 = vpop.permute.xlu1 %647  ;;  %3120 = vmatpush3.bf16.msra.mxu1 %v3691_v11  ;;  %3123 = vmatprep.mubr.msk.bf16.mxu1 %vm3600_vm0, %v3598_v1 }
 0x83b   :  { %3100 = vmatmul.mubr.msk.bf16.vlgmr.msra.gmra.mxu0 %vm83_vm1, %v648_v19  ;;  %3121 = vmatprep.subr.bf16.mxu1 %v3598_v1 }
 0x83c   :  { %3112 = vmatpush3.bf16.msra.mxu0 %v3666_v4  ;;  %3115 = vmatprep.mubr.msk.bf16.mxu0 %vm3600_vm0, %v3598_v1 }
 0x83d   :  { %3113 = vmatprep.subr.bf16.mxu0 %v3598_v1 }
 0x83e   :  { %3122 = vmatpush3.bf16.msra.mxu1 %v3708_v14 }
 0x83f   :  { %3135 = vmatprep.subr.bf16.mxu1 %v3598_v1 }
 0x840   :  { %3114 = vmatpush3.bf16.msra.mxu0 %v3678_v7 }
 0x841   :  { %3127 = vmatprep.subr.bf16.mxu0 %v3598_v1 }
 0x8f9   :  { %v738_v22 = vpop.f32.mrf.mxu1 }
 0x8fa   :  { %v744_v23 = vadd.f32 %v738_v22, %v3748_v38 }
 0x8fb   :  { %v686_v24 = vpop.f32.mrf.mxu0  ;;  %v3109_v25 = vpop.f32.mrf.mxu1 }
 0x8fc   :  { %3382 = vtanh.f32 %v744_v23  ;;  %v693_v27 = vrot.slane %v686_v24, 4  ;;  %v2889_v40 = vmul.f32 -1.442695, %v744_v23 }
 0x8fd   :  { %v3101_v28 = vpop.f32.mrf.mxu0  ;;  %v741_v30 = vpop.f32.mrf.mxu1 }
 0x8fe   :  { %v695_v31 = vadd.f32 %v693_v27, %v3742_v29 }
 0x8ff   :  { %v689_v33 = vpop.f32.mrf.mxu0  ;;  %v3110_v34 = vpop.f32.mrf.mxu1 }
 0x900   :  { %3384 = vtanh.f32 %v695_v31  ;;  %v2888_v38 = vmul.f32 -1.442695, %v695_v31 }
 0x901   :  { %v3102_v36 = vpop.f32.mrf.mxu0  ;;  %3386 = vpow2.f32 %v2889_v40 }
 0x902   :  { %3388 = vpow2.f32 %v2888_v38 }
 0x909   :  { %v3383_v37 = vpop.eup %3382 }
 0x90a   :  { %784 = vrot.lane.b32.xlu0 %v3383_v37, %s3601_s4 }
 0x90d   :  { %v3385_v39 = vpop.eup %3384 }
 0x90e   :  { %757 = vrot.lane.b32.xlu1 %v3385_v39, %s3601_s4  ;;  %v3387_v41 = vpop.eup %3386 }
 0x90f   :  { %v775_v43 = vadd.f32 1.0, %v3387_v41  ;;  %v3389_v44 = vpop.eup %3388 }
 0x910   :  { %v748_v47 = vadd.f32 1.0, %v3389_v44 }
 0x911   :  { %3390 = vrcp.f32 %v775_v43 }
 0x912   :  { %3392 = vrcp.f32 %v748_v47 }
 0x91e   :  { %v3391_v29 = vpop.eup %3390 }
 0x91f   :  { %v3393_v49 = vpop.eup %3392  ;;  %v782_v52 = vmul.f32 %v3391_v29, %v780_v45 }
 0x920   :  { %v755_v56 = vmul.f32 %v3393_v49, %v753_v54 }
 0x97c   :  { %v785_v46 = vpop.permute.xlu0 %784 }
 0x97d   :  { %v787_v48 = vmul.f32 %v3391_v29, %v785_v46 }
 0x97f   :  { %789 = vrot.lane.b32.xlu0 %v787_v48, %s3602_s10 }
 0x980   :  { %v758_v50 = vpop.permute.xlu1 %757 }
 0x981   :  { %v760_v51 = vmul.f32 %v3393_v49, %v758_v50 }
 0x983   :  { %762 = vrot.lane.b32.xlu1 %v760_v51, %s3602_s10 }
 0x9f1   :  { %v790_v53 = vpop.permute.xlu0 %789 }
 0x9f2   :  { %v3882_v55 = vadd.f32 %v790_v53, %v782_v52 }
 0x9f4   :  { %3394 = vtanh.f32 %v3882_v55  ;;  %v944_v51 = vrot.slane %v3882_v55, 4 }
 0x9f5   :  { %v763_v57 = vpop.permute.xlu1 %762 }
 0x9f6   :  { %v3885_v59 = vadd.f32 %v763_v57, %v755_v56 }
 0x9f8   :  { %3396 = vtanh.f32 %v3885_v59  ;;  %v917_v53 = vrot.slane %v3885_v59, 4 }
 0xa01   :  { %v3395_v60 = vpop.eup %3394 }
 0xa02   :  { %795 = vrot.lane.b32.xlu0 %v3395_v60, %s3601_s4 }
 0xa05   :  { %v3397_v63 = vpop.eup %3396 }
 0xa06   :  { %768 = vrot.lane.b32.xlu1 %v3397_v63, %s3601_s4 }
 0xa74   :  { %v796_v58 = vpop.permute.xlu0 %795 }
 0xa75   :  { %v3890_v3 = vmul.f32 %v3391_v29, %v796_v58 }
 0xa77   :  { %v858_v62 = vpack.c.bf16 %v3890_v3, %v3890_v3 }
 0xa78   :  { %v769_v61 = vpop.permute.xlu1 %768 }
 0xa79   :  { %v3894_v0 = vmul.f32 %v3393_v49, %v769_v61  ;;  %860 = vrot.lane.b32.xlu0 %v858_v62, %s3602_s10 }
 0xa7b   :  { %v809_v5 = vpack.c.bf16 %v3894_v0, %v3894_v0 }
 0xa7d   :  { %v811_v10 = vrot.slane %v809_v5, 2 }
 0xa7f   :  { %812 = vrot.lane.b32.xlu1 %v811_v10, %s3602_s10 }
 0xaeb   :  { %v861_v13 = vpop.permute.xlu0 %860 }
 0xaec   :  { %3124 = vmatmul.mubr.msk.bf16.vlgmr.msra.gmra.mxu1 %vm83_vm1, %v861_v13 }
 0xaed   :  { %3136 = vmatpush3.bf16.msra.mxu1 %v3691_v11  ;;  %3139 = vmatprep.mubr.msk.bf16.mxu1 %vm3600_vm0, %v3598_v1 }
 0xaee   :  { %3137 = vmatprep.subr.bf16.mxu1 %v3598_v1 }
 0xaf1   :  { %v813_v16 = vpop.permute.xlu1 %812  ;;  %3138 = vmatpush3.bf16.msra.mxu1 %v3708_v14 }
 0xaf2   :  { %3116 = vmatmul.mubr.msk.bf16.vlgmr.msra.gmra.mxu0 %vm83_vm1, %v813_v16  ;;  %3151 = vmatprep.subr.bf16.mxu1 %v3598_v1 }
 0xaf3   :  { %3128 = vmatpush3.bf16.msra.mxu0 %v3666_v4  ;;  %3131 = vmatprep.mubr.msk.bf16.mxu0 %vm3600_vm0, %v3598_v1 }
 0xaf4   :  { %3129 = vmatprep.subr.bf16.mxu0 %v3598_v1 }
 0xaf7   :  { %3130 = vmatpush3.bf16.msra.mxu0 %v3678_v7 }
 0xaf8   :  { %3143 = vmatprep.subr.bf16.mxu0 %v3598_v1 }
 0xbac   :  { %v899_v19 = vpop.f32.mrf.mxu1 }
 0xbad   :  { %v906_v22 = vrot.slane %v899_v19, 4 }
 0xbae   :  { %v3125_v23 = vpop.f32.mrf.mxu1 }
 0xbaf   :  { %v908_v24 = vadd.f32 %v906_v22, %v3744_v32 }
 0xbb0   :  { %v902_v25 = vpop.f32.mrf.mxu1 }
 0xbb1   :  { %3398 = vtanh.f32 %v908_v24  ;;  %v2893_v39 = vmul.f32 -1.442695, %v908_v24 }
 0xbb2   :  { %v851_v27 = vpop.f32.mrf.mxu0  ;;  %v3126_v28 = vpop.f32.mrf.mxu1 }
 0xbb3   :  { %v857_v30 = vadd.f32 %v851_v27, %v3746_v35 }
 0xbb4   :  { %v3117_v31 = vpop.f32.mrf.mxu0 }
 0xbb5   :  { %3400 = vtanh.f32 %v857_v30  ;;  %v2892_v40 = vmul.f32 -1.442695, %v857_v30 }
 0xbb6   :  { %v854_v33 = vpop.f32.mrf.mxu0  ;;  %3402 = vpow2.f32 %v2893_v39 }
 0xbb7   :  { %3404 = vpow2.f32 %v2892_v40 }
 0xbb8   :  { %v3118_v34 = vpop.f32.mrf.mxu0 }
 0xbbe   :  { %v3399_v36 = vpop.eup %3398 }
 0xbbf   :  { %948 = vrot.lane.b32.xlu0 %v3399_v36, %s3601_s4 }
 0xbc2   :  { %v3401_v37 = vpop.eup %3400 }
 0xbc3   :  { %921 = vrot.lane.b32.xlu1 %v3401_v37, %s3601_s4  ;;  %v3403_v38 = vpop.eup %3402 }
 0xbc4   :  { %v939_v41 = vadd.f32 1.0, %v3403_v38  ;;  %v3405_v43 = vpop.eup %3404 }
 0xbc5   :  { %v912_v44 = vadd.f32 1.0, %v3405_v43 }
 0xbc6   :  { %3406 = vrcp.f32 %v939_v41 }
 0xbc7   :  { %3408 = vrcp.f32 %v912_v44 }
 0xbd3   :  { %v3407_v47 = vpop.eup %3406 }
 0xbd4   :  { %v3409_v48 = vpop.eup %3408  ;;  %v946_v45 = vmul.f32 %v3407_v47, %v944_v51 }
 0xbd5   :  { %v919_v56 = vmul.f32 %v3409_v48, %v917_v53 }
 0xc31   :  { %v949_v29 = vpop.permute.xlu0 %948 }
 0xc32   :  { %v951_v46 = vmul.f32 %v3407_v47, %v949_v29 }
 0xc34   :  { %953 = vrot.lane.b32.xlu0 %v951_v46, %s3602_s10 }
 0xc35   :  { %v922_v49 = vpop.permute.xlu1 %921 }
 0xc36   :  { %v924_v50 = vmul.f32 %v3409_v48, %v922_v49 }
 0xc38   :  { %926 = vrot.lane.b32.xlu1 %v924_v50, %s3602_s10 }
 0xca6   :  { %v954_v52 = vpop.permute.xlu0 %953 }
 0xca7   :  { %v3922_v54 = vadd.f32 %v954_v52, %v946_v45 }
 0xca9   :  { %3410 = vtanh.f32 %v3922_v54  ;;  %v1108_v50 = vrot.slane %v3922_v54, 4 }
 0xcaa   :  { %v927_v57 = vpop.permute.xlu1 %926 }
 0xcab   :  { %v3925_v60 = vadd.f32 %v927_v57, %v919_v56 }
 0xcad   :  { %3412 = vtanh.f32 %v3925_v60  ;;  %v1081_v52 = vrot.slane %v3925_v60, 4 }
 0xcb6   :  { %v3411_v63 = vpop.eup %3410 }
 0xcb7   :  { %959 = vrot.lane.b32.xlu0 %v3411_v63, %s3601_s4 }
 0xcba   :  { %v3413_v58 = vpop.eup %3412 }
 0xcbb   :  { %932 = vrot.lane.b32.xlu1 %v3413_v58, %s3601_s4 }
 0xd29   :  { %v960_v55 = vpop.permute.xlu0 %959 }
 0xd2a   :  { %v3930_v62 = vmul.f32 %v3407_v47, %v960_v55 }
 0xd2c   :  { %v1024_v59 = vpack.c.bf16 %v3930_v62, %v3930_v62 }
 0xd2d   :  { %v933_v61 = vpop.permute.xlu1 %932 }
 0xd2e   :  { %v3934_v5 = vmul.f32 %v3409_v48, %v933_v61  ;;  %v1026_v10 = vrot.slane %v1024_v59, 2 }
 0xd30   :  { %v973_v13 = vpack.c.bf16 %v3934_v5, %v3934_v5  ;;  %1027 = vrot.lane.b32.xlu0 %v1026_v10, %s3602_s10 }
 0xd32   :  { %975 = vrot.lane.b32.xlu1 %v973_v13, %s3602_s10 }
 0xda2   :  { %v1028_v16 = vpop.permute.xlu0 %1027 }
 0xda3   :  { %3140 = vmatmul.mubr.msk.bf16.vlgmr.msra.gmra.mxu1 %vm83_vm1, %v1028_v16 }
 0xda4   :  { %v976_v19 = vpop.permute.xlu1 %975  ;;  %3152 = vmatpush3.bf16.msra.mxu1 %v3691_v11  ;;  %3155 = vmatprep.mubr.msk.bf16.mxu1 %vm3600_vm0, %v3598_v1 }
 0xda5   :  { %3132 = vmatmul.mubr.msk.bf16.vlgmr.msra.gmra.mxu0 %vm83_vm1, %v976_v19  ;;  %3153 = vmatprep.subr.bf16.mxu1 %v3598_v1 }
 0xda6   :  { %3144 = vmatpush3.bf16.msra.mxu0 %v3666_v4  ;;  %3147 = vmatprep.mubr.msk.bf16.mxu0 %vm3600_vm0, %v3598_v1 }
 0xda7   :  { %3145 = vmatprep.subr.bf16.mxu0 %v3598_v1 }
 0xda8   :  { %3154 = vmatpush3.bf16.msra.mxu1 %v3708_v14 }
 0xda9   :  { %3167 = vmatprep.subr.bf16.mxu1 %v3598_v1 }
 0xdaa   :  { %3146 = vmatpush3.bf16.msra.mxu0 %v3678_v7 }
 0xdab   :  { %3159 = vmatprep.subr.bf16.mxu0 %v3598_v1 }
 0xe63   :  { %v1066_v22 = vpop.f32.mrf.mxu1 }
 0xe64   :  { %v1072_v23 = vadd.f32 %v1066_v22, %v3744_v32 }
 0xe65   :  { %v1014_v24 = vpop.f32.mrf.mxu0  ;;  %v3141_v25 = vpop.f32.mrf.mxu1 }
 0xe66   :  { %3414 = vtanh.f32 %v1072_v23  ;;  %v1021_v27 = vrot.slane %v1014_v24, 4  ;;  %v2897_v40 = vmul.f32 -1.442695, %v1072_v23 }
 0xe67   :  { %v3133_v28 = vpop.f32.mrf.mxu0  ;;  %v1069_v30 = vpop.f32.mrf.mxu1 }
 0xe68   :  { %v1023_v31 = vadd.f32 %v1021_v27, %v3746_v35 }
 0xe69   :  { %v1017_v33 = vpop.f32.mrf.mxu0  ;;  %v3142_v34 = vpop.f32.mrf.mxu1 }
 0xe6a   :  { %3416 = vtanh.f32 %v1023_v31  ;;  %v2896_v32 = vmul.f32 -1.442695, %v1023_v31 }
 0xe6b   :  { %v3134_v36 = vpop.f32.mrf.mxu0  ;;  %3418 = vpow2.f32 %v2897_v40 }
 0xe6c   :  { %3420 = vpow2.f32 %v2896_v32 }
 0xe73   :  { %v3415_v37 = vpop.eup %3414 }
 0xe74   :  { %1112 = vrot.lane.b32.xlu0 %v3415_v37, %s3601_s4 }
 0xe77   :  { %v3417_v39 = vpop.eup %3416 }
 0xe78   :  { %1085 = vrot.lane.b32.xlu1 %v3417_v39, %s3601_s4  ;;  %v3419_v38 = vpop.eup %3418 }
 0xe79   :  { %v1103_v41 = vadd.f32 1.0, %v3419_v38  ;;  %v3421_v43 = vpop.eup %3420 }
 0xe7a   :  { %v1076_v44 = vadd.f32 1.0, %v3421_v43 }
 0xe7b   :  { %3422 = vrcp.f32 %v1103_v41 }
 0xe7c   :  { %3424 = vrcp.f32 %v1076_v44 }
 0xe88   :  { %v3423_v35 = vpop.eup %3422 }
 0xe89   :  { %v3425_v46 = vpop.eup %3424  ;;  %v1110_v51 = vmul.f32 %v3423_v35, %v1108_v50 }
 0xe8a   :  { %v1083_v56 = vmul.f32 %v3425_v46, %v1081_v52 }
 0xee6   :  { %v1113_v47 = vpop.permute.xlu0 %1112 }
 0xee7   :  { %v1115_v29 = vmul.f32 %v3423_v35, %v1113_v47 }
 0xee9   :  { %1117 = vrot.lane.b32.xlu0 %v1115_v29, %s3602_s10 }
 0xeea   :  { %v1086_v48 = vpop.permute.xlu1 %1085 }
 0xeeb   :  { %v1088_v49 = vmul.f32 %v3425_v46, %v1086_v48 }
 0xeed   :  { %1090 = vrot.lane.b32.xlu1 %v1088_v49, %s3602_s10 }
 0xf5b   :  { %v1118_v45 = vpop.permute.xlu0 %1117 }
 0xf5c   :  { %v3962_v53 = vadd.f32 %v1118_v45, %v1110_v51 }
 0xf5e   :  { %3426 = vtanh.f32 %v3962_v53 }
 0xf5f   :  { %v1091_v57 = vpop.permute.xlu1 %1090 }
 0xf60   :  { %v3965_v63 = vadd.f32 %v1091_v57, %v1083_v56 }
 0xf62   :  { %3428 = vtanh.f32 %v3965_v63  ;;  %v1245_v50 = vrot.slane %v3965_v63, 4 }
 0xf6b   :  { %v3427_v58 = vpop.eup %3426 }
 0xf6c   :  { %1123 = vrot.lane.b32.xlu0 %v3427_v58, %s3601_s4 }
 0xf6f   :  { %v3429_v55 = vpop.eup %3428 }
 0xf70   :  { %1096 = vrot.lane.b32.xlu1 %v3429_v55, %s3601_s4 }
 0xfde   :  { %v1124_v54 = vpop.permute.xlu0 %1123 }
 0xfdf   :  { %v3970_v59 = vmul.f32 %v3423_v35, %v1124_v54 }
 0xfe1   :  { %v1186_v60 = vpack.c.bf16 %v3970_v59, %v3970_v59 }
 0xfe2   :  { %v1097_v61 = vpop.permute.xlu1 %1096 }
 0xfe3   :  { %v3974_v10 = vmul.f32 %v3425_v46, %v1097_v61  ;;  %1188 = vrot.lane.b32.xlu0 %v1186_v60, %s3602_s10  ;;  %v1272_v46 = vrot.slane %v3962_v53, 4 }
 0xfe5   :  { %v1137_v13 = vpack.c.bf16 %v3974_v10, %v3974_v10 }
 0xfe7   :  { %v1139_v16 = vrot.slane %v1137_v13, 2 }
 0xfe9   :  { %1140 = vrot.lane.b32.xlu1 %v1139_v16, %s3602_s10 }
0x1055   :  { %v1189_v19 = vpop.permute.xlu0 %1188 }
0x1056   :  { %3156 = vmatmul.mubr.msk.bf16.vlgmr.msra.gmra.mxu1 %vm83_vm1, %v1189_v19 }
0x1057   :  { %3168 = vmatpush3.bf16.msra.mxu1 %v3691_v11  ;;  %3171 = vmatprep.mubr.msk.bf16.mxu1 %vm3600_vm0, %v3598_v1 }
0x1058   :  { %3169 = vmatprep.subr.bf16.mxu1 %v3598_v1 }
0x105b   :  { %v1141_v22 = vpop.permute.xlu1 %1140  ;;  %3170 = vmatpush3.bf16.msra.mxu1 %v3708_v14 }
0x105c   :  { %3148 = vmatmul.mubr.msk.bf16.vlgmr.msra.gmra.mxu0 %vm83_vm1, %v1141_v22  ;;  %3175 = vmatprep.subr.bf16.mxu1 %v3598_v1 }
0x105d   :  { %3160 = vmatpush3.bf16.msra.mxu0 %v3666_v4  ;;  %3163 = vmatprep.mubr.msk.bf16.mxu0 %vm3600_vm0, %v3598_v1 }
0x105e   :  { %3161 = vmatprep.subr.bf16.mxu0 %v3598_v1 }
0x1061   :  { %3162 = vmatpush3.bf16.msra.mxu0 %v3678_v7 }
0x1116   :  { %v1227_v11 = vpop.f32.mrf.mxu1 }
0x1117   :  { %v1234_v23 = vrot.slane %v1227_v11, 4 }
0x1118   :  { %v3157_v24 = vpop.f32.mrf.mxu1 }
0x1119   :  { %v1236_v25 = vadd.f32 %v1234_v23, %v3740_v26 }
0x111a   :  { %v1230_v27 = vpop.f32.mrf.mxu1 }
0x111b   :  { %3430 = vtanh.f32 %v1236_v25  ;;  %v2901_v7 = vmul.f32 -1.442695, %v1236_v25 }
0x111c   :  { %v1179_v14 = vpop.f32.mrf.mxu0  ;;  %v3158_v28 = vpop.f32.mrf.mxu1 }
0x111d   :  { %v1185_v30 = vadd.f32 %v1179_v14, %v3750_v42 }
0x111e   :  { %v3149_v31 = vpop.f32.mrf.mxu0 }
0x111f   :  { %3432 = vtanh.f32 %v1185_v30  ;;  %v2900_v37 = vmul.f32 -1.442695, %v1185_v30 }
0x1120   :  { %v1182_v4 = vpop.f32.mrf.mxu0  ;;  %3434 = vpow2.f32 %v2901_v7 }
0x1121   :  { %3436 = vpow2.f32 %v2900_v37 }
0x1122   :  { %v3150_v33 = vpop.f32.mrf.mxu0 }
0x1128   :  { %v3431_v34 = vpop.eup %3430 }
0x1129   :  { %1276 = vrot.lane.b32.xlu0 %v3431_v34, %s3601_s4 }
0x112c   :  { %v3433_v36 = vpop.eup %3432 }
0x112d   :  { %1249 = vrot.lane.b32.xlu1 %v3433_v36, %s3601_s4  ;;  %v3435_v39 = vpop.eup %3434 }
0x112e   :  { %v1267_v40 = vadd.f32 1.0, %v3435_v39  ;;  %v3437_v32 = vpop.eup %3436 }
0x112f   :  { %v1240_v38 = vadd.f32 1.0, %v3437_v32 }
0x1130   :  { %3438 = vrcp.f32 %v1267_v40 }
0x1131   :  { %3440 = vrcp.f32 %v1240_v38 }
0x113d   :  { %v3439_v41 = vpop.eup %3438 }
0x113e   :  { %v3441_v35 = vpop.eup %3440  ;;  %v1274_v48 = vmul.f32 %v3439_v41, %v1272_v46 }
0x113f   :  { %v1247_v45 = vmul.f32 %v3441_v35, %v1245_v50 }
0x119b   :  { %v1277_v43 = vpop.permute.xlu0 %1276 }
0x119c   :  { %v1279_v44 = vmul.f32 %v3439_v41, %v1277_v43 }
0x119e   :  { %1281 = vrot.lane.b32.xlu0 %v1279_v44, %s3602_s10 }
0x119f   :  { %v1250_v47 = vpop.permute.xlu1 %1249 }
0x11a0   :  { %v1252_v29 = vmul.f32 %v3441_v35, %v1250_v47 }
0x11a2   :  { %1254 = vrot.lane.b32.xlu1 %v1252_v29, %s3602_s10 }
0x1210   :  { %v1282_v49 = vpop.permute.xlu0 %1281 }
0x1211   :  { %v1284_v51 = vadd.f32 %v1282_v49, %v1274_v48 }
0x1213   :  { %3442 = vtanh.f32 %v1284_v51 }
0x1214   :  { %v1255_v52 = vpop.permute.xlu1 %1254 }
0x1215   :  { %v4001_v56 = vadd.f32 %v1255_v52, %v1247_v45 }
0x1217   :  { %3444 = vtanh.f32 %v4001_v56  ;;  %v1409_v46 = vrot.slane %v4001_v56, 4 }
0x1220   :  { %v3443_v57 = vpop.eup %3442 }
0x1221   :  { %1287 = vrot.lane.b32.xlu0 %v3443_v57, %s3601_s4 }
0x1224   :  { %v3445_v58 = vpop.eup %3444 }
0x1225   :  { %1260 = vrot.lane.b32.xlu1 %v3445_v58, %s3601_s4  ;;  %v4116_v58 = vld [vmem:[%s4408_s7] sm:$0xff]  }
0x1293   :  { %v1288_v55 = vpop.permute.xlu0 %1287 }
0x1294   :  { %v4006_v53 = vmul.f32 %v3439_v41, %v1288_v55 }
0x1296   :  { %v1352_v63 = vpack.c.bf16 %v4006_v53, %v4006_v53 }
0x1297   :  { %v1261_v54 = vpop.permute.xlu1 %1260 }
0x1298   :  { %v1354_v60 = vrot.slane %v1352_v63, 2  ;;  %v4010_v61 = vmul.f32 %v3441_v35, %v1261_v54  ;;  %v1436_v35 = vrot.slane %v1284_v51, 4  ;;  %v4107_v51 = vld [vmem:[%s4408_s7 + $0x8] sm:$0xff]  }
0x129a   :  { %v1301_v13 = vpack.c.bf16 %v4010_v61, %v4010_v61  ;;  %1355 = vrot.lane.b32.xlu0 %v1354_v60, %s3602_s10 }
0x129c   :  { %1303 = vrot.lane.b32.xlu1 %v1301_v13, %s3602_s10 }
0x130c   :  { %v1356_v16 = vpop.permute.xlu0 %1355 }
0x130d   :  { %3172 = vmatmul.mubr.msk.bf16.vlgmr.msra.gmra.mxu1 %vm83_vm1, %v1356_v16 }
0x130e   :  { %v1304_v19 = vpop.permute.xlu1 %1303  ;;  %3179 = vmatprep.mubr.msk.bf16.mxu1 %vm3600_vm0, %v3598_v1 }
0x130f   :  { %3164 = vmatmul.mubr.msk.bf16.vlgmr.msra.gmra.mxu0 %vm83_vm1, %v1304_v19 }
0x1310   :  { %1578 = vmatprep.mubr.bf16.mxu0 %v3599_v2 }
0x13cd   :  { %v1394_v22 = vpop.f32.mrf.mxu1 }
0x13ce   :  { %v1400_v11 = vadd.f32 %v1394_v22, %v3740_v26 }
0x13cf   :  { %v1342_v23 = vpop.f32.mrf.mxu0  ;;  %v3173_v24 = vpop.f32.mrf.mxu1 }
0x13d0   :  { %3446 = vtanh.f32 %v1400_v11  ;;  %v1349_v25 = vrot.slane %v1342_v23, 4  ;;  %v2905_v36 = vmul.f32 -1.442695, %v1400_v11 }
0x13d1   :  { %v3165_v27 = vpop.f32.mrf.mxu0  ;;  %v1397_v14 = vpop.f32.mrf.mxu1 }
0x13d2   :  { %v1351_v28 = vadd.f32 %v1349_v25, %v3750_v42 }
0x13d3   :  { %v1345_v30 = vpop.f32.mrf.mxu0  ;;  %v3174_v31 = vpop.f32.mrf.mxu1 }
0x13d4   :  { %3448 = vtanh.f32 %v1351_v28  ;;  %v2904_v26 = vmul.f32 -1.442695, %v1351_v28 }
0x13d5   :  { %v3166_v4 = vpop.f32.mrf.mxu0  ;;  %3450 = vpow2.f32 %v2905_v36 }
0x13d6   :  { %3452 = vpow2.f32 %v2904_v26 }
0x13dd   :  { %v3447_v33 = vpop.eup %3446 }
0x13de   :  { %1440 = vrot.lane.b32.xlu0 %v3447_v33, %s3601_s4 }
0x13e1   :  { %v3449_v34 = vpop.eup %3448 }
0x13e2   :  { %1413 = vrot.lane.b32.xlu1 %v3449_v34, %s3601_s4  ;;  %v3451_v7 = vpop.eup %3450 }
0x13e3   :  { %v1431_v37 = vadd.f32 1.0, %v3451_v7  ;;  %v3453_v39 = vpop.eup %3452 }
0x13e4   :  { %v1404_v40 = vadd.f32 1.0, %v3453_v39 }
0x13e5   :  { %3454 = vrcp.f32 %v1431_v37 }
0x13e6   :  { %3456 = vrcp.f32 %v1404_v40 }
0x13f2   :  { %v4025_v42 = vpop.eup %3454 }
0x13f3   :  { %v4029_v41 = vpop.eup %3456  ;;  %v1438_v47 = vmul.f32 %v4025_v42, %v1436_v35 }
0x13f4   :  { %v1411_v49 = vmul.f32 %v4029_v41, %v1409_v46 }
0x1450   :  { %v1441_v32 = vpop.permute.xlu0 %1440 }
0x1451   :  { %v1443_v38 = vmul.f32 %v4025_v42, %v1441_v32 }
0x1453   :  { %1445 = vrot.lane.b32.xlu0 %v1443_v38, %s3602_s10  ;;  %v1487_v38 = vld [vmem:[%s4409_s8] sm:$0x3] }
0x1454   :  { %v1414_v43 = vpop.permute.xlu1 %1413 }
0x1455   :  { %v1416_v44 = vmul.f32 %v4029_v41, %v1414_v43  ;;  %v1496_v43 = vrot.slane %v1487_v38, %v59_v18 }
0x1457   :  { %1418 = vrot.lane.b32.xlu1 %v1416_v44, %s3602_s10 }
0x14c5   :  { %v1446_v29 = vpop.permute.xlu0 %1445 }
0x14c6   :  { %v1448_v48 = vadd.f32 %v1446_v29, %v1438_v47 }
0x14c8   :  { %3458 = vtanh.f32 %v1448_v48 }
0x14c9   :  { %v1419_v50 = vpop.permute.xlu1 %1418 }
0x14ca   :  { %v1421_v45 = vadd.f32 %v1419_v50, %v1411_v49 }
0x14cc   :  { %3460 = vtanh.f32 %v1421_v45 }
0x14d5   :  { %v3459_v52 = vpop.eup %3458 }
0x14d6   :  { %1451 = vrot.lane.b32.xlu0 %v3459_v52, %s3601_s4 }
0x14d9   :  { %v3461_v57 = vpop.eup %3460 }
0x14da   :  { %304 = vrot.lane.b32.xlu0 %v3774_v21, %s3602_s10  ;;  %1424 = vrot.lane.b32.xlu1 %v3461_v57, %s3601_s4  ;;  %v3318_v21 = vld [vmem:[%s4406_s5 + $0x30] ss:$8 sps:$4 sm:$0xff]  }
0x14de   :  { %636 = vrot.lane.b32.xlu0 %v3854_v9, %s3602_s10  ;;  %470 = vrot.lane.b32.xlu1 %v3814_v12, %s3602_s10  ;;  %v3320_v12 = vld [vmem:[%s4406_s5 + $0x34] ss:$8 sps:$4 sm:$0xff]   ;;  %v3323_v9 = vld [vmem:[%s4406_s5 + $0x24] ss:$8 sps:$4 sm:$0xff]  }
0x14df   :  { %1554 = vmatprep.subr.bf16.mxu0 %v3320_v12 }
0x14e0   :  { %1555 = vmatpush1.bf16.msra.mxu0 %v3318_v21 }
0x14e1   :  { %1556 = vmatprep.subr.bf16.mxu0 %v3323_v9 }
0x14e2   :  { %969 = vrot.lane.b32.xlu0 %v3930_v62, %s3601_s4  ;;  %800 = vrot.lane.b32.xlu1 %v3894_v0, %s3602_s10  ;;  %v3328_v0 = vld [vmem:[%s4406_s5] ss:$8 sps:$4 sm:$0xff]   ;;  %v3330_v62 = vld [vmem:[%s4406_s5 + $0x4] ss:$8 sps:$4 sm:$0xff]  }
0x14e6   :  { %1297 = vrot.lane.b32.xlu0 %v4006_v53, %s3601_s4  ;;  %1133 = vrot.lane.b32.xlu1 %v3970_v59, %s3601_s4 }
0x14ea   :  { %310 = vrot.lane.b32.xlu0 %v3770_v15, %s3601_s4  ;;  %476 = vrot.lane.b32.xlu1 %v3810_v8, %s3601_s4  ;;  %v3321_v15 = vld [vmem:[%s4406_s5 + $0x20] ss:$8 sps:$4 sm:$0xff]   ;;  %v3324_v8 = vld [vmem:[%s4406_s5 + $0x10] ss:$8 sps:$4 sm:$0xff]  }
0x14eb   :  { %1557 = vmatpush1.bf16.msra.mxu0 %v3321_v15 }
0x14ee   :  { %641 = vrot.lane.b32.xlu0 %v3850_v6, %s3601_s4  ;;  %805 = vrot.lane.b32.xlu1 %v3890_v3, %s3601_s4  ;;  %v3326_v6 = vld [vmem:[%s4406_s5 + $0x14] ss:$8 sps:$4 sm:$0xff]   ;;  %v4085_v3 = vld [vmem:[%s4407_s6 + $0x8] sm:$0xff]  }
0x14ef   :  { %1558 = vmatprep.subr.bf16.mxu0 %v3326_v6  ;;  %3176 = vmatpush3.bf16.msra.mxu1 %v4085_v3 }
0x14f0   :  { %1559 = vmatpush1.bf16.msra.mxu0 %v3324_v8  ;;  %3177 = vmatprep.subr.bf16.mxu1 %v3598_v1 }
0x14f1   :  { %1560 = vmatprep.subr.bf16.mxu0 %v3330_v62 }
0x14f2   :  { %964 = vrot.lane.b32.xlu0 %v3934_v5, %s3602_s10  ;;  %v4098_v5 = vld [vmem:[%s4407_s6] sm:$0xff]  }
0x14f3   :  { %3178 = vmatpush3.bf16.msra.mxu1 %v4098_v5 }
0x14f4   :  { %1561 = vmatpush1.bf16.msra.mxu0 %v3328_v0  ;;  %3183 = vmatprep.subr.bf16.mxu1 %v3598_v1 }
0x14f5   :  { %3199 = vmatprep.subr.bf16.mxu0 %v3598_v1 }
0x14f6   :  { %1292 = vrot.lane.b32.xlu0 %v4010_v61, %s3602_s10  ;;  %3180 = vmatmul.mubr.bf16.vlgmr.msra.gmra.mxu1 %v3599_v2 }
0x14f7   :  { %3187 = vmatprep.mubr.msk.bf16.mxu1 %vm3600_vm0, %v3598_v1  ;;  %3184 = vmatpush3.bf16.msra.mxu1 %v4107_v51 }
0x14f8   :  { %3185 = vmatprep.subr.bf16.mxu1 %v3598_v1 }
0x14fb   :  { %3186 = vmatpush3.bf16.msra.mxu1 %v4116_v58 }
0x14fc   :  { %3191 = vmatprep.subr.bf16.mxu1 %v3598_v1 }
0x14fe   :  { %3188 = vmatmul.mubr.bf16.vlgmr.msra.gmra.mxu1 %v3599_v2 }
0x14ff   :  { %3192 = vmatpush3.bf16.msra.mxu1 %v4085_v3  ;;  %3195 = vmatprep.mubr.msk.bf16.mxu1 %vm3600_vm0, %v3598_v1 }
0x1500   :  { %3193 = vmatprep.subr.bf16.mxu1 %v3598_v1 }
0x1503   :  { %3194 = vmatpush3.bf16.msra.mxu1 %v4098_v5 }
0x1504   :  { %3207 = vmatprep.subr.bf16.mxu1 %v3598_v1 }
0x1548   :  { %v1452_v59 = vpop.permute.xlu0 %1451 }
0x1549   :  { %v1454_v56 = vmul.f32 %v4025_v42, %v1452_v59 }
0x154b   :  { %1461 = vrot.lane.b32.xlu1 %v1454_v56, %s3601_s4 }
0x154c   :  { %v305_v55 = vpop.permute.xlu0 %304  ;;  %v1425_v53 = vpop.permute.xlu1 %1424 }
0x154d   :  { %308 = vst.msk [vmem:[#allocation2] sm:$0xf] %vm307_vm2, %v305_v55  ;;  %v1427_v60 = vmul.f32 %v4029_v41, %v1425_v53  ;;  %v1492_v41 = vrot.slane %v1487_v38, %v55_v20 }
0x154f   :  { %1128 = vrot.lane.b32.xlu1 %v3974_v10, %s3602_s10 }
0x1550   :  { %v637_v63 = vpop.permute.xlu0 %636  ;;  %v471_v54 = vpop.permute.xlu1 %470 }
0x1551   :  { %639 = vst.msk [vmem:[#allocation2 + $0x8] sm:$0xf] %vm307_vm2, %v637_v63 }
0x1552   :  { %474 = vst.msk [vmem:[#allocation2] sm:$0xf0] %vm473_vm3, %v471_v54 }
0x1553   :  { %1456 = vrot.lane.b32.xlu1 %v1427_v60, %s3602_s10 }
0x1554   :  { %v970_v10 = vpop.permute.xlu0 %969  ;;  %v801_v61 = vpop.permute.xlu1 %800 }
0x1555   :  { %803 = vst.msk [vmem:[#allocation2 + $0x8] sm:$0xf0] %vm473_vm3, %v801_v61 }
0x1556   :  { %972 = vst.msk [vmem:[#allocation2 + $0x8] sm:$0xf0] %vm313_vm4, %v970_v10 }
0x1558   :  { %v1298_v13 = vpop.permute.xlu0 %1297  ;;  %v1134_v16 = vpop.permute.xlu1 %1133 }
0x1559   :  { %1300 = vst.msk [vmem:[#allocation2] sm:$0xf0] %vm313_vm4, %v1298_v13 }
0x155a   :  { %1136 = vst.msk [vmem:[#allocation2 + $0x8] sm:$0xf] %vm479_vm5, %v1134_v16 }
0x155c   :  { %v311_v19 = vpop.permute.xlu0 %310  ;;  %v477_v22 = vpop.permute.xlu1 %476 }
0x155d   :  { %314 = vst.msk [vmem:[#allocation2 + $0x18] sm:$0xf0] %vm313_vm4, %v311_v19 }
0x155e   :  { %480 = vst.msk [vmem:[#allocation2 + $0x18] sm:$0xf] %vm479_vm5, %v477_v22 }
0x1560   :  { %v642_v11 = vpop.permute.xlu0 %641  ;;  %v806_v23 = vpop.permute.xlu1 %805 }
0x1561   :  { %644 = vst.msk [vmem:[#allocation2 + $0x10] sm:$0xf0] %vm313_vm4, %v642_v11  ;;  %v1466_v31 = vld [vmem:[#allocation2 + $0x8] sm:$0xff] }
0x1562   :  { %808 = vst.msk [vmem:[#allocation2 + $0x10] sm:$0xf] %vm479_vm5, %v806_v23 }
0x1564   :  { %v965_v24 = vpop.permute.xlu0 %964 }
0x1565   :  { %967 = vst.msk [vmem:[#allocation2 + $0x10] sm:$0xf] %vm307_vm2, %v965_v24 }
0x1568   :  { %v1293_v25 = vpop.permute.xlu0 %1292 }
0x1569   :  { %1295 = vst.msk [vmem:[#allocation2 + $0x18] sm:$0xf] %vm307_vm2, %v1293_v25 }
0x15b6   :  { %v1645_v26 = vpop.f32.mrf.mxu1 }
0x15b8   :  { %v3181_v7 = vpop.f32.mrf.mxu1 }
0x15ba   :  { %v1648_v37 = vpop.f32.mrf.mxu1 }
0x15bc   :  { %v3182_v39 = vpop.f32.mrf.mxu1 }
0x15bd   :  { %v1462_v27 = vpop.permute.xlu1 %1461 }
0x15be   :  { %1464 = vst.msk [vmem:[#allocation2] sm:$0xf] %vm479_vm5, %v1462_v27 }
0x15c1   :  { %v1129_v14 = vpop.permute.xlu1 %1128 }
0x15c2   :  { %1131 = vst.msk [vmem:[#allocation2 + $0x10] sm:$0xf0] %vm473_vm3, %v1129_v14 }
0x15c5   :  { %v1457_v28 = vpop.permute.xlu1 %1456  ;;  %v1465_v30 = vld [vmem:[#allocation2] sm:$0xff] }
0x15c6   :  { %1459 = vst.msk [vmem:[#allocation2 + $0x18] sm:$0xf0] %vm473_vm3, %v1457_v28  ;;  %v1469_v4 = vpack.c.bf16 %v1466_v31, %v1465_v30 }
0x15c8   :  { %2914 = vmatmul.mubr.msk.bf16.vlgmr.msra.gmra.mxu0 %vm1539_vm6, %v1469_v4 }
0x15c9   :  { %1588 = vmatprep.mubr.bf16.mxu0 %v3599_v2  ;;  %3200 = vmatpush3.bf16.msra.mxu0 %v4107_v51  ;;  %v1467_v33 = vld [vmem:[#allocation2 + $0x10] sm:$0xff]  ;;  %v1698_v2 = vpop.f32.mrf.mxu1 }
0x15ca   :  { %3201 = vmatprep.subr.bf16.mxu0 %v3598_v1  ;;  %v1705_v21 = vrot.slane %v1698_v2, 4 }
0x15cb   :  { %v3189_v40 = vpop.f32.mrf.mxu1 }
0x15cd   :  { %v1468_v34 = vld [vmem:[#allocation2 + $0x18] sm:$0xff]  ;;  %3202 = vmatpush3.bf16.msra.mxu0 %v4116_v58  ;;  %v1701_v42 = vpop.f32.mrf.mxu1 }
0x15ce   :  { %v1470_v36 = vpack.c.bf16 %v1468_v34, %v1467_v33  ;;  %3215 = vmatprep.subr.bf16.mxu0 %v3598_v1 }
0x15cf   :  { %v3190_v32 = vpop.f32.mrf.mxu1 }
0x15d0   :  { %2915 = vmatmul.mubr.msk.bf16.gmra.mxu0 %vm1539_vm6, %v1470_v36 }
0x15d1   :  { %3203 = vmatprep.mubr.msk.bf16.mxu0 %vm3600_vm0, %v3598_v1 }
0x1688   :  { %v1580_v44 = vpop.f32.mrf.mxu0 }
0x1689   :  { %v4163_v35 = vadd.f32 %v1580_v44, %v1492_v41 }
0x168a   :  { %v1582_v47 = vpop.f32.mrf.mxu0 }
0x168b   :  { %v1651_v29 = vadd.f32 %v1645_v26, %v4163_v35  ;;  %v4166_v46 = vadd.f32 %v1582_v47, %v1496_v43 }
0x168c   :  { %v1584_v48 = vpop.f32.mrf.mxu0 }
0x168d   :  { %3462 = vtanh.f32 %v1651_v29  ;;  %v4168_v49 = vadd.f32 %v1584_v48, %v1492_v41  ;;  %v2920_v62 = vmul.f32 -1.442695, %v1651_v29 }
0x168e   :  { %v1586_v50 = vpop.f32.mrf.mxu0 }
0x168f   :  { %v4170_v45 = vadd.f32 %v1586_v50, %v1496_v43 }
0x1690   :  { %v1590_v52 = vpop.f32.mrf.mxu0 }
0x1691   :  { %v4172_v20 = vadd.f32 %v1590_v52, %v1492_v41 }
0x1692   :  { %v1592_v17 = vpop.f32.mrf.mxu0 }
0x1693   :  { %v4174_v18 = vadd.f32 %v1592_v17, %v1496_v43 }
0x1694   :  { %v1594_v57 = vpop.f32.mrf.mxu0 }
0x1695   :  { %v4176_v12 = vadd.f32 %v1594_v57, %v1492_v41 }
0x1696   :  { %v1596_v9 = vpop.f32.mrf.mxu0 }
0x1697   :  { %v4178_v15 = vadd.f32 %v1596_v9, %v1496_v43 }
0x1699   :  { %v1707_v8 = vadd.f32 %v1705_v21, %v4178_v15 }
0x169a   :  { %v3463_v6 = vpop.eup %3462 }
0x169b   :  { %3464 = vtanh.f32 %v1707_v8  ;;  %1717 = vrot.lane.b32.xlu1 %v3463_v6, %s3601_s4  ;;  %v2921_v59 = vmul.f32 -1.442695, %v1707_v8 }
0x169c   :  { %3466 = vpow2.f32 %v2920_v62 }
0x169d   :  { %3468 = vpow2.f32 %v2921_v59 }
0x16a8   :  { %v3465_v0 = vpop.eup %3464 }
0x16a9   :  { %1741 = vrot.lane.b32.xlu0 %v3465_v0, %s3601_s4  ;;  %v3467_v56 = vpop.eup %3466 }
0x16aa   :  { %v1711_v55 = vadd.f32 1.0, %v3467_v56  ;;  %v3469_v53 = vpop.eup %3468 }
0x16ab   :  { %v1735_v63 = vadd.f32 1.0, %v3469_v53 }
0x16ac   :  { %3470 = vrcp.f32 %v1711_v55 }
0x16ad   :  { %3472 = vrcp.f32 %v1735_v63 }
0x16b9   :  { %v3471_v54 = vpop.eup %3470 }
0x16ba   :  { %v3473_v61 = vpop.eup %3472  ;;  %v1715_v19 = vmul.f32 0.0, %v3471_v54 }
0x16bb   :  { %v1739_v23 = vmul.f32 0.0, %v3473_v61 }
0x170d   :  { %v1718_v60 = vpop.permute.xlu1 %1717 }
0x170e   :  { %v1720_v10 = vmul.f32 %v3471_v54, %v1718_v60 }
0x1710   :  { %1722 = vrot.lane.b32.xlu1 %v1720_v10, %s3602_s10 }
0x171b   :  { %v1742_v13 = vpop.permute.xlu0 %1741 }
0x171c   :  { %v1744_v16 = vmul.f32 %v3473_v61, %v1742_v13 }
0x171e   :  { %1746 = vrot.lane.b32.xlu0 %v1744_v16, %s3602_s10 }
0x1782   :  { %v1723_v22 = vpop.permute.xlu1 %1722 }
0x1783   :  { %v4185_v11 = vadd.f32 %v1723_v22, %v1715_v19 }
0x1785   :  { %3474 = vtanh.f32 %v4185_v11  ;;  %v1864_v59 = vrot.slane %v4185_v11, 4 }
0x1790   :  { %v1747_v24 = vpop.permute.xlu0 %1746 }
0x1791   :  { %v4188_v25 = vadd.f32 %v1747_v24, %v1739_v23 }
0x1792   :  { %v3475_v27 = vpop.eup %3474 }
0x1793   :  { %3476 = vtanh.f32 %v4188_v25  ;;  %1728 = vrot.lane.b32.xlu1 %v3475_v27, %s3601_s4  ;;  %v1891_v63 = vrot.slane %v4188_v25, 4 }
0x17a0   :  { %v3477_v14 = vpop.eup %3476 }
0x17a1   :  { %1752 = vrot.lane.b32.xlu0 %v3477_v14, %s3601_s4 }
0x1805   :  { %v1729_v28 = vpop.permute.xlu1 %1728 }
0x1806   :  { %v1731_v30 = vmul.f32 %v3471_v54, %v1729_v28 }
0x1808   :  { %v1756_v31 = vpack.c.bf16 %v1731_v30, %v1731_v30 }
0x180a   :  { %1758 = vrot.lane.b32.xlu0 %v1756_v31, %s3602_s10 }
0x1813   :  { %v1753_v4 = vpop.permute.xlu0 %1752 }
0x1814   :  { %v1755_v33 = vmul.f32 %v3473_v61, %v1753_v4 }
0x1816   :  { %v1807_v34 = vpack.c.bf16 %v1755_v33, %v1755_v33 }
0x1818   :  { %v1809_v36 = vrot.slane %v1807_v34, 2 }
0x181a   :  { %1810 = vrot.lane.b32.xlu1 %v1809_v36, %s3602_s10 }
0x187c   :  { %v1759_v26 = vpop.permute.xlu0 %1758 }
0x187d   :  { %3196 = vmatmul.mubr.msk.bf16.vlgmr.msra.gmra.mxu1 %vm83_vm1, %v1759_v26 }
0x187e   :  { %3208 = vmatpush3.bf16.msra.mxu1 %v4085_v3  ;;  %3211 = vmatprep.mubr.msk.bf16.mxu1 %vm3600_vm0, %v3598_v1 }
0x187f   :  { %3209 = vmatprep.subr.bf16.mxu1 %v3598_v1 }
0x1882   :  { %3210 = vmatpush3.bf16.msra.mxu1 %v4098_v5 }
0x1883   :  { %3223 = vmatprep.subr.bf16.mxu1 %v3598_v1 }
0x188c   :  { %v1811_v7 = vpop.permute.xlu1 %1810 }
0x188d   :  { %3204 = vmatmul.mubr.msk.bf16.vlgmr.msra.gmra.mxu0 %vm83_vm1, %v1811_v7 }
0x188e   :  { %3216 = vmatpush3.bf16.msra.mxu0 %v4107_v51  ;;  %3219 = vmatprep.mubr.msk.bf16.mxu0 %vm3600_vm0, %v3598_v1 }
0x188f   :  { %3217 = vmatprep.subr.bf16.mxu0 %v3598_v1 }
0x1892   :  { %3218 = vmatpush3.bf16.msra.mxu0 %v4116_v58 }
0x1893   :  { %3231 = vmatprep.subr.bf16.mxu0 %v3598_v1 }
0x193d   :  { %v1797_v37 = vpop.f32.mrf.mxu1 }
0x193e   :  { %v1804_v39 = vrot.slane %v1797_v37, 4 }
0x193f   :  { %v3197_v2 = vpop.f32.mrf.mxu1 }
0x1940   :  { %v1806_v40 = vadd.f32 %v1804_v39, %v4163_v35 }
0x1941   :  { %v1800_v42 = vpop.f32.mrf.mxu1 }
0x1942   :  { %3478 = vtanh.f32 %v1806_v40  ;;  %v2924_v50 = vmul.f32 -1.442695, %v1806_v40 }
0x1943   :  { %v3198_v32 = vpop.f32.mrf.mxu1 }
0x194d   :  { %v1849_v38 = vpop.f32.mrf.mxu0 }
0x194e   :  { %v1855_v41 = vadd.f32 %v1849_v38, %v4178_v15 }
0x194f   :  { %v3479_v43 = vpop.eup %3478  ;;  %v3205_v44 = vpop.f32.mrf.mxu0 }
0x1950   :  { %3480 = vtanh.f32 %v1855_v41  ;;  %1868 = vrot.lane.b32.xlu1 %v3479_v43, %s3601_s4  ;;  %v2925_v52 = vmul.f32 -1.442695, %v1855_v41 }
0x1951   :  { %v1852_v47 = vpop.f32.mrf.mxu0  ;;  %3482 = vpow2.f32 %v2924_v50 }
0x1952   :  { %3484 = vpow2.f32 %v2925_v52 }
0x1953   :  { %v3206_v29 = vpop.f32.mrf.mxu0 }
0x195d   :  { %v3481_v48 = vpop.eup %3480 }
0x195e   :  { %1895 = vrot.lane.b32.xlu0 %v3481_v48, %s3601_s4  ;;  %v3483_v35 = vpop.eup %3482 }
0x195f   :  { %v1859_v17 = vadd.f32 1.0, %v3483_v35  ;;  %v3485_v57 = vpop.eup %3484 }
0x1960   :  { %v1886_v21 = vadd.f32 1.0, %v3485_v57 }
0x1961   :  { %3486 = vrcp.f32 %v1859_v17 }
0x1962   :  { %3488 = vrcp.f32 %v1886_v21 }
0x196e   :  { %v3487_v9 = vpop.eup %3486 }
0x196f   :  { %v3489_v6 = vpop.eup %3488  ;;  %v1866_v56 = vmul.f32 %v3487_v9, %v1864_v59 }
0x1970   :  { %v1893_v54 = vmul.f32 %v3489_v6, %v1891_v63 }
0x19c2   :  { %v1869_v15 = vpop.permute.xlu1 %1868 }
0x19c3   :  { %v1871_v8 = vmul.f32 %v3487_v9, %v1869_v15 }
0x19c5   :  { %1873 = vrot.lane.b32.xlu1 %v1871_v8, %s3602_s10 }
0x19d0   :  { %v1896_v0 = vpop.permute.xlu0 %1895 }
0x19d1   :  { %v1898_v62 = vmul.f32 %v3489_v6, %v1896_v0 }
0x19d3   :  { %1900 = vrot.lane.b32.xlu0 %v1898_v62, %s3602_s10 }
0x1a37   :  { %v1874_v55 = vpop.permute.xlu1 %1873 }
0x1a38   :  { %v4216_v53 = vadd.f32 %v1874_v55, %v1866_v56 }
0x1a3a   :  { %3490 = vtanh.f32 %v4216_v53  ;;  %v2018_v17 = vrot.slane %v4216_v53, 4 }
0x1a45   :  { %v1901_v60 = vpop.permute.xlu0 %1900 }
0x1a46   :  { %v4220_v10 = vadd.f32 %v1901_v60, %v1893_v54 }
0x1a47   :  { %v3491_v61 = vpop.eup %3490 }
0x1a48   :  { %3492 = vtanh.f32 %v4220_v10  ;;  %1879 = vrot.lane.b32.xlu1 %v3491_v61, %s3601_s4  ;;  %v2045_v15 = vrot.slane %v4220_v10, 4 }
0x1a55   :  { %v3493_v13 = vpop.eup %3492 }
0x1a56   :  { %1906 = vrot.lane.b32.xlu0 %v3493_v13, %s3601_s4 }
0x1aba   :  { %v1880_v16 = vpop.permute.xlu1 %1879 }
0x1abb   :  { %v1882_v19 = vmul.f32 %v3487_v9, %v1880_v16 }
0x1abd   :  { %v1910_v22 = vpack.c.bf16 %v1882_v19, %v1882_v19 }
0x1abf   :  { %v1912_v11 = vrot.slane %v1910_v22, 2 }
0x1ac1   :  { %1913 = vrot.lane.b32.xlu1 %v1912_v11, %s3602_s10 }
0x1ac8   :  { %v1907_v23 = vpop.permute.xlu0 %1906 }
0x1ac9   :  { %v1909_v24 = vmul.f32 %v3489_v6, %v1907_v23 }
0x1acb   :  { %v1959_v25 = vpack.c.bf16 %v1909_v24, %v1909_v24 }
0x1acd   :  { %1961 = vrot.lane.b32.xlu0 %v1959_v25, %s3602_s10 }
0x1b33   :  { %v1914_v27 = vpop.permute.xlu1 %1913 }
0x1b34   :  { %3212 = vmatmul.mubr.msk.bf16.vlgmr.msra.gmra.mxu1 %vm83_vm1, %v1914_v27 }
0x1b35   :  { %3224 = vmatpush3.bf16.msra.mxu1 %v4085_v3  ;;  %3227 = vmatprep.mubr.msk.bf16.mxu1 %vm3600_vm0, %v3598_v1 }
0x1b36   :  { %3225 = vmatprep.subr.bf16.mxu1 %v3598_v1 }
0x1b39   :  { %3226 = vmatpush3.bf16.msra.mxu1 %v4098_v5 }
0x1b3a   :  { %3239 = vmatprep.subr.bf16.mxu1 %v3598_v1 }
0x1b3f   :  { %v1962_v14 = vpop.permute.xlu0 %1961 }
0x1b40   :  { %3220 = vmatmul.mubr.msk.bf16.vlgmr.msra.gmra.mxu0 %vm83_vm1, %v1962_v14 }
0x1b41   :  { %3232 = vmatpush3.bf16.msra.mxu0 %v4107_v51  ;;  %3235 = vmatprep.mubr.msk.bf16.mxu0 %vm3600_vm0, %v3598_v1 }
0x1b42   :  { %3233 = vmatprep.subr.bf16.mxu0 %v3598_v1 }
0x1b45   :  { %3234 = vmatpush3.bf16.msra.mxu0 %v4116_v58 }
0x1b46   :  { %3247 = vmatprep.subr.bf16.mxu0 %v3598_v1 }
0x1bf4   :  { %v1952_v28 = vpop.f32.mrf.mxu1 }
0x1bf5   :  { %v1958_v30 = vadd.f32 %v1952_v28, %v4168_v49 }
0x1bf6   :  { %v3213_v31 = vpop.f32.mrf.mxu1 }
0x1bf7   :  { %3494 = vtanh.f32 %v1958_v30  ;;  %v2928_v42 = vmul.f32 -1.442695, %v1958_v30 }
0x1bf8   :  { %v1955_v4 = vpop.f32.mrf.mxu1 }
0x1bfa   :  { %v3214_v33 = vpop.f32.mrf.mxu1 }
0x1c00   :  { %v2000_v34 = vpop.f32.mrf.mxu0 }
0x1c01   :  { %v2007_v36 = vrot.slane %v2000_v34, 4 }
0x1c02   :  { %v3221_v26 = vpop.f32.mrf.mxu0 }
0x1c03   :  { %v2009_v7 = vadd.f32 %v2007_v36, %v4174_v18 }
0x1c04   :  { %v3495_v37 = vpop.eup %3494  ;;  %v2003_v39 = vpop.f32.mrf.mxu0 }
0x1c05   :  { %3496 = vtanh.f32 %v2009_v7  ;;  %2022 = vrot.lane.b32.xlu1 %v3495_v37, %s3601_s4  ;;  %v2929_v32 = vmul.f32 -1.442695, %v2009_v7 }
0x1c06   :  { %v3222_v2 = vpop.f32.mrf.mxu0  ;;  %3498 = vpow2.f32 %v2928_v42 }
0x1c07   :  { %3500 = vpow2.f32 %v2929_v32 }
0x1c12   :  { %v3497_v40 = vpop.eup %3496 }
0x1c13   :  { %2049 = vrot.lane.b32.xlu0 %v3497_v40, %s3601_s4  ;;  %v3499_v38 = vpop.eup %3498 }
0x1c14   :  { %v2013_v41 = vadd.f32 1.0, %v3499_v38  ;;  %v3501_v43 = vpop.eup %3500 }
0x1c15   :  { %v2040_v44 = vadd.f32 1.0, %v3501_v43 }
0x1c16   :  { %3502 = vrcp.f32 %v2013_v41 }
0x1c17   :  { %3504 = vrcp.f32 %v2040_v44 }
0x1c23   :  { %v3503_v47 = vpop.eup %3502 }
0x1c24   :  { %v3505_v50 = vpop.eup %3504  ;;  %v2020_v57 = vmul.f32 %v3503_v47, %v2018_v17 }
0x1c25   :  { %v2047_v8 = vmul.f32 %v3505_v50, %v2045_v15 }
0x1c77   :  { %v2023_v29 = vpop.permute.xlu1 %2022 }
0x1c78   :  { %v2025_v48 = vmul.f32 %v3503_v47, %v2023_v29 }
0x1c7a   :  { %2027 = vrot.lane.b32.xlu1 %v2025_v48, %s3602_s10 }
0x1c85   :  { %v2050_v52 = vpop.permute.xlu0 %2049 }
0x1c86   :  { %v2052_v35 = vmul.f32 %v3505_v50, %v2050_v52 }
0x1c88   :  { %2054 = vrot.lane.b32.xlu0 %v2052_v35, %s3602_s10 }
0x1cec   :  { %v2028_v21 = vpop.permute.xlu1 %2027 }
0x1ced   :  { %v4248_v9 = vadd.f32 %v2028_v21, %v2020_v57 }
0x1cef   :  { %3506 = vtanh.f32 %v4248_v9  ;;  %v2172_v32 = vrot.slane %v4248_v9, 4 }
0x1cfa   :  { %v2055_v6 = vpop.permute.xlu0 %2054 }
0x1cfb   :  { %v4252_v0 = vadd.f32 %v2055_v6, %v2047_v8 }
0x1cfc   :  { %v3507_v62 = vpop.eup %3506 }
0x1cfd   :  { %3508 = vtanh.f32 %v4252_v0  ;;  %2033 = vrot.lane.b32.xlu1 %v3507_v62, %s3601_s4  ;;  %v2199_v44 = vrot.slane %v4252_v0, 4 }
0x1d0a   :  { %v3509_v59 = vpop.eup %3508 }
0x1d0b   :  { %2060 = vrot.lane.b32.xlu0 %v3509_v59, %s3601_s4 }
0x1d6f   :  { %v2034_v56 = vpop.permute.xlu1 %2033 }
0x1d70   :  { %v2036_v55 = vmul.f32 %v3503_v47, %v2034_v56 }
0x1d72   :  { %v2064_v53 = vpack.c.bf16 %v2036_v55, %v2036_v55 }
0x1d74   :  { %2066 = vrot.lane.b32.xlu0 %v2064_v53, %s3602_s10 }
0x1d7d   :  { %v2061_v63 = vpop.permute.xlu0 %2060 }
0x1d7e   :  { %v2063_v54 = vmul.f32 %v3505_v50, %v2061_v63 }
0x1d80   :  { %v2115_v60 = vpack.c.bf16 %v2063_v54, %v2063_v54 }
0x1d82   :  { %v2117_v10 = vrot.slane %v2115_v60, 2 }
0x1d84   :  { %2118 = vrot.lane.b32.xlu1 %v2117_v10, %s3602_s10 }
0x1de6   :  { %v2067_v61 = vpop.permute.xlu0 %2066 }
0x1de7   :  { %3228 = vmatmul.mubr.msk.bf16.vlgmr.msra.gmra.mxu1 %vm83_vm1, %v2067_v61 }
0x1de8   :  { %3240 = vmatpush3.bf16.msra.mxu1 %v4085_v3  ;;  %3243 = vmatprep.mubr.msk.bf16.mxu1 %vm3600_vm0, %v3598_v1 }
0x1de9   :  { %3241 = vmatprep.subr.bf16.mxu1 %v3598_v1 }
0x1dec   :  { %3242 = vmatpush3.bf16.msra.mxu1 %v4098_v5 }
0x1ded   :  { %3255 = vmatprep.subr.bf16.mxu1 %v3598_v1 }
0x1df6   :  { %v2119_v13 = vpop.permute.xlu1 %2118 }
0x1df7   :  { %3236 = vmatmul.mubr.msk.bf16.vlgmr.msra.gmra.mxu0 %vm83_vm1, %v2119_v13 }
0x1df8   :  { %3248 = vmatpush3.bf16.msra.mxu0 %v4107_v51  ;;  %3251 = vmatprep.mubr.msk.bf16.mxu0 %vm3600_vm0, %v3598_v1 }
0x1df9   :  { %3249 = vmatprep.subr.bf16.mxu0 %v3598_v1 }
0x1dfc   :  { %3250 = vmatpush3.bf16.msra.mxu0 %v4116_v58 }
0x1dfd   :  { %3263 = vmatprep.subr.bf16.mxu0 %v3598_v1 }
0x1ea7   :  { %v2105_v16 = vpop.f32.mrf.mxu1 }
0x1ea8   :  { %v2112_v19 = vrot.slane %v2105_v16, 4 }
0x1ea9   :  { %v3229_v22 = vpop.f32.mrf.mxu1 }
0x1eaa   :  { %v2114_v11 = vadd.f32 %v2112_v19, %v4168_v49 }
0x1eab   :  { %v2108_v23 = vpop.f32.mrf.mxu1 }
0x1eac   :  { %3510 = vtanh.f32 %v2114_v11  ;;  %v2932_v33 = vmul.f32 -1.442695, %v2114_v11 }
0x1ead   :  { %v3230_v24 = vpop.f32.mrf.mxu1 }
0x1eb7   :  { %v2157_v25 = vpop.f32.mrf.mxu0 }
0x1eb8   :  { %v2163_v27 = vadd.f32 %v2157_v25, %v4174_v18 }
0x1eb9   :  { %v3511_v14 = vpop.eup %3510  ;;  %v3237_v28 = vpop.f32.mrf.mxu0 }
0x1eba   :  { %3512 = vtanh.f32 %v2163_v27  ;;  %2176 = vrot.lane.b32.xlu1 %v3511_v14, %s3601_s4  ;;  %v2933_v34 = vmul.f32 -1.442695, %v2163_v27 }
0x1ebb   :  { %v2160_v30 = vpop.f32.mrf.mxu0  ;;  %3514 = vpow2.f32 %v2932_v33 }
0x1ebc   :  { %3516 = vpow2.f32 %v2933_v34 }
0x1ebd   :  { %v3238_v31 = vpop.f32.mrf.mxu0 }
0x1ec7   :  { %v3513_v4 = vpop.eup %3512 }
0x1ec8   :  { %2203 = vrot.lane.b32.xlu0 %v3513_v4, %s3601_s4  ;;  %v3515_v49 = vpop.eup %3514 }
0x1ec9   :  { %v2167_v36 = vadd.f32 1.0, %v3515_v49  ;;  %v3517_v26 = vpop.eup %3516 }
0x1eca   :  { %v2194_v7 = vadd.f32 1.0, %v3517_v26 }
0x1ecb   :  { %3518 = vrcp.f32 %v2167_v36 }
0x1ecc   :  { %3520 = vrcp.f32 %v2194_v7 }
0x1ed8   :  { %v3519_v18 = vpop.eup %3518 }
0x1ed9   :  { %v3521_v2 = vpop.eup %3520  ;;  %v2174_v38 = vmul.f32 %v3519_v18, %v2172_v32 }
0x1eda   :  { %v2201_v47 = vmul.f32 %v3521_v2, %v2199_v44 }
0x1f2c   :  { %v2177_v37 = vpop.permute.xlu1 %2176 }
0x1f2d   :  { %v2179_v39 = vmul.f32 %v3519_v18, %v2177_v37 }
0x1f2f   :  { %2181 = vrot.lane.b32.xlu1 %v2179_v39, %s3602_s10 }
0x1f3a   :  { %v2204_v40 = vpop.permute.xlu0 %2203 }
0x1f3b   :  { %v2206_v42 = vmul.f32 %v3521_v2, %v2204_v40 }
0x1f3d   :  { %2208 = vrot.lane.b32.xlu0 %v2206_v42, %s3602_s10 }
0x1fa1   :  { %v2182_v41 = vpop.permute.xlu1 %2181 }
0x1fa2   :  { %v4280_v43 = vadd.f32 %v2182_v41, %v2174_v38 }
0x1fa4   :  { %3522 = vtanh.f32 %v4280_v43  ;;  %v2326_v34 = vrot.slane %v4280_v43, 4 }
0x1faf   :  { %v2209_v29 = vpop.permute.xlu0 %2208 }
0x1fb0   :  { %v4284_v48 = vadd.f32 %v2209_v29, %v2201_v47 }
0x1fb1   :  { %v3523_v50 = vpop.eup %3522 }
0x1fb2   :  { %3524 = vtanh.f32 %v4284_v48  ;;  %2187 = vrot.lane.b32.xlu1 %v3523_v50, %s3601_s4  ;;  %v2353_v7 = vrot.slane %v4284_v48, 4 }
0x1fbf   :  { %v3525_v52 = vpop.eup %3524 }
0x1fc0   :  { %2214 = vrot.lane.b32.xlu0 %v3525_v52, %s3601_s4 }
0x2024   :  { %v2188_v35 = vpop.permute.xlu1 %2187 }
0x2025   :  { %v2190_v17 = vmul.f32 %v3519_v18, %v2188_v35 }
0x2027   :  { %v2218_v57 = vpack.c.bf16 %v2190_v17, %v2190_v17 }
0x2029   :  { %v2220_v21 = vrot.slane %v2218_v57, 2 }
0x202b   :  { %2221 = vrot.lane.b32.xlu1 %v2220_v21, %s3602_s10 }
0x2032   :  { %v2215_v9 = vpop.permute.xlu0 %2214 }
0x2033   :  { %v2217_v15 = vmul.f32 %v3521_v2, %v2215_v9 }
0x2035   :  { %v2267_v8 = vpack.c.bf16 %v2217_v15, %v2217_v15 }
0x2037   :  { %2269 = vrot.lane.b32.xlu0 %v2267_v8, %s3602_s10 }
0x209d   :  { %v2222_v6 = vpop.permute.xlu1 %2221 }
0x209e   :  { %3244 = vmatmul.mubr.msk.bf16.vlgmr.msra.gmra.mxu1 %vm83_vm1, %v2222_v6 }
0x209f   :  { %3256 = vmatpush3.bf16.msra.mxu1 %v4085_v3  ;;  %3259 = vmatprep.mubr.msk.bf16.mxu1 %vm3600_vm0, %v3598_v1 }
0x20a0   :  { %3257 = vmatprep.subr.bf16.mxu1 %v3598_v1 }
0x20a3   :  { %3258 = vmatpush3.bf16.msra.mxu1 %v4098_v5 }
0x20a4   :  { %3271 = vmatprep.subr.bf16.mxu1 %v3598_v1 }
0x20a9   :  { %v2270_v0 = vpop.permute.xlu0 %2269 }
0x20aa   :  { %3252 = vmatmul.mubr.msk.bf16.vlgmr.msra.gmra.mxu0 %vm83_vm1, %v2270_v0 }
0x20ab   :  { %3264 = vmatpush3.bf16.msra.mxu0 %v4107_v51  ;;  %3267 = vmatprep.mubr.msk.bf16.mxu0 %vm3600_vm0, %v3598_v1 }
0x20ac   :  { %3265 = vmatprep.subr.bf16.mxu0 %v3598_v1 }
0x20af   :  { %3266 = vmatpush3.bf16.msra.mxu0 %v4116_v58 }
0x20b0   :  { %3279 = vmatprep.subr.bf16.mxu0 %v3598_v1 }
0x215e   :  { %v2260_v62 = vpop.f32.mrf.mxu1 }
0x215f   :  { %v2266_v59 = vadd.f32 %v2260_v62, %v4172_v20 }
0x2160   :  { %v3245_v56 = vpop.f32.mrf.mxu1 }
0x2161   :  { %3526 = vtanh.f32 %v2266_v59  ;;  %v2936_v22 = vmul.f32 -1.442695, %v2266_v59 }
0x2162   :  { %v2263_v55 = vpop.f32.mrf.mxu1 }
0x2164   :  { %v3246_v53 = vpop.f32.mrf.mxu1 }
0x216a   :  { %v2308_v63 = vpop.f32.mrf.mxu0 }
0x216b   :  { %v2315_v54 = vrot.slane %v2308_v63, 4 }
0x216c   :  { %v3253_v60 = vpop.f32.mrf.mxu0 }
0x216d   :  { %v2317_v10 = vadd.f32 %v2315_v54, %v4170_v45 }
0x216e   :  { %v3527_v61 = vpop.eup %3526  ;;  %v2311_v13 = vpop.f32.mrf.mxu0 }
0x216f   :  { %3528 = vtanh.f32 %v2317_v10  ;;  %2330 = vrot.lane.b32.xlu1 %v3527_v61, %s3601_s4  ;;  %v2937_v11 = vmul.f32 -1.442695, %v2317_v10 }
0x2170   :  { %v3254_v16 = vpop.f32.mrf.mxu0  ;;  %3530 = vpow2.f32 %v2936_v22 }
0x2171   :  { %3532 = vpow2.f32 %v2937_v11 }
0x217c   :  { %v3529_v19 = vpop.eup %3528 }
0x217d   :  { %2357 = vrot.lane.b32.xlu0 %v3529_v19, %s3601_s4  ;;  %v3531_v23 = vpop.eup %3530 }
0x217e   :  { %v2321_v24 = vadd.f32 1.0, %v3531_v23  ;;  %v3533_v25 = vpop.eup %3532 }
0x217f   :  { %v2348_v27 = vadd.f32 1.0, %v3533_v25 }
0x2180   :  { %3534 = vrcp.f32 %v2321_v24 }
0x2181   :  { %3536 = vrcp.f32 %v2348_v27 }
0x218d   :  { %v3535_v14 = vpop.eup %3534 }
0x218e   :  { %v3537_v31 = vpop.eup %3536  ;;  %v2328_v49 = vmul.f32 %v3535_v14, %v2326_v34 }
0x218f   :  { %v2355_v18 = vmul.f32 %v3537_v31, %v2353_v7  ;;  %v3596_v7 = vld [vmem:[%s4408_s7 + $0x8] sm:$0xff]  }
0x21e1   :  { %v2331_v28 = vpop.permute.xlu1 %2330 }
0x21e2   :  { %v2333_v30 = vmul.f32 %v3535_v14, %v2331_v28 }
0x21e4   :  { %2335 = vrot.lane.b32.xlu1 %v2333_v30, %s3602_s10 }
0x21ef   :  { %v2358_v4 = vpop.permute.xlu0 %2357 }
0x21f0   :  { %v2360_v33 = vmul.f32 %v3537_v31, %v2358_v4 }
0x21f2   :  { %2362 = vrot.lane.b32.xlu0 %v2360_v33, %s3602_s10 }
0x2256   :  { %v2336_v36 = vpop.permute.xlu1 %2335 }
0x2257   :  { %v4312_v26 = vadd.f32 %v2336_v36, %v2328_v49  ;;  %v3594_v49 = vld [vmem:[%s4407_s6 + $0x8] sm:$0xff]   ;;  %v3595_v36 = vld [vmem:[%s4407_s6] sm:$0xff]  }
0x2259   :  { %3538 = vtanh.f32 %v4312_v26  ;;  %v2480_v10 = vrot.slane %v4312_v26, 4 }
0x2264   :  { %v2363_v37 = vpop.permute.xlu0 %2362 }
0x2265   :  { %v4316_v39 = vadd.f32 %v2363_v37, %v2355_v18  ;;  %v3597_v18 = vld [vmem:[%s4408_s7] sm:$0xff]  }
0x2266   :  { %v3539_v2 = vpop.eup %3538 }
0x2267   :  { %3540 = vtanh.f32 %v4316_v39  ;;  %2341 = vrot.lane.b32.xlu1 %v3539_v2, %s3601_s4  ;;  %v2507_v19 = vrot.slane %v4316_v39, 4 }
0x2274   :  { %v3541_v40 = vpop.eup %3540 }
0x2275   :  { %2368 = vrot.lane.b32.xlu0 %v3541_v40, %s3601_s4 }
0x22d9   :  { %v2342_v42 = vpop.permute.xlu1 %2341 }
0x22da   :  { %v2344_v32 = vmul.f32 %v3535_v14, %v2342_v42 }
0x22dc   :  { %v2372_v38 = vpack.c.bf16 %v2344_v32, %v2344_v32 }
0x22de   :  { %2374 = vrot.lane.b32.xlu0 %v2372_v38, %s3602_s10 }
0x22e7   :  { %v2369_v41 = vpop.permute.xlu0 %2368 }
0x22e8   :  { %v2371_v43 = vmul.f32 %v3537_v31, %v2369_v41 }
0x22ea   :  { %v2423_v44 = vpack.c.bf16 %v2371_v43, %v2371_v43 }
0x22ec   :  { %v2425_v47 = vrot.slane %v2423_v44, 2 }
0x22ee   :  { %2426 = vrot.lane.b32.xlu1 %v2425_v47, %s3602_s10 }
0x2350   :  { %v2375_v29 = vpop.permute.xlu0 %2374 }
0x2351   :  { %3260 = vmatmul.mubr.msk.bf16.vlgmr.msra.gmra.mxu1 %vm83_vm1, %v2375_v29 }
0x2352   :  { %3272 = vmatpush3.bf16.msra.mxu1 %v4085_v3  ;;  %3275 = vmatprep.mubr.msk.bf16.mxu1 %vm3600_vm0, %v3598_v1 }
0x2353   :  { %3273 = vmatprep.subr.bf16.mxu1 %v3598_v1 }
0x2356   :  { %3274 = vmatpush3.bf16.msra.mxu1 %v4098_v5 }
0x2357   :  { %3287 = vmatprep.subr.bf16.mxu1 %v3598_v1 }
0x2360   :  { %v2427_v48 = vpop.permute.xlu1 %2426 }
0x2361   :  { %3268 = vmatmul.mubr.msk.bf16.vlgmr.msra.gmra.mxu0 %vm83_vm1, %v2427_v48 }
0x2362   :  { %3280 = vmatpush3.bf16.msra.mxu0 %v4107_v51  ;;  %3283 = vmatprep.mubr.msk.bf16.mxu0 %vm3600_vm0, %v3598_v1 }
0x2363   :  { %3281 = vmatprep.subr.bf16.mxu0 %v3598_v1 }
0x2366   :  { %3282 = vmatpush3.bf16.msra.mxu0 %v4116_v58 }
0x2367   :  { %3295 = vmatprep.subr.bf16.mxu0 %v3598_v1 }
0x2411   :  { %v2413_v3 = vpop.f32.mrf.mxu1 }
0x2412   :  { %v2420_v50 = vrot.slane %v2413_v3, 4 }
0x2413   :  { %v3261_v52 = vpop.f32.mrf.mxu1 }
0x2414   :  { %v2422_v5 = vadd.f32 %v2420_v50, %v4172_v20 }
0x2415   :  { %v2416_v35 = vpop.f32.mrf.mxu1 }
0x2416   :  { %3542 = vtanh.f32 %v2422_v5  ;;  %v2940_v6 = vmul.f32 -1.442695, %v2422_v5 }
0x2417   :  { %v3262_v17 = vpop.f32.mrf.mxu1 }
0x2421   :  { %v2465_v57 = vpop.f32.mrf.mxu0 }
0x2422   :  { %v2471_v51 = vadd.f32 %v2465_v57, %v4170_v45 }
0x2423   :  { %v3543_v21 = vpop.eup %3542  ;;  %v3269_v9 = vpop.f32.mrf.mxu0 }
0x2424   :  { %3544 = vtanh.f32 %v2471_v51  ;;  %2484 = vrot.lane.b32.xlu1 %v3543_v21, %s3601_s4  ;;  %v2941_v0 = vmul.f32 -1.442695, %v2471_v51 }
0x2425   :  { %v2468_v15 = vpop.f32.mrf.mxu0  ;;  %3546 = vpow2.f32 %v2940_v6 }
0x2426   :  { %3548 = vpow2.f32 %v2941_v0 }
0x2427   :  { %v3270_v58 = vpop.f32.mrf.mxu0 }
0x2431   :  { %v3545_v8 = vpop.eup %3544 }
0x2432   :  { %2511 = vrot.lane.b32.xlu0 %v3545_v8, %s3601_s4  ;;  %v3547_v20 = vpop.eup %3546 }
0x2433   :  { %v2475_v62 = vadd.f32 1.0, %v3547_v20  ;;  %v3549_v59 = vpop.eup %3548 }
0x2434   :  { %v2502_v56 = vadd.f32 1.0, %v3549_v59 }
0x2435   :  { %3550 = vrcp.f32 %v2475_v62 }
0x2436   :  { %3552 = vrcp.f32 %v2502_v56 }
0x2442   :  { %v3551_v45 = vpop.eup %3550 }
0x2443   :  { %v3553_v63 = vpop.eup %3552  ;;  %v2482_v61 = vmul.f32 %v3551_v45, %v2480_v10 }
0x2444   :  { %v2509_v22 = vmul.f32 %v3553_v63, %v2507_v19 }
0x2496   :  { %v2485_v55 = vpop.permute.xlu1 %2484 }
0x2497   :  { %v2487_v53 = vmul.f32 %v3551_v45, %v2485_v55 }
0x2499   :  { %2489 = vrot.lane.b32.xlu1 %v2487_v53, %s3602_s10 }
0x24a4   :  { %v2512_v54 = vpop.permute.xlu0 %2511 }
0x24a5   :  { %v2514_v60 = vmul.f32 %v3553_v63, %v2512_v54 }
0x24a7   :  { %2516 = vrot.lane.b32.xlu0 %v2514_v60, %s3602_s10 }
0x250b   :  { %v2490_v13 = vpop.permute.xlu1 %2489 }
0x250c   :  { %v4344_v16 = vadd.f32 %v2490_v13, %v2482_v61 }
0x250e   :  { %3554 = vtanh.f32 %v4344_v16  ;;  %v2634_v58 = vrot.slane %v4344_v16, 4 }
0x2519   :  { %v2517_v11 = vpop.permute.xlu0 %2516 }
0x251a   :  { %v4348_v23 = vadd.f32 %v2517_v11, %v2509_v22 }
0x251b   :  { %v3555_v24 = vpop.eup %3554 }
0x251c   :  { %3556 = vtanh.f32 %v4348_v23  ;;  %2495 = vrot.lane.b32.xlu1 %v3555_v24, %s3601_s4  ;;  %v2661_v20 = vrot.slane %v4348_v23, 4 }
0x2529   :  { %v3557_v25 = vpop.eup %3556 }
0x252a   :  { %2522 = vrot.lane.b32.xlu0 %v3557_v25, %s3601_s4 }
0x258e   :  { %v2496_v27 = vpop.permute.xlu1 %2495 }
0x258f   :  { %v2498_v14 = vmul.f32 %v3551_v45, %v2496_v27 }
0x2591   :  { %v2526_v28 = vpack.c.bf16 %v2498_v14, %v2498_v14 }
0x2593   :  { %v2528_v30 = vrot.slane %v2526_v28, 2 }
0x2595   :  { %2529 = vrot.lane.b32.xlu1 %v2528_v30, %s3602_s10 }
0x259c   :  { %v2523_v31 = vpop.permute.xlu0 %2522 }
0x259d   :  { %v2525_v4 = vmul.f32 %v3553_v63, %v2523_v31 }
0x259f   :  { %v2575_v33 = vpack.c.bf16 %v2525_v4, %v2525_v4 }
0x25a1   :  { %2577 = vrot.lane.b32.xlu0 %v2575_v33, %s3602_s10 }
0x2607   :  { %v2530_v34 = vpop.permute.xlu1 %2529 }
0x2608   :  { %3276 = vmatmul.mubr.msk.bf16.vlgmr.msra.gmra.mxu1 %vm83_vm1, %v2530_v34 }
0x2609   :  { %3288 = vmatpush3.bf16.msra.mxu1 %v3594_v49  ;;  %3291 = vmatprep.mubr.msk.bf16.mxu1 %vm3600_vm0, %v3598_v1 }
0x260a   :  { %3289 = vmatprep.subr.bf16.mxu1 %v3598_v1 }
0x260d   :  { %3290 = vmatpush3.bf16.msra.mxu1 %v3595_v36 }
0x2613   :  { %v2578_v26 = vpop.permute.xlu0 %2577 }
0x2614   :  { %3284 = vmatmul.mubr.msk.bf16.vlgmr.msra.gmra.mxu0 %vm83_vm1, %v2578_v26 }
0x2615   :  { %3296 = vmatpush3.bf16.msra.mxu0 %v3596_v7  ;;  %3299 = vmatprep.mubr.msk.bf16.mxu0 %vm3600_vm0, %v3598_v1 }
0x2616   :  { %3297 = vmatprep.subr.bf16.mxu0 %v3598_v1 }
0x2619   :  { %3298 = vmatpush3.bf16.msra.mxu0 %v3597_v18 }
0x26c8   :  { %v2568_v37 = vpop.f32.mrf.mxu1 }
0x26c9   :  { %v2574_v39 = vadd.f32 %v2568_v37, %v4176_v12 }
0x26ca   :  { %v3277_v2 = vpop.f32.mrf.mxu1 }
0x26cb   :  { %3558 = vtanh.f32 %v2574_v39  ;;  %v2944_v48 = vmul.f32 -1.442695, %v2574_v39 }
0x26cc   :  { %v2571_v40 = vpop.f32.mrf.mxu1 }
0x26ce   :  { %v3278_v42 = vpop.f32.mrf.mxu1 }
0x26d4   :  { %v2616_v32 = vpop.f32.mrf.mxu0 }
0x26d5   :  { %v2623_v38 = vrot.slane %v2616_v32, 4 }
0x26d6   :  { %v3285_v41 = vpop.f32.mrf.mxu0 }
0x26d7   :  { %v2625_v43 = vadd.f32 %v2623_v38, %v4166_v46 }
0x26d8   :  { %v3559_v44 = vpop.eup %3558  ;;  %v2619_v47 = vpop.f32.mrf.mxu0 }
0x26d9   :  { %3560 = vtanh.f32 %v2625_v43  ;;  %2638 = vrot.lane.b32.xlu1 %v3559_v44, %s3601_s4  ;;  %v2945_v3 = vmul.f32 -1.442695, %v2625_v43 }
0x26da   :  { %v3286_v1 = vpop.f32.mrf.mxu0  ;;  %3562 = vpow2.f32 %v2944_v48 }
0x26db   :  { %3564 = vpow2.f32 %v2945_v3 }
0x26e6   :  { %v3561_v29 = vpop.eup %3560 }
0x26e7   :  { %2665 = vrot.lane.b32.xlu0 %v3561_v29, %s3601_s4  ;;  %v3563_v50 = vpop.eup %3562 }
0x26e8   :  { %v2629_v52 = vadd.f32 1.0, %v3563_v50  ;;  %v3565_v5 = vpop.eup %3564 }
0x26e9   :  { %v2656_v35 = vadd.f32 1.0, %v3565_v5 }
0x26ea   :  { %3566 = vrcp.f32 %v2629_v52 }
0x26eb   :  { %3568 = vrcp.f32 %v2656_v35 }
0x26f7   :  { %v3567_v17 = vpop.eup %3566 }
0x26f8   :  { %v3569_v21 = vpop.eup %3568  ;;  %v2636_v8 = vmul.f32 %v3567_v17, %v2634_v58 }
0x26f9   :  { %v2663_v62 = vmul.f32 %v3569_v21, %v2661_v20 }
0x274b   :  { %v2639_v57 = vpop.permute.xlu1 %2638 }
0x274c   :  { %v2641_v51 = vmul.f32 %v3567_v17, %v2639_v57 }
0x274e   :  { %2643 = vrot.lane.b32.xlu1 %v2641_v51, %s3602_s10 }
0x2759   :  { %v2666_v9 = vpop.permute.xlu0 %2665 }
0x275a   :  { %v2668_v15 = vmul.f32 %v3569_v21, %v2666_v9 }
0x275c   :  { %2670 = vrot.lane.b32.xlu0 %v2668_v15, %s3602_s10 }
0x27c0   :  { %v2644_v6 = vpop.permute.xlu1 %2643 }
0x27c1   :  { %v2646_v0 = vadd.f32 %v2644_v6, %v2636_v8 }
0x27c3   :  { %3570 = vtanh.f32 %v2646_v0  ;;  %v2788_v32 = vrot.slane %v2646_v0, 4 }
0x27ce   :  { %v2671_v59 = vpop.permute.xlu0 %2670 }
0x27cf   :  { %v2673_v56 = vadd.f32 %v2671_v59, %v2663_v62 }
0x27d0   :  { %v3571_v45 = vpop.eup %3570 }
0x27d1   :  { %3572 = vtanh.f32 %v2673_v56  ;;  %2649 = vrot.lane.b32.xlu1 %v3571_v45, %s3601_s4  ;;  %v2815_v44 = vrot.slane %v2673_v56, 4 }
0x27de   :  { %v3573_v55 = vpop.eup %3572 }
0x27df   :  { %2676 = vrot.lane.b32.xlu0 %v3573_v55, %s3601_s4 }
0x2843   :  { %v2650_v53 = vpop.permute.xlu1 %2649 }
0x2844   :  { %v2652_v63 = vmul.f32 %v3567_v17, %v2650_v53 }
0x2846   :  { %v2680_v54 = vpack.c.bf16 %v2652_v63, %v2652_v63 }
0x2848   :  { %2682 = vrot.lane.b32.xlu0 %v2680_v54, %s3602_s10 }
0x2851   :  { %v2677_v60 = vpop.permute.xlu0 %2676 }
0x2852   :  { %v2679_v10 = vmul.f32 %v3569_v21, %v2677_v60 }
0x2854   :  { %v2731_v61 = vpack.c.bf16 %v2679_v10, %v2679_v10 }
0x2856   :  { %v2733_v13 = vrot.slane %v2731_v61, 2 }
0x2858   :  { %2734 = vrot.lane.b32.xlu1 %v2733_v13, %s3602_s10 }
0x28ba   :  { %v2683_v16 = vpop.permute.xlu0 %2682 }
0x28bb   :  { %3292 = vmatmul.mubr.msk.bf16.vlgmr.msra.gmra.mxu1 %vm83_vm1, %v2683_v16 }
0x28ca   :  { %v2735_v19 = vpop.permute.xlu1 %2734 }
0x28cb   :  { %3300 = vmatmul.mubr.msk.bf16.vlgmr.msra.gmra.mxu0 %vm83_vm1, %v2735_v19 }
0x297b   :  { %v2721_v22 = vpop.f32.mrf.mxu1 }
0x297c   :  { %v2728_v11 = vrot.slane %v2721_v22, 4 }
0x297d   :  { %v3293_v23 = vpop.f32.mrf.mxu1 }
0x297e   :  { %v2730_v24 = vadd.f32 %v2728_v11, %v4176_v12 }
0x297f   :  { %v2724_v25 = vpop.f32.mrf.mxu1 }
0x2980   :  { %3574 = vtanh.f32 %v2730_v24  ;;  %v2948_v49 = vmul.f32 -1.442695, %v2730_v24 }
0x2981   :  { %v3294_v27 = vpop.f32.mrf.mxu1 }
0x298b   :  { %v2773_v14 = vpop.f32.mrf.mxu0 }
0x298c   :  { %v2779_v28 = vadd.f32 %v2773_v14, %v4166_v46 }
0x298d   :  { %v3575_v30 = vpop.eup %3574  ;;  %v3301_v31 = vpop.f32.mrf.mxu0 }
0x298e   :  { %3576 = vtanh.f32 %v2779_v28  ;;  %2792 = vrot.lane.b32.xlu1 %v3575_v30, %s3601_s4  ;;  %v2949_v36 = vmul.f32 -1.442695, %v2779_v28 }
0x298f   :  { %v2776_v4 = vpop.f32.mrf.mxu0  ;;  %3578 = vpow2.f32 %v2948_v49 }
0x2990   :  { %3580 = vpow2.f32 %v2949_v36 }
0x2991   :  { %v3302_v33 = vpop.f32.mrf.mxu0 }
0x299b   :  { %v3577_v34 = vpop.eup %3576 }
0x299c   :  { %2819 = vrot.lane.b32.xlu0 %v3577_v34, %s3601_s4  ;;  %v3579_v12 = vpop.eup %3578 }
0x299d   :  { %v2783_v26 = vadd.f32 1.0, %v3579_v12  ;;  %v3581_v7 = vpop.eup %3580 }
0x299e   :  { %v2810_v18 = vadd.f32 1.0, %v3581_v7 }
0x299f   :  { %3582 = vrcp.f32 %v2783_v26 }
0x29a0   :  { %3584 = vrcp.f32 %v2810_v18 }
0x29ac   :  { %v3583_v46 = vpop.eup %3582 }
0x29ad   :  { %v3585_v2 = vpop.eup %3584  ;;  %v2790_v38 = vmul.f32 %v3583_v46, %v2788_v32 }
0x29ae   :  { %v2817_v47 = vmul.f32 %v3585_v2, %v2815_v44 }
0x2a00   :  { %v2793_v37 = vpop.permute.xlu1 %2792 }
0x2a01   :  { %v2795_v39 = vmul.f32 %v3583_v46, %v2793_v37 }
0x2a03   :  { %2797 = vrot.lane.b32.xlu1 %v2795_v39, %s3602_s10 }
0x2a0e   :  { %v2820_v40 = vpop.permute.xlu0 %2819 }
0x2a0f   :  { %v2822_v42 = vmul.f32 %v3585_v2, %v2820_v40 }
0x2a11   :  { %2824 = vrot.lane.b32.xlu0 %v2822_v42, %s3602_s10 }
0x2a75   :  { %v2798_v41 = vpop.permute.xlu1 %2797 }
0x2a76   :  { %v2800_v43 = vadd.f32 %v2798_v41, %v2790_v38 }
0x2a78   :  { %3586 = vtanh.f32 %v2800_v43 }
0x2a83   :  { %v2825_v1 = vpop.permute.xlu0 %2824 }
0x2a84   :  { %v2827_v29 = vadd.f32 %v2825_v1, %v2817_v47 }
0x2a85   :  { %v3587_v48 = vpop.eup %3586 }
0x2a86   :  { %3588 = vtanh.f32 %v2827_v29  ;;  %2803 = vrot.lane.b32.xlu1 %v3587_v48, %s3601_s4 }
0x2a93   :  { %v3589_v3 = vpop.eup %3588 }
0x2a94   :  { %2830 = vrot.lane.b32.xlu0 %v3589_v3, %s3601_s4 }
0x2af8   :  { %v2804_v50 = vpop.permute.xlu1 %2803 }
0x2af9   :  { %v2806_v52 = vmul.f32 %v3583_v46, %v2804_v50 }
0x2afb   :  { %v2835_v17 = vrot.slane %v2806_v52, 2 }
0x2afd   :  { %v2837_v21 = vmul.f32 %v2835_v17, %v2806_v52 }
0x2b06   :  { %v2831_v5 = vpop.permute.xlu0 %2830 }
0x2b07   :  { %v2833_v35 = vmul.f32 %v3585_v2, %v2831_v5 }
0x2b09   :  { %v2839_v57 = vrot.slane %v2833_v35, 2 }
0x2b0b   :  { %v2841_v51 = vmul.f32 %v2839_v57, %v2833_v35 }
0x2b0d   :  { %v2843_v9 = vrot.slane %v2841_v51, 4 }
0x2b0f   :  { %v2845_v15 = vadd.f32 %v2843_v9, %v2837_v21 }
0x2b11   :  { %2847 = vrot.lane.b32.xlu0 %v2845_v15, %s3602_s10 }
0x2b83   :  { %v2848_v58 = vpop.permute.xlu0 %2847 }
0x2b84   :  { %v2851_v8 = vsel %vm2850_vm7, %v2848_v58, 0.0 }
0x2b85   :  { %2852 = vadd.xlane.f32.xlu1 %v2851_v8 }
0x2c0e   :  { %v2853_v6 = vpop.xlane.xlu1 %2852 }
0x2c0f   :  { %v2950_v0 = vmul.f32 -1.442695, %v2853_v6 }
0x2c11   :  { %3590 = vpow2.f32 %v2950_v0 }
0x2c1e   :  { %v3591_v20 = vpop.eup %3590 }
0x2c1f   :  { %v2857_v62 = vadd.f32 1.0, %v3591_v20 }
0x2c21   :  { %3592 = vrcp.f32 %v2857_v62 }
0x2c2e   :  { %v3593_v59 = vpop.eup %3592 }
0x2c2f   :  { %2861 = vst.msk [vmem:[%s4410_s9 - $0x4] sm:$0x30] %vm2860_vm8, %v3593_v59 }

</bundles_post_ra>
